<compile_context>
chip_gen: v7x
topology: tpu7x:2x2x1
jax: 0.10.0
libtpu: 0.0.40
codegen_flags: <defaults>
</compile_context>

<pallas_src>
from functools import partial

import numpy as np
import jax
import jax.numpy as jnp
from jax.experimental import pallas as pl
from jax.experimental.pallas import tpu as pltpu

BETA = 0.9          # unused at t=0: hidden state starts at zero -> mem = beta*0 + input
THRESHOLD = 1.0     # snn.Leaky default threshold; spike = (mem - threshold > 0)


def _make_seg_head_kernel(num_features):
    """Build the fused kernel for a fixed number of concatenated feature maps."""

    def kernel(*refs):
        # refs: x_0 .. x_{F-1}, w1, w2, b2, U, out
        #   x_i   : [C, H*W]        channels on sublanes, flattened spatial on lanes
        #   w1    : [F, C, C]       dense1 weight, split per feature map (fused torch.cat)
        #   w2    : [K, C]          predict weight
        #   b2    : [K, 1]          predict bias
        #   U     : [H*W, H4*W4]    kron(Mh, Mw)^T bilinear upsample matrix (align_corners=True)
        #   out   : [K, H4*W4]      lane-dense spike output
        x_refs = refs[:num_features]
        w1_ref, w2_ref, b2_ref, u_ref, out_ref = refs[num_features:]

        # dense1 (1x1 conv, no bias) with the cat fused in: sum of per-feature partial products.
        h = jnp.dot(w1_ref[0], x_refs[0][...], preferred_element_type=jnp.float32)   # [C, HW]
        for i in range(1, num_features):
            h = h + jnp.dot(w1_ref[i], x_refs[i][...], preferred_element_type=jnp.float32)

        # LIF1 spike (zero-initialised membrane at t=0 -> mem == input)
        spk = (h > THRESHOLD).astype(jnp.float32)

        # predict (1x1 conv + bias); lane-dense [K, HW]
        y = jnp.dot(w2_ref[...], spk, preferred_element_type=jnp.float32) + b2_ref[...]

        # 4x bilinear upsample as a single lane-dense matmul, then LIF2 spike.
        up = jnp.dot(y, u_ref[...], preferred_element_type=jnp.float32)              # [K, H4*W4]
        out_ref[...] = (up > THRESHOLD).astype(out_ref.dtype)

    return kernel


def _bilinear_matrix_np(in_size, scale):
    """Interpolation matrix for align_corners=True bilinear upsampling along one axis (numpy)."""
    out_size = in_size * scale
    ratio = (in_size - 1) / (out_size - 1)
    src = np.arange(out_size, dtype=np.float64) * ratio
    i0 = np.clip(np.floor(src).astype(np.int64), 0, in_size - 1)
    i1 = np.clip(i0 + 1, 0, in_size - 1)
    frac = (src - i0).astype(np.float32)
    m = np.zeros((out_size, in_size), dtype=np.float32)
    rows = np.arange(out_size)
    np.add.at(m, (rows, i0), 1.0 - frac)
    np.add.at(m, (rows, i1), frac)
    return m


def _upsample_kron_np(h, w, scale):
    """U[hh*W + ww, oh*W4 + ow] = Mh[oh, hh] * Mw[ow, ww]  -> shape [H*W, H4*W4]."""
    mh = _bilinear_matrix_np(h, scale)              # [H4, H]
    mw = _bilinear_matrix_np(w, scale)              # [W4, W]
    u = mh.T[:, None, :, None] * mw.T[None, :, None, :]     # [H, W, H4, W4]
    return u.reshape(h * w, h * scale * w * scale).astype(np.float32)


@partial(jax.jit, static_argnames=("scale",))
def segmentation_head(xs, w1, w2, b2, scale=4):
    """xs: list of F arrays [B, C, H, W]; w1: [C, C*F]; w2: [K, C]; b2: [K]
    -> [B, K, H*scale, W*scale] spike map."""
    F = len(xs)
    B, C, H, W = xs[0].shape
    K = w2.shape[0]
    HW = H * W
    H4, W4 = H * scale, W * scale

    # Contiguous reshapes only (no transpose, no concatenate) on the activations.
    xs_flat = [x.reshape(B, C, HW) for x in xs]
    # Split dense1 weight per feature map: w1_split[i] == w1[:, i*C:(i+1)*C]  (tiny).
    w1_split = w1.reshape(C, F, C).transpose(1, 0, 2)               # [F, C, C]
    # Compile-time-constant kron upsample matrix (built with numpy -> baked as a constant).
    U = jnp.asarray(_upsample_kron_np(H, W, scale))                 # [HW, H4*W4]

    kernel = _make_seg_head_kernel(F)

    in_specs = [pl.BlockSpec((pl.Squeezed(), C, HW), lambda b: (b, 0, 0)) for _ in range(F)]
    in_specs += [
        pl.BlockSpec((F, C, C), lambda b: (0, 0, 0)),
        pl.BlockSpec((K, C), lambda b: (0, 0)),
        pl.BlockSpec((K, 1), lambda b: (0, 0)),
        pl.BlockSpec((HW, H4 * W4), lambda b: (0, 0)),              # resident in VMEM, DMA'd once
    ]

    out_flat = pl.pallas_call(
        kernel,
        out_shape=jax.ShapeDtypeStruct((B, K, H4 * W4), jnp.float32),
        grid=(B,),
        in_specs=in_specs,
        out_specs=pl.BlockSpec((pl.Squeezed(), K, H4 * W4), lambda b: (b, 0, 0)),
        compiler_params=pltpu.CompilerParams(
            dimension_semantics=("parallel",),
            vmem_limit_bytes=32 * 1024 * 1024,   # ~8.3 MiB footprint incl. double-buffered U
        ),
    )(*xs_flat, w1_split, w2, b2.reshape(K, 1), U)

    return out_flat.reshape(B, K, H4, W4)        # free contiguous reshape


if __name__ == "__main__":
    B, C, H, W = 2, 4, 16, 16
    F = 4            # num_features
    K = 3            # num_classes
    SCALE = 4

    key = jax.random.PRNGKey(0)
    kx, kw1, kw2, kb2 = jax.random.split(key, 4)
    # forward takes a list of num_features feature maps, each [B, C, H, W] (NCHW like PyTorch)
    xs = [jax.random.normal(jax.random.fold_in(kx, i), (B, C, H, W), dtype=jnp.float32)
          for i in range(F)]
    # dense1: Conv2d(C*F, C, 1, bias=False) -> weight [C, C*F] (PyTorch [out, in], 1x1 squeezed)
    w1 = jax.random.normal(kw1, (C, C * F), dtype=jnp.float32) * 0.25
    # predict: Conv2d(C, K, 1) -> weight [K, C]; bias [K]
    w2 = jax.random.normal(kw2, (K, C), dtype=jnp.float32) * 0.5
    b2 = jax.random.normal(kb2, (K,), dtype=jnp.float32) * 0.1

    out = jax.block_until_ready(segmentation_head(xs, w1, w2, b2, scale=SCALE))

    # plain-JAX reference of the same forward semantics
    xcat = jnp.concatenate(xs, axis=1)
    h = jnp.einsum('oc,bchw->bohw', w1, xcat)
    s = (h > THRESHOLD).astype(jnp.float32)
    y = jnp.einsum('oc,bchw->bohw', w2, s) + b2[None, :, None, None]
    Mh = jnp.asarray(_bilinear_matrix_np(H, SCALE))
    Mw = jnp.asarray(_bilinear_matrix_np(W, SCALE))
    up = jnp.einsum('oh,bkhw,pw->bkop', Mh, y, Mw)
    ref = (up > THRESHOLD).astype(jnp.float32)

    assert out.shape == (B, K, H * SCALE, W * SCALE), out.shape
    # Spike outputs are exact {0,1}; tolerate a tiny fraction of flips arising when a
    # pre-threshold value sits within ~1 ulp of the threshold (different f32 accumulation
    # order between the kernel's MXU matmuls and the XLA einsum reference).
    match = float(jnp.mean((out == ref).astype(jnp.float32)))
    assert match > 0.999, f"spike mismatch fraction {1.0 - match:.6f}"
    print("KERNEL_OK")
</pallas_src>

<mosaic_0001>
module attributes {stable_mosaic.version = 11 : i64} {
  func.func @kernel(%arg0: i32, %arg1: memref<1x4x256xf32, #tpu.memory_space<vmem>>, %arg2: memref<1x4x256xf32, #tpu.memory_space<vmem>>, %arg3: memref<1x4x256xf32, #tpu.memory_space<vmem>>, %arg4: memref<1x4x256xf32, #tpu.memory_space<vmem>>, %arg5: memref<4x4x4xf32, #tpu.memory_space<vmem>>, %arg6: memref<3x4xf32, #tpu.memory_space<vmem>>, %arg7: memref<3x1xf32, #tpu.memory_space<vmem>>, %arg8: memref<256x4096xf32, #tpu.memory_space<vmem>>, %arg9: memref<1x3x4096xf32, #tpu.memory_space<vmem>>) attributes {dimension_semantics = [#tpu.dimension_semantics<parallel>], iteration_bounds = array<i64: 2>, scalar_prefetch = 0 : i64, scratch_operands = 0 : i64, tpu.core_type = #tpu.core_type<tc>, window_params = [{transform_indices = @transform_0, window_bounds = array<i64: 1, 4, 256>}, {transform_indices = @transform_1, window_bounds = array<i64: 1, 4, 256>}, {transform_indices = @transform_2, window_bounds = array<i64: 1, 4, 256>}, {transform_indices = @transform_3, window_bounds = array<i64: 1, 4, 256>}, {pipeline_mode = #tpu.pipeline_mode<synchronous>, transform_indices = @transform_4, window_bounds = array<i64: 4, 4, 4>}, {pipeline_mode = #tpu.pipeline_mode<synchronous>, transform_indices = @transform_5, window_bounds = array<i64: 3, 4>}, {pipeline_mode = #tpu.pipeline_mode<synchronous>, transform_indices = @transform_6, window_bounds = array<i64: 3, 1>}, {pipeline_mode = #tpu.pipeline_mode<synchronous>, transform_indices = @transform_7, window_bounds = array<i64: 256, 4096>}, {transform_indices = @transform_8, window_bounds = array<i64: 1, 3, 4096>}]} {
    %c0 = arith.constant 0 : index
    %c0_0 = arith.constant 0 : index
    %c0_1 = arith.constant 0 : index
    %0 = vector.load %arg5[%c0, %c0_0, %c0_1] : memref<4x4x4xf32, #tpu.memory_space<vmem>>, vector<1x4x4xf32>
    %1 = vector.shape_cast %0 : vector<1x4x4xf32> to vector<4x4xf32>
    %c0_2 = arith.constant 0 : index
    %c0_3 = arith.constant 0 : index
    %c0_4 = arith.constant 0 : index
    %2 = vector.load %arg1[%c0_2, %c0_3, %c0_4] : memref<1x4x256xf32, #tpu.memory_space<vmem>>, vector<1x4x256xf32>
    %3 = vector.shape_cast %2 : vector<1x4x256xf32> to vector<4x256xf32>
    %cst = arith.constant dense<0.000000e+00> : vector<4x256xf32>
    %4 = tpu.matmul %1, %3, %cst {dimension_numbers = #tpu.dot_dimension_numbers<[1], [0], [0], [1], [0, 0, 1, 1], [], []>} : vector<4x4xf32>, vector<4x256xf32>, vector<4x256xf32> -> vector<4x256xf32>
    %c1 = arith.constant 1 : index
    %c0_5 = arith.constant 0 : index
    %c0_6 = arith.constant 0 : index
    %5 = vector.load %arg5[%c1, %c0_5, %c0_6] : memref<4x4x4xf32, #tpu.memory_space<vmem>>, vector<1x4x4xf32>
    %6 = vector.shape_cast %5 : vector<1x4x4xf32> to vector<4x4xf32>
    %c0_7 = arith.constant 0 : index
    %c0_8 = arith.constant 0 : index
    %c0_9 = arith.constant 0 : index
    %7 = vector.load %arg2[%c0_7, %c0_8, %c0_9] : memref<1x4x256xf32, #tpu.memory_space<vmem>>, vector<1x4x256xf32>
    %8 = vector.shape_cast %7 : vector<1x4x256xf32> to vector<4x256xf32>
    %cst_10 = arith.constant dense<0.000000e+00> : vector<4x256xf32>
    %9 = tpu.matmul %6, %8, %cst_10 {dimension_numbers = #tpu.dot_dimension_numbers<[1], [0], [0], [1], [0, 0, 1, 1], [], []>} : vector<4x4xf32>, vector<4x256xf32>, vector<4x256xf32> -> vector<4x256xf32>
    %10 = arith.addf %4, %9 : vector<4x256xf32>
    %c2 = arith.constant 2 : index
    %c0_11 = arith.constant 0 : index
    %c0_12 = arith.constant 0 : index
    %11 = vector.load %arg5[%c2, %c0_11, %c0_12] : memref<4x4x4xf32, #tpu.memory_space<vmem>>, vector<1x4x4xf32>
    %12 = vector.shape_cast %11 : vector<1x4x4xf32> to vector<4x4xf32>
    %c0_13 = arith.constant 0 : index
    %c0_14 = arith.constant 0 : index
    %c0_15 = arith.constant 0 : index
    %13 = vector.load %arg3[%c0_13, %c0_14, %c0_15] : memref<1x4x256xf32, #tpu.memory_space<vmem>>, vector<1x4x256xf32>
    %14 = vector.shape_cast %13 : vector<1x4x256xf32> to vector<4x256xf32>
    %cst_16 = arith.constant dense<0.000000e+00> : vector<4x256xf32>
    %15 = tpu.matmul %12, %14, %cst_16 {dimension_numbers = #tpu.dot_dimension_numbers<[1], [0], [0], [1], [0, 0, 1, 1], [], []>} : vector<4x4xf32>, vector<4x256xf32>, vector<4x256xf32> -> vector<4x256xf32>
    %16 = arith.addf %10, %15 : vector<4x256xf32>
    %c3 = arith.constant 3 : index
    %c0_17 = arith.constant 0 : index
    %c0_18 = arith.constant 0 : index
    %17 = vector.load %arg5[%c3, %c0_17, %c0_18] : memref<4x4x4xf32, #tpu.memory_space<vmem>>, vector<1x4x4xf32>
    %18 = vector.shape_cast %17 : vector<1x4x4xf32> to vector<4x4xf32>
    %c0_19 = arith.constant 0 : index
    %c0_20 = arith.constant 0 : index
    %c0_21 = arith.constant 0 : index
    %19 = vector.load %arg4[%c0_19, %c0_20, %c0_21] : memref<1x4x256xf32, #tpu.memory_space<vmem>>, vector<1x4x256xf32>
    %20 = vector.shape_cast %19 : vector<1x4x256xf32> to vector<4x256xf32>
    %cst_22 = arith.constant dense<0.000000e+00> : vector<4x256xf32>
    %21 = tpu.matmul %18, %20, %cst_22 {dimension_numbers = #tpu.dot_dimension_numbers<[1], [0], [0], [1], [0, 0, 1, 1], [], []>} : vector<4x4xf32>, vector<4x256xf32>, vector<4x256xf32> -> vector<4x256xf32>
    %22 = arith.addf %16, %21 : vector<4x256xf32>
    %cst_23 = arith.constant 1.000000e+00 : f32
    %23 = vector.broadcast %cst_23 : f32 to vector<4x256xf32>
    %24 = arith.cmpf ogt, %22, %23 : vector<4x256xf32>
    %25 = arith.extui %24 : vector<4x256xi1> to vector<4x256xi32>
    %26 = arith.sitofp %25 : vector<4x256xi32> to vector<4x256xf32>
    %c0_24 = arith.constant 0 : index
    %c0_25 = arith.constant 0 : index
    %27 = vector.load %arg6[%c0_24, %c0_25] : memref<3x4xf32, #tpu.memory_space<vmem>>, vector<3x4xf32>
    %cst_26 = arith.constant dense<0.000000e+00> : vector<3x256xf32>
    %28 = tpu.matmul %27, %26, %cst_26 {dimension_numbers = #tpu.dot_dimension_numbers<[1], [0], [0], [1], [0, 0, 1, 1], [], []>} : vector<3x4xf32>, vector<4x256xf32>, vector<3x256xf32> -> vector<3x256xf32>
    %c0_27 = arith.constant 0 : index
    %c0_28 = arith.constant 0 : index
    %29 = vector.load %arg7[%c0_27, %c0_28] : memref<3x1xf32, #tpu.memory_space<vmem>>, vector<3x1xf32>
    %30 = vector.broadcast %29 : vector<3x1xf32> to vector<3x256xf32>
    %31 = arith.addf %28, %30 : vector<3x256xf32>
    %c0_29 = arith.constant 0 : index
    %c0_30 = arith.constant 0 : index
    %32 = vector.load %arg8[%c0_29, %c0_30] : memref<256x4096xf32, #tpu.memory_space<vmem>>, vector<256x4096xf32>
    %cst_31 = arith.constant dense<0.000000e+00> : vector<3x4096xf32>
    %33 = tpu.matmul %31, %32, %cst_31 {dimension_numbers = #tpu.dot_dimension_numbers<[1], [0], [0], [1], [0, 0, 1, 1], [], []>} : vector<3x256xf32>, vector<256x4096xf32>, vector<3x4096xf32> -> vector<3x4096xf32>
    %cst_32 = arith.constant 1.000000e+00 : f32
    %34 = vector.broadcast %cst_32 : f32 to vector<3x4096xf32>
    %35 = arith.cmpf ogt, %33, %34 : vector<3x4096xf32>
    %36 = arith.extui %35 : vector<3x4096xi1> to vector<3x4096xi32>
    %37 = arith.sitofp %36 : vector<3x4096xi32> to vector<3x4096xf32>
    %c0_33 = arith.constant 0 : index
    %c0_34 = arith.constant 0 : index
    %c0_35 = arith.constant 0 : index
    %38 = vector.load %arg9[%c0_33, %c0_34, %c0_35] : memref<1x3x4096xf32, #tpu.memory_space<vmem>>, vector<1x3x4096xf32>
    %39 = vector.shape_cast %38 : vector<1x3x4096xf32> to vector<3x4096xf32>
    %40 = vector.shape_cast %37 : vector<3x4096xf32> to vector<1x3x4096xf32>
    tpu.vector_store %arg9[%c0_33, %c0_34, %c0_35], %40 {strides = array<i32>} : memref<1x3x4096xf32, #tpu.memory_space<vmem>>, vector<1x3x4096xf32>,
    return
  }
  func.func @transform_0(%arg0: i32) -> (i32, i32, i32) {
    %c0_i32 = arith.constant 0 : i32
    %c0_i32_0 = arith.constant 0 : i32
    %c0_i32_1 = arith.constant 0 : i32
    return %arg0, %c0_i32, %c0_i32_0 : i32, i32, i32
  }
  func.func @transform_1(%arg0: i32) -> (i32, i32, i32) {
    %c0_i32 = arith.constant 0 : i32
    %c0_i32_0 = arith.constant 0 : i32
    %c0_i32_1 = arith.constant 0 : i32
    return %arg0, %c0_i32, %c0_i32_0 : i32, i32, i32
  }
  func.func @transform_2(%arg0: i32) -> (i32, i32, i32) {
    %c0_i32 = arith.constant 0 : i32
    %c0_i32_0 = arith.constant 0 : i32
    %c0_i32_1 = arith.constant 0 : i32
    return %arg0, %c0_i32, %c0_i32_0 : i32, i32, i32
  }
  func.func @transform_3(%arg0: i32) -> (i32, i32, i32) {
    %c0_i32 = arith.constant 0 : i32
    %c0_i32_0 = arith.constant 0 : i32
    %c0_i32_1 = arith.constant 0 : i32
    return %arg0, %c0_i32, %c0_i32_0 : i32, i32, i32
  }
  func.func @transform_4(%arg0: i32) -> (i32, i32, i32) {
    %c0_i32 = arith.constant 0 : i32
    %c0_i32_0 = arith.constant 0 : i32
    %c0_i32_1 = arith.constant 0 : i32
    %c0_i32_2 = arith.constant 0 : i32
    return %c0_i32, %c0_i32_0, %c0_i32_1 : i32, i32, i32
  }
  func.func @transform_5(%arg0: i32) -> (i32, i32) {
    %c0_i32 = arith.constant 0 : i32
    %c0_i32_0 = arith.constant 0 : i32
    %c0_i32_1 = arith.constant 0 : i32
    return %c0_i32, %c0_i32_0 : i32, i32
  }
  func.func @transform_6(%arg0: i32) -> (i32, i32) {
    %c0_i32 = arith.constant 0 : i32
    %c0_i32_0 = arith.constant 0 : i32
    %c0_i32_1 = arith.constant 0 : i32
    return %c0_i32, %c0_i32_0 : i32, i32
  }
  func.func @transform_7(%arg0: i32) -> (i32, i32) {
    %c0_i32 = arith.constant 0 : i32
    %c0_i32_0 = arith.constant 0 : i32
    %c0_i32_1 = arith.constant 0 : i32
    return %c0_i32, %c0_i32_0 : i32, i32
  }
  func.func @transform_8(%arg0: i32) -> (i32, i32, i32) {
    %c0_i32 = arith.constant 0 : i32
    %c0_i32_0 = arith.constant 0 : i32
    %c0_i32_1 = arith.constant 0 : i32
    return %arg0, %c0_i32, %c0_i32_0 : i32, i32, i32
  }
}

</mosaic_0001>

<bundles_post_ra>
// kernel: segmentation_head.1
= control target key start
LH: loop header
LB: loop body
LE: loop exit
PB: predicated region body
PF: predicated region fallthrough
CT: control target
= control target key end

     0   :  { %13 = vsyncpa [#allocation3], 0  ;;  %s4771_s0 = inlined_call_operand.vmem [shape: f32[2,4,256], index: 0, kind: input, shape index: {}]   ;;  %s4772_s1 = inlined_call_operand.vmem [shape: f32[2,4,256], index: 1, kind: input, shape index: {}]   ;;  %s4773_s2 = inlined_call_operand.vmem [shape: f32[2,4,256], index: 2, kind: input, shape index: {}]   ;;  %s4774_s3 = inlined_call_operand.vmem [shape: f32[2,4,256], index: 3, kind: input, shape index: {}]   ;;  %s4775_s4 = inlined_call_operand.vmem [shape: f32[4,4,4], index: 4, kind: input, shape index: {}]   ;;  %s4776_s5 = inlined_call_operand.hbm [shape: f32[3,4], index: 5, kind: input, shape index: {}]   ;;  %s4777_s6 = inlined_call_operand.vmem [shape: f32[3,1], index: 6, kind: input, shape index: {}]   ;;  %s4778_s7 = inlined_call_operand.hbm [shape: f32[256,4096], index: 7, kind: input, shape index: {}]   ;;  %s4779_s8 = inlined_call_operand.vmem [shape: f32[2,3,4096], index: 8, kind: output, shape index: {}]  }
   0x1   :  { %14 = vsyncpa [#allocation5], 0  ;;  %s4542_s27 = smov 0  }
   0x2 LB: > { %s4548_s28 = sadd.s32 4294967295, %s4489_s27   ;;  %p3275_p0 = scmp.ge.s32.totalorder %s4489_s27, 1  ;;  %s4489_s27 = sphi %s4542_s27, %s20_s27  }
   0x3   : > { %p239_p1 = scmp.lt.s32.totalorder %s4489_s27, 3  ;;  %p4780_p2 = scmp.eq.s32.totalorder %s4548_s28, 0 }
   0x4   : > { %s4491_s29 = smov [#allocation2]   ;;  %s4492_s10 = smov [#allocation4]  }
   0x5   : > { %s255_s30 = sshll.u32 %s4491_s29, 4  ;;  %p4553_p3 = pnand %p3275_p0, %p239_p1  ;;  %s256_s30 = int_to_ptr.vmem [resolvable:$true] %s255_s30 }
   0x6   : > { %s268_s11 = sshll.u32 %s4492_s10, 4  ;;  %s4419_s15 = scalar_lea.hbm %s4776_s5, 64  ;;  %s4565_s11 = int_to_ptr.vmem [resolvable:$true] %s268_s11 }
   0x7   : > { %s4782_s9 = scalar_select %p4553_p3, 1, 0 }
   0x8   : > { %p4389_p4 = pneg %p4553_p3  ;;  %p4420_p6 = scmp.ne.s32.totalorder %s4776_s5, %s4419_s15 }
   0x9   : > { %p4426_p10 = scmp.lt.u32.totalorder %s4419_s15, %s4776_s5 }
   0xa   : > { %p4561_p5 = pnand %p4780_p2, %p4389_p4 }
   0xc   : > { %p4421_p7 = pneg %p4561_p5 }
   0xe   : > { %p4422_p8 = pnand %p4421_p7, %p4420_p6 }
  0x10   : > { %p4423_p9 = pneg %p4422_p8 }
  0x12   : > { %p4428_p11 = pnand %p4426_p10, %p4423_p9 }
  0x14   : > { %4431 = shalt.err (!%p4428_p11)
}
  0x15   : > { %s4432_s20 = scalar_lea.vmem %s256_s30, 64  ;;  %p4440_p1 = scmp.lt.s32.totalorder %s256_s30, %s256_s30 }
  0x16   : > { %p4433_p12 = scmp.ne.s32.totalorder %s256_s30, %s4432_s20  ;;  %p4441_p4 = scmp.lt.s32.totalorder %s4432_s20, %s4432_s20 }
  0x18   : > { %p4435_p13 = pnand %p4433_p12, %p4421_p7  ;;  %p4442_p2 = por %p4441_p4, %p4440_p1 }
  0x1a   : > { %p4436_p0 = pneg %p4435_p13 }
  0x1c   : > { %p4443_p3 = pnand %p4442_p2, %p4436_p0 }
  0x1e   : > { %4446 = shalt.err (!%p4443_p3)
}
  0x1f   : > { %4392 = dma.hbm_to_vmem [thread:$0]  (!%p4561_p5), %s4776_s5, 64, %s256_s30, [#allocation3]  }
  0x20   : > { %s4447_s25 = scalar_lea.hbm %s4778_s7, 131072 }
  0x21   : > { %p4448_p6 = scmp.ne.s32.totalorder %s4778_s7, %s4447_s25  ;;  %p4454_p3 = scmp.lt.u32.totalorder %s4447_s25, %s4778_s7 }
  0x23   : > { %p4450_p8 = pnand %p4448_p6, %p4421_p7 }
  0x25   : > { %p4451_p2 = pneg %p4450_p8 }
  0x27   : > { %p4456_p9 = pnand %p4454_p3, %p4451_p2 }
  0x29   : > { %4459 = shalt.err (!%p4456_p9)
}
  0x2a   : > { %s4460_s30 = scalar_lea.vmem %s4565_s11, 131072  ;;  %p4468_p13 = scmp.lt.s32.totalorder %s4565_s11, %s4565_s11 }
  0x2b   : > { %p4461_p10 = scmp.ne.s32.totalorder %s4565_s11, %s4460_s30  ;;  %p4469_p0 = scmp.lt.s32.totalorder %s4460_s30, %s4460_s30 }
  0x2d   : > { %p4463_p11 = pnand %p4461_p10, %p4421_p7  ;;  %p4470_p1 = por %p4469_p0, %p4468_p13 }
  0x2f   : > { %p4464_p12 = pneg %p4463_p11 }
  0x31   : > { %p4471_p4 = pnand %p4470_p1, %p4464_p12 }
  0x33   : > { %4474 = shalt.err (!%p4471_p4)
}
  0x34   : > { %s4493_s14 = smov 4096   ;;  %s4494_s15 = smov 256  }
  0x35   : > { %4395 = dma.hbm_to_vmem [thread:$0]  (!%p4561_p5), %s4778_s7, 131072, %s4565_s11, [#allocation5], %s4493_s14, %s4493_s14, %s4494_s15  }
  0x36   : > { %p4784_p6 = scmp.ne.s32.totalorder %s4782_s9, 0 }
  0x37   : > { %p4785_p7 = scmp.eq.s32.totalorder (!%p4784_p6), %s4548_s28, 0 }
  0x38   : > { %316 = sbr.rel (%p4784_p6) target bundleno = 1195 (0x4ab), region = 52 }
  0x3f   : > { %4480 = dma.done.wait (%p4785_p7), [#allocation3], 64   ;;  %p4786_p8 = pmov %p4785_p7 }
  0x40   : > { %p4787_p2 = pmov %p4785_p7 }
  0x41   : > { %4482 = vsyncadd (%p4786_p8), [#allocation3], 4294967232 }
  0x42   : > { %4484 = dma.done.wait (%p4787_p2), [#allocation5], 131072   ;;  %p4788_p3 = pmov %p4787_p2 }
  0x43   : > { %p369_p9 = scmp.lt.s32.totalorder %s4548_s28, 1  ;;  %v4495_v0 = vmov 0.0   ;;  %vm405_vm0 = vcmask 1043456   ;;  %v394_v7 = vld [vmem:[%s4775_s4] sm:$0xf]  ;;  %vm401_vm1 = vcmask 31744  }
  0x44   : > { %4486 = vsyncadd (%p4788_p3), [#allocation5], 4294836224  ;;  %554 = vmatprep.mubr.f32.mxu0 %v4495_v0  ;;  %474 = vmatprep.mubr.f32.mxu1 %v4495_v0  ;;  %v3292_v10 = vld [vmem:[%s4775_s4 + $0x4] sm:$0xf]  ;;  %v3299_v11 = vld [vmem:[%s4775_s4 + $0x8] sm:$0xf] }
  0x45   : > { %s4790_s28 = smov (!%p369_p9, %s4548_s28), 1  ;;  %v3303_v12 = vld [vmem:[%s4775_s4 + $0xc] sm:$0xf]  ;;  %v738_v13 = vld [vmem:[%s4777_s6] sm:$0x7]  ;;  %v4496_v14 = vmov 0  }
  0x46   : > { %s3346_s9 = sshll.u32 %s4790_s28, 3  ;;  %4414 = vset.pattern.permute.xlu0 %v4496_v14  ;;  %v827_v15 = vld [vmem:[#allocation4 + $0x18] sm:$0xff]  ;;  %v826_v18 = vld [vmem:[#allocation4 + $0x10] sm:$0xff] }
  0x47   : > { %s373_s18 = scalar_lea.vmem %s4771_s0, %s3346_s9  ;;  %s383_s21 = scalar_lea.vmem %s4773_s2, %s3346_s9  ;;  %v859_v16 = vld [vmem:[#allocation4 + $0x118] sm:$0xff]  ;;  %741 = vperm.xlu0 %4414, %v738_v13   ;;  %v858_v19 = vld [vmem:[#allocation4 + $0x110] sm:$0xff] }
  0x48   : > { %s388_s24 = scalar_lea.vmem %s4774_s3, %s3346_s9  ;;  %v395_v1 = vld [vmem:[%s373_s18] sm:$0xff]  ;;  %s378_s29 = scalar_lea.vmem %s4772_s1, %s3346_s9  ;;  %v3415_v17 = vpack.c.bf16 %v859_v16, %v827_v15  ;;  %v3417_v20 = vpack.c.bf16 %v858_v19, %v826_v18  ;;  %v890_v24 = vld [vmem:[#allocation4 + $0x210] sm:$0xff] }
  0x49   : > { %v563_v2 = vld [vmem:[%s383_s21] sm:$0xff]  ;;  %v482_v3 = vcombine.high %v395_v1, %v395_v1  ;;  %v922_v25 = vld [vmem:[#allocation4 + $0x310] sm:$0xff]  ;;  %s3350_s18 = sshll.u32 %s4790_s28, 7 }
  0x4a   : > { %v565_v4 = vcombine.high %v563_v2, %v563_v2  ;;  %v648_v5 = vld [vmem:[%s388_s24] sm:$0xff]  ;;  %v3421_v26 = vpack.c.bf16 %v922_v25, %v890_v24  ;;  %v954_v30 = vld [vmem:[#allocation4 + $0x410] sm:$0xff]  ;;  %s4706_s20 = scalar_lea.vmem %s4779_s8, %s3350_s18 }
  0x4b   : > { %v398_v6 = vld [vmem:[%s378_s29] sm:$0xff]  ;;  %3296 = vmatprep.subr.msk.mxu0 %vm405_vm0, %v482_v3  ;;  %v650_v9 = vcombine.high %v648_v5, %v648_v5  ;;  %v986_v31 = vld [vmem:[#allocation4 + $0x510] sm:$0xff] }
  0x4c   : > { %v400_v8 = vcombine.high %v398_v6, %v398_v6  ;;  %3297 = vmatpush1.msk.msra.mxu0 %vm405_vm0, %v395_v1  ;;  %v891_v21 = vld [vmem:[#allocation4 + $0x218] sm:$0xff]  ;;  %v3425_v32 = vpack.c.bf16 %v986_v31, %v954_v30  ;;  %v1018_v36 = vld [vmem:[#allocation4 + $0x610] sm:$0xff] }
  0x4d   : > { %3298 = vmatmul.mubr.msk.f32.vlgmr.msra.gmra.mrb[0].mxu0 %vm401_vm1, %v394_v7  ;;  %3300 = vmatprep.subr.msk.mxu0 %vm405_vm0, %v565_v4  ;;  %v923_v22 = vld [vmem:[#allocation4 + $0x318] sm:$0xff]  ;;  %v1050_v37 = vld [vmem:[#allocation4 + $0x710] sm:$0xff] }
  0x4e   : > { %3293 = vmatprep.subr.msk.mxu1 %vm405_vm0, %v400_v8  ;;  %3301 = vmatpush1.msk.msra.mxu0 %vm405_vm0, %v563_v2  ;;  %v3419_v23 = vpack.c.bf16 %v923_v22, %v891_v21  ;;  %v955_v27 = vld [vmem:[#allocation4 + $0x418] sm:$0xff]  ;;  %v3429_v38 = vpack.c.bf16 %v1050_v37, %v1018_v36  ;;  %v1082_v42 = vld [vmem:[#allocation4 + $0x810] sm:$0xff] }
  0x4f   : > { %637 = vmatprep.mubr.f32.mxu0 %v4495_v0  ;;  %3304 = vmatprep.subr.msk.mxu0 %vm405_vm0, %v650_v9  ;;  %v987_v28 = vld [vmem:[#allocation4 + $0x518] sm:$0xff]  ;;  %v1114_v43 = vld [vmem:[#allocation4 + $0x910] sm:$0xff] }
  0x50   : > { %3294 = vmatpush1.msk.msra.mxu1 %vm405_vm0, %v398_v6  ;;  %v3423_v29 = vpack.c.bf16 %v987_v28, %v955_v27  ;;  %v1019_v33 = vld [vmem:[#allocation4 + $0x618] sm:$0xff]  ;;  %v3433_v44 = vpack.c.bf16 %v1114_v43, %v1082_v42  ;;  %v1146_v48 = vld [vmem:[#allocation4 + $0xa10] sm:$0xff] }
  0x51   : > { %3295 = vmatmul.mubr.msk.f32.vlgmr.msra.gmra.mrb[0].mxu1 %vm401_vm1, %v3292_v10  ;;  %v1051_v34 = vld [vmem:[#allocation4 + $0x718] sm:$0xff]  ;;  %v1178_v49 = vld [vmem:[#allocation4 + $0xb10] sm:$0xff] }
  0x52   : > { %817 = vmatprep.mubr.f32.mxu1 %v4495_v0  ;;  %v3427_v35 = vpack.c.bf16 %v1051_v34, %v1019_v33  ;;  %v1083_v39 = vld [vmem:[#allocation4 + $0x818] sm:$0xff]  ;;  %v3437_v50 = vpack.c.bf16 %v1178_v49, %v1146_v48  ;;  %v1210_v54 = vld [vmem:[#allocation4 + $0xc10] sm:$0xff]  ;;  %v857_v48 = vld [vmem:[#allocation4 + $0x108] sm:$0xff] }
  0x53   : > { %v1115_v40 = vld [vmem:[#allocation4 + $0x918] sm:$0xff]  ;;  %v1242_v55 = vld [vmem:[#allocation4 + $0xd10] sm:$0xff] }
  0x54   : > { %v3431_v41 = vpack.c.bf16 %v1115_v40, %v1083_v39  ;;  %v1147_v45 = vld [vmem:[#allocation4 + $0xa18] sm:$0xff]  ;;  %v3441_v56 = vpack.c.bf16 %v1242_v55, %v1210_v54  ;;  %v1274_v60 = vld [vmem:[#allocation4 + $0xe10] sm:$0xff] }
  0x55   : > { %3302 = vmatmul.mubr.msk.f32.vlgmr.msra.gmra.mrb[0].mxu0 %vm401_vm1, %v3299_v11  ;;  %v1179_v46 = vld [vmem:[#allocation4 + $0xb18] sm:$0xff]  ;;  %v1306_v61 = vld [vmem:[#allocation4 + $0xf10] sm:$0xff] }
  0x56   : > { %3305 = vmatpush1.msk.msra.mxu0 %vm405_vm0, %v648_v5  ;;  %722 = vmatprep.mubr.f32.mxu0 %v4495_v0  ;;  %v3435_v47 = vpack.c.bf16 %v1179_v46, %v1147_v45  ;;  %v1211_v51 = vld [vmem:[#allocation4 + $0xc18] sm:$0xff]  ;;  %v3445_v62 = vpack.c.bf16 %v1306_v61, %v1274_v60  ;;  %v1338_v3 = vld [vmem:[#allocation4 + $0x1010] sm:$0xff]  ;;  %v888_v60 = vld [vmem:[#allocation4 + $0x200] sm:$0xff] }
  0x57   : > { %3416 = vmatprep.subr.bf16.mxu0 %v3415_v17  ;;  %v1243_v52 = vld [vmem:[#allocation4 + $0xd18] sm:$0xff]  ;;  %v1370_v4 = vld [vmem:[#allocation4 + $0x1110] sm:$0xff]  ;;  %v920_v61 = vld [vmem:[#allocation4 + $0x300] sm:$0xff] }
  0x58   : > { %v3439_v53 = vpack.c.bf16 %v1243_v52, %v1211_v51  ;;  %v1275_v57 = vld [vmem:[#allocation4 + $0xe18] sm:$0xff]  ;;  %v3449_v5 = vpack.c.bf16 %v1370_v4, %v1338_v3  ;;  %v1402_v9 = vld [vmem:[#allocation4 + $0x1210] sm:$0xff]  ;;  %v856_v51 = vld [vmem:[#allocation4 + $0x100] sm:$0xff] }
  0x59   : > { %v1307_v58 = vld [vmem:[#allocation4 + $0xf18] sm:$0xff]  ;;  %v1434_v10 = vld [vmem:[#allocation4 + $0x1310] sm:$0xff]  ;;  %v889_v52 = vld [vmem:[#allocation4 + $0x208] sm:$0xff] }
  0x5a   : > { %v3443_v59 = vpack.c.bf16 %v1307_v58, %v1275_v57  ;;  %v1339_v63 = vld [vmem:[#allocation4 + $0x1018] sm:$0xff]  ;;  %v3453_v11 = vpack.c.bf16 %v1434_v10, %v1402_v9  ;;  %v1466_v15 = vld [vmem:[#allocation4 + $0x1410] sm:$0xff]  ;;  %v952_v3 = vld [vmem:[#allocation4 + $0x400] sm:$0xff] }
  0x5b   : > { %v1371_v1 = vld [vmem:[#allocation4 + $0x1118] sm:$0xff]  ;;  %v1498_v16 = vld [vmem:[#allocation4 + $0x1510] sm:$0xff]  ;;  %v984_v4 = vld [vmem:[#allocation4 + $0x500] sm:$0xff] }
  0x5c   : > { %v3447_v2 = vpack.c.bf16 %v1371_v1, %v1339_v63  ;;  %v1403_v6 = vld [vmem:[#allocation4 + $0x1218] sm:$0xff]  ;;  %v3457_v17 = vpack.c.bf16 %v1498_v16, %v1466_v15  ;;  %v1530_v21 = vld [vmem:[#allocation4 + $0x1610] sm:$0xff]  ;;  %v985_v63 = vld [vmem:[#allocation4 + $0x508] sm:$0xff]  ;;  %v3357_v1 = vpack.c.bf16 %v920_v61, %v888_v60 }
  0x5d   : > { %3306 = vmatmul.mubr.msk.f32.vlgmr.msra.gmra.mrb[0].mxu0 %vm401_vm1, %v3303_v12  ;;  %v1435_v7 = vld [vmem:[#allocation4 + $0x1318] sm:$0xff]  ;;  %v1562_v22 = vld [vmem:[#allocation4 + $0x1710] sm:$0xff]  ;;  %v1016_v9 = vld [vmem:[#allocation4 + $0x600] sm:$0xff] }
  0x5e   : > { %3418 = vmatpush1.bf16.msra.mxu0 %v3417_v20  ;;  %v3451_v8 = vpack.c.bf16 %v1435_v7, %v1403_v6  ;;  %v1467_v12 = vld [vmem:[#allocation4 + $0x1418] sm:$0xff]  ;;  %v1594_v27 = vld [vmem:[#allocation4 + $0x1810] sm:$0xff]  ;;  %v1049_v6 = vld [vmem:[#allocation4 + $0x708] sm:$0xff]  ;;  %v3361_v7 = vpack.c.bf16 %v984_v4, %v952_v3 }
  0x5f   : > { %3420 = vmatprep.subr.bf16.mxu0 %v3419_v23  ;;  %v1499_v13 = vld [vmem:[#allocation4 + $0x1518] sm:$0xff]  ;;  %v3461_v23 = vpack.c.bf16 %v1562_v22, %v1530_v21  ;;  %v1626_v28 = vld [vmem:[#allocation4 + $0x1910] sm:$0xff]  ;;  %v1048_v10 = vld [vmem:[#allocation4 + $0x700] sm:$0xff] }
  0x60   : > { %v3455_v14 = vpack.c.bf16 %v1499_v13, %v1467_v12  ;;  %v1531_v18 = vld [vmem:[#allocation4 + $0x1618] sm:$0xff]  ;;  %v1658_v33 = vld [vmem:[#allocation4 + $0x1a10] sm:$0xff]  ;;  %v1113_v12 = vld [vmem:[#allocation4 + $0x908] sm:$0xff]  ;;  %v3365_v13 = vpack.c.bf16 %v1048_v10, %v1016_v9 }
  0x61   : > { %v1563_v19 = vld [vmem:[#allocation4 + $0x1718] sm:$0xff]  ;;  %v1690_v34 = vld [vmem:[#allocation4 + $0x1b10] sm:$0xff]  ;;  %v1080_v15 = vld [vmem:[#allocation4 + $0x800] sm:$0xff] }
  0x62   : > { %3422 = vmatpush1.bf16.msra.mxu0 %v3421_v26  ;;  %v3459_v20 = vpack.c.bf16 %v1563_v19, %v1531_v18  ;;  %v1595_v24 = vld [vmem:[#allocation4 + $0x1818] sm:$0xff]  ;;  %v1722_v39 = vld [vmem:[#allocation4 + $0x1c10] sm:$0xff]  ;;  %v1112_v16 = vld [vmem:[#allocation4 + $0x900] sm:$0xff] }
  0x63   : > { %3424 = vmatprep.subr.bf16.mxu0 %v3423_v29  ;;  %v1627_v25 = vld [vmem:[#allocation4 + $0x1918] sm:$0xff]  ;;  %v3465_v29 = vpack.c.bf16 %v1626_v28, %v1594_v27  ;;  %v1754_v40 = vld [vmem:[#allocation4 + $0x1d10] sm:$0xff]  ;;  %v1177_v18 = vld [vmem:[#allocation4 + $0xb08] sm:$0xff]  ;;  %v3369_v19 = vpack.c.bf16 %v1112_v16, %v1080_v15 }
  0x64   : > { %v3463_v26 = vpack.c.bf16 %v1627_v25, %v1595_v24  ;;  %v1659_v30 = vld [vmem:[#allocation4 + $0x1a18] sm:$0xff]  ;;  %v1144_v21 = vld [vmem:[#allocation4 + $0xa00] sm:$0xff]  ;;  %v1241_v24 = vld [vmem:[#allocation4 + $0xd08] sm:$0xff] }
  0x65   : > { %v1691_v31 = vld [vmem:[#allocation4 + $0x1b18] sm:$0xff]  ;;  %v1176_v22 = vld [vmem:[#allocation4 + $0xb00] sm:$0xff]  ;;  %v1625_v60 = vld [vmem:[#allocation4 + $0x1908] sm:$0xff] }
  0x66   : > { %3426 = vmatpush1.bf16.msra.mxu0 %v3425_v32  ;;  %v3467_v32 = vpack.c.bf16 %v1691_v31, %v1659_v30  ;;  %v1723_v36 = vld [vmem:[#allocation4 + $0x1c18] sm:$0xff]  ;;  %v3373_v25 = vpack.c.bf16 %v1176_v22, %v1144_v21  ;;  %v1208_v27 = vld [vmem:[#allocation4 + $0xc00] sm:$0xff]  ;;  %v1305_v30 = vld [vmem:[#allocation4 + $0xf08] sm:$0xff] }
  0x67   : > { %3428 = vmatprep.subr.bf16.mxu0 %v3427_v35  ;;  %v3469_v35 = vpack.c.bf16 %v1690_v34, %v1658_v33  ;;  %v1755_v37 = vld [vmem:[#allocation4 + $0x1d18] sm:$0xff]  ;;  %v1240_v28 = vld [vmem:[#allocation4 + $0xd00] sm:$0xff]  ;;  %v1689_v3 = vld [vmem:[#allocation4 + $0x1b08] sm:$0xff] }
  0x68   : > { %v3377_v31 = vpack.c.bf16 %v1240_v28, %v1208_v27  ;;  %v1272_v33 = vld [vmem:[#allocation4 + $0xe00] sm:$0xff]  ;;  %v1753_v9 = vld [vmem:[#allocation4 + $0x1d08] sm:$0xff] }
  0x69   : > { %v1304_v34 = vld [vmem:[#allocation4 + $0xf00] sm:$0xff]  ;;  %v1785_v15 = vld [vmem:[#allocation4 + $0x1e08] sm:$0xff] }
  0x6a   : > { %3430 = vmatpush1.bf16.msra.mxu0 %v3429_v38  ;;  %v3471_v38 = vpack.c.bf16 %v1755_v37, %v1723_v36  ;;  %v1369_v36 = vld [vmem:[#allocation4 + $0x1108] sm:$0xff]  ;;  %v3381_v37 = vpack.c.bf16 %v1304_v34, %v1272_v33  ;;  %v1816_v21 = vld [vmem:[#allocation4 + $0x1f00] sm:$0xff] }
  0x6b   : > { %3432 = vmatprep.subr.bf16.mxu0 %v3431_v41  ;;  %v3473_v41 = vpack.c.bf16 %v1754_v40, %v1722_v39  ;;  %v1336_v39 = vld [vmem:[#allocation4 + $0x1000] sm:$0xff]  ;;  %v1817_v16 = vld [vmem:[#allocation4 + $0x1f08] sm:$0xff] }
  0x6c   : > { %v1368_v40 = vld [vmem:[#allocation4 + $0x1100] sm:$0xff]  ;;  %v829_v27 = vld [vmem:[#allocation4 + $0x28] sm:$0xff] }
  0x6d   : > { %v861_v28 = vld [vmem:[#allocation4 + $0x128] sm:$0xff]  ;;  %v828_v33 = vld [vmem:[#allocation4 + $0x20] sm:$0xff] }
  0x6e   : > { %3434 = vmatpush1.bf16.msra.mxu0 %v3433_v44 }
  0x6f   : > { %3436 = vmatprep.subr.bf16.mxu0 %v3435_v47  ;;  %v825_v47 = vld [vmem:[#allocation4 + $0x8] sm:$0xff] }
  0x70   : > { %v3351_v54 = vpack.c.bf16 %v857_v48, %v825_v47  ;;  %v1465_v47 = vld [vmem:[#allocation4 + $0x1408] sm:$0xff] }
  0x71   : > { %v1497_v48 = vld [vmem:[#allocation4 + $0x1508] sm:$0xff] }
  0x72   : > { %3438 = vmatpush1.bf16.msra.mxu0 %v3437_v50  ;;  %v824_v50 = vld [vmem:[#allocation4] sm:$0xff] }
  0x73   : > { %3440 = vmatprep.subr.bf16.mxu0 %v3439_v53  ;;  %v921_v53 = vld [vmem:[#allocation4 + $0x308] sm:$0xff]  ;;  %v3353_v57 = vpack.c.bf16 %v856_v51, %v824_v50  ;;  %v3391_v50 = vpack.c.bf16 %v1497_v48, %v1465_v47  ;;  %v1464_v51 = vld [vmem:[#allocation4 + $0x1400] sm:$0xff] }
  0x74   : > { %v892_v47 = vld [vmem:[#allocation4 + $0x220] sm:$0xff] }
  0x75   : > { %v924_v48 = vld [vmem:[#allocation4 + $0x320] sm:$0xff] }
  0x76   : > { %3442 = vmatpush1.bf16.msra.mxu0 %v3441_v56  ;;  %v737_v56 = vld [vmem:[#allocation2] sm:$0x7] }
  0x77   : > { %3444 = vmatprep.subr.bf16.mxu0 %v3443_v59  ;;  %v3355_v59 = vpack.c.bf16 %v921_v53, %v889_v52  ;;  %v1496_v52 = vld [vmem:[#allocation4 + $0x1500] sm:$0xff]  ;;  %v1529_v53 = vld [vmem:[#allocation4 + $0x1608] sm:$0xff] }
  0x7a   : > { %3446 = vmatpush1.bf16.msra.mxu0 %v3445_v62  ;;  %v953_v62 = vld [vmem:[#allocation4 + $0x408] sm:$0xff] }
  0x7b   : > { %3448 = vmatprep.subr.bf16.mxu0 %v3447_v2  ;;  %v3359_v2 = vpack.c.bf16 %v985_v63, %v953_v62  ;;  %v1592_v63 = vld [vmem:[#allocation4 + $0x1800] sm:$0xff] }
  0x7e   : > { %3450 = vmatpush1.bf16.msra.mxu0 %v3449_v5  ;;  %v1017_v5 = vld [vmem:[#allocation4 + $0x608] sm:$0xff] }
  0x7f   : > { %3452 = vmatprep.subr.bf16.mxu0 %v3451_v8  ;;  %v3363_v8 = vpack.c.bf16 %v1049_v6, %v1017_v5  ;;  %v1656_v6 = vld [vmem:[#allocation4 + $0x1a00] sm:$0xff] }
  0x82   : > { %3454 = vmatpush1.bf16.msra.mxu0 %v3453_v11  ;;  %v1081_v11 = vld [vmem:[#allocation4 + $0x808] sm:$0xff] }
  0x83   : > { %3456 = vmatprep.subr.bf16.mxu0 %v3455_v14  ;;  %v3367_v14 = vpack.c.bf16 %v1113_v12, %v1081_v11  ;;  %v1720_v12 = vld [vmem:[#allocation4 + $0x1c00] sm:$0xff] }
  0x86   : > { %3458 = vmatpush1.bf16.msra.mxu0 %v3457_v17  ;;  %v1145_v17 = vld [vmem:[#allocation4 + $0xa08] sm:$0xff] }
  0x87   : > { %3460 = vmatprep.subr.bf16.mxu0 %v3459_v20  ;;  %v3371_v20 = vpack.c.bf16 %v1177_v18, %v1145_v17  ;;  %v1787_v17 = vld [vmem:[#allocation4 + $0x1e18] sm:$0xff]  ;;  %v3411_v18 = vpack.c.bf16 %v1817_v16, %v1785_v15  ;;  %v1085_v15 = vld [vmem:[#allocation4 + $0x828] sm:$0xff] }
  0x88   : > { %v1117_v16 = vld [vmem:[#allocation4 + $0x928] sm:$0xff] }
  0x8a   : > { %3462 = vmatpush1.bf16.msra.mxu0 %v3461_v23  ;;  %v1209_v23 = vld [vmem:[#allocation4 + $0xc08] sm:$0xff] }
  0x8b   : > { %3464 = vmatprep.subr.bf16.mxu0 %v3463_v26  ;;  %v3375_v26 = vpack.c.bf16 %v1241_v24, %v1209_v23  ;;  %v1786_v24 = vld [vmem:[#allocation4 + $0x1e10] sm:$0xff] }
  0x8e   : > { %3466 = vmatpush1.bf16.msra.mxu0 %v3465_v29  ;;  %v1273_v29 = vld [vmem:[#allocation4 + $0xe08] sm:$0xff] }
  0x8f   : > { %3468 = vmatprep.subr.bf16.mxu0 %v3467_v32  ;;  %v3379_v32 = vpack.c.bf16 %v1305_v30, %v1273_v29  ;;  %v831_v29 = vld [vmem:[#allocation4 + $0x38] sm:$0xff]  ;;  %v3479_v30 = vpack.c.bf16 %v861_v28, %v829_v27  ;;  %v1149_v27 = vld [vmem:[#allocation4 + $0xa28] sm:$0xff] }
  0x90   : > { %v1181_v28 = vld [vmem:[#allocation4 + $0xb28] sm:$0xff] }
  0x92   : > { %3470 = vmatpush1.bf16.msra.mxu0 %v3469_v35  ;;  %v1337_v35 = vld [vmem:[#allocation4 + $0x1008] sm:$0xff] }
  0x93   : > { %3472 = vmatprep.subr.bf16.mxu0 %v3471_v38  ;;  %v3383_v38 = vpack.c.bf16 %v1369_v36, %v1337_v35  ;;  %v860_v35 = vld [vmem:[#allocation4 + $0x120] sm:$0xff]  ;;  %v830_v36 = vld [vmem:[#allocation4 + $0x30] sm:$0xff] }
  0x96   : > { %3474 = vmatpush1.bf16.msra.mxu0 %v3473_v41  ;;  %v1401_v41 = vld [vmem:[#allocation4 + $0x1208] sm:$0xff] }
  0xc6   : > { %v742_v34 = vpop.permute.xlu0 %741 }
 0x124   : > { %v476_v42 = vpop.f32.mrb[0].mxu1 }
 0x125   : > { %v478_v43 = vpop.f32.mrb[1].mxu1 }
 0x130   : > { %v724_v44 = vpop.f32.mrb[0].mxu0 }
 0x131   : > { %v4375_v45 = vadd.f32 %v724_v44, %v476_v42  ;;  %v726_v46 = vpop.f32.mrb[1].mxu0  ;;  %v1433_v42 = vld [vmem:[#allocation4 + $0x1308] sm:$0xff] }
 0x132   : > { %v4376_v49 = vadd.f32 %v726_v46, %v478_v43  ;;  %v3385_v43 = vpack.c.bf16 %v1368_v40, %v1336_v39  ;;  %v3387_v44 = vpack.c.bf16 %v1433_v42, %v1401_v41  ;;  %v1432_v46 = vld [vmem:[#allocation4 + $0x1300] sm:$0xff]  ;;  %v893_v39 = vld [vmem:[#allocation4 + $0x228] sm:$0xff]  ;;  %v895_v42 = vld [vmem:[#allocation4 + $0x238] sm:$0xff] }
 0x133   : > { %vm731_vm2 = vcmp.gt.f32.partialorder %v4375_v45, 1.0  ;;  %v1400_v45 = vld [vmem:[#allocation4 + $0x1200] sm:$0xff]  ;;  %v925_v41 = vld [vmem:[#allocation4 + $0x328] sm:$0xff] }
 0x134   : > { %vm732_vm3 = vcmp.gt.f32.partialorder %v4376_v49, 1.0  ;;  %v3307_v58 = vsel %vm731_vm2, 1.0, %v4495_v0  ;;  %v3389_v49 = vpack.c.bf16 %v1432_v46, %v1400_v45  ;;  %v3481_v45 = vpack.c.bf16 %v860_v35, %v828_v33  ;;  %v1148_v33 = vld [vmem:[#allocation4 + $0xa20] sm:$0xff] }
 0x135   : > { %v3308_v55 = vsel %vm732_vm3, 1.0, %v4495_v0  ;;  %v3499_v35 = vpack.c.bf16 %v1181_v28, %v1149_v27  ;;  %v1501_v27 = vld [vmem:[#allocation4 + $0x1528] sm:$0xff]  ;;  %v1471_v28 = vld [vmem:[#allocation4 + $0x1438] sm:$0xff] }
 0x136   : > { %3309 = vmatprep.subr.msk.mxu1 %vm405_vm0, %v3308_v55  ;;  %v3393_v55 = vpack.c.bf16 %v1496_v52, %v1464_v51  ;;  %v926_v51 = vld [vmem:[#allocation4 + $0x330] sm:$0xff]  ;;  %v957_v52 = vld [vmem:[#allocation4 + $0x428] sm:$0xff] }
 0x137   : > { %3310 = vmatpush1.msk.msra.mxu1 %vm405_vm0, %v3307_v58  ;;  %v1560_v58 = vld [vmem:[#allocation4 + $0x1700] sm:$0xff] }
 0x138   : > { %3311 = vmatmul.mubr.msk.f32.vlgmr.msra.gmra.mrb[2].mxu1 %vm401_vm1, %v737_v56  ;;  %3352 = vmatprep.subr.bf16.mxu1 %v3351_v54  ;;  %v1561_v54 = vld [vmem:[#allocation4 + $0x1708] sm:$0xff] }
 0x139   : > { %3354 = vmatpush1.bf16.msra.mxu1 %v3353_v57  ;;  %v3395_v56 = vpack.c.bf16 %v1561_v54, %v1529_v53  ;;  %v1528_v57 = vld [vmem:[#allocation4 + $0x1600] sm:$0xff]  ;;  %v3483_v53 = vpack.c.bf16 %v925_v41, %v893_v39  ;;  %v1213_v39 = vld [vmem:[#allocation4 + $0xc28] sm:$0xff]  ;;  %v1215_v41 = vld [vmem:[#allocation4 + $0xc38] sm:$0xff] }
 0x13a   : > { %3356 = vmatprep.subr.bf16.mxu1 %v3355_v59  ;;  %v1593_v59 = vld [vmem:[#allocation4 + $0x1808] sm:$0xff]  ;;  %v3397_v61 = vpack.c.bf16 %v1560_v58, %v1528_v57  ;;  %v991_v57 = vld [vmem:[#allocation4 + $0x538] sm:$0xff]  ;;  %v3485_v58 = vpack.c.bf16 %v924_v48, %v892_v47  ;;  %v1244_v47 = vld [vmem:[#allocation4 + $0xd20] sm:$0xff] }
 0x13b   : > { %v3399_v62 = vpack.c.bf16 %v1625_v60, %v1593_v59  ;;  %v956_v60 = vld [vmem:[#allocation4 + $0x420] sm:$0xff] }
 0x13d   : > { %3358 = vmatpush1.bf16.msra.mxu1 %v3357_v1  ;;  %v1624_v1 = vld [vmem:[#allocation4 + $0x1900] sm:$0xff] }
 0x13e   : > { %3360 = vmatprep.subr.bf16.mxu1 %v3359_v2  ;;  %v1657_v2 = vld [vmem:[#allocation4 + $0x1a08] sm:$0xff]  ;;  %v3401_v4 = vpack.c.bf16 %v1624_v1, %v1592_v63  ;;  %v958_v1 = vld [vmem:[#allocation4 + $0x430] sm:$0xff] }
 0x13f   : > { %v3403_v5 = vpack.c.bf16 %v1689_v3, %v1657_v2  ;;  %v990_v2 = vld [vmem:[#allocation4 + $0x530] sm:$0xff]  ;;  %v1021_v3 = vld [vmem:[#allocation4 + $0x628] sm:$0xff] }
 0x141   : > { %3362 = vmatpush1.bf16.msra.mxu1 %v3361_v7  ;;  %v1688_v7 = vld [vmem:[#allocation4 + $0x1b00] sm:$0xff] }
 0x142   : > { %3364 = vmatprep.subr.bf16.mxu1 %v3363_v8  ;;  %v1721_v8 = vld [vmem:[#allocation4 + $0x1c08] sm:$0xff]  ;;  %v3405_v10 = vpack.c.bf16 %v1688_v7, %v1656_v6  ;;  %v1055_v6 = vld [vmem:[#allocation4 + $0x738] sm:$0xff] }
 0x143   : > { %v3407_v11 = vpack.c.bf16 %v1753_v9, %v1721_v8  ;;  %v3553_v8 = vpack.c.bf16 %v990_v2, %v958_v1  ;;  %v1020_v9 = vld [vmem:[#allocation4 + $0x620] sm:$0xff]  ;;  %v1310_v1 = vld [vmem:[#allocation4 + $0xf30] sm:$0xff]  ;;  %v1341_v2 = vld [vmem:[#allocation4 + $0x1028] sm:$0xff] }
 0x145   : > { %3366 = vmatpush1.bf16.msra.mxu1 %v3365_v13  ;;  %v1752_v13 = vld [vmem:[#allocation4 + $0x1d00] sm:$0xff] }
 0x146   : > { %3368 = vmatprep.subr.bf16.mxu1 %v3367_v14  ;;  %v3409_v14 = vpack.c.bf16 %v1752_v13, %v1720_v12  ;;  %v1022_v13 = vld [vmem:[#allocation4 + $0x630] sm:$0xff] }
 0x149   : > { %3370 = vmatpush1.bf16.msra.mxu1 %v3369_v19  ;;  %v1819_v19 = vld [vmem:[#allocation4 + $0x1f18] sm:$0xff] }
 0x14a   : > { %3372 = vmatprep.subr.bf16.mxu1 %v3371_v20  ;;  %v1784_v20 = vld [vmem:[#allocation4 + $0x1e00] sm:$0xff]  ;;  %v3475_v22 = vpack.c.bf16 %v1819_v19, %v1787_v17  ;;  %v1087_v17 = vld [vmem:[#allocation4 + $0x838] sm:$0xff] }
 0x14b   : > { %v3413_v23 = vpack.c.bf16 %v1816_v21, %v1784_v20  ;;  %v1084_v21 = vld [vmem:[#allocation4 + $0x820] sm:$0xff] }
 0x14c   : > { %3476 = vmatprep.subr.bf16.mxu0 %v3475_v22  ;;  %v1116_v22 = vld [vmem:[#allocation4 + $0x920] sm:$0xff] }
 0x14d   : > { %3374 = vmatpush1.bf16.msra.mxu1 %v3373_v25  ;;  %v1818_v25 = vld [vmem:[#allocation4 + $0x1f10] sm:$0xff] }
 0x14e   : > { %3376 = vmatprep.subr.bf16.mxu1 %v3375_v26  ;;  %v3477_v26 = vpack.c.bf16 %v1818_v25, %v1786_v24  ;;  %v1086_v25 = vld [vmem:[#allocation4 + $0x830] sm:$0xff] }
 0x150   : > { %3478 = vmatpush1.bf16.msra.mxu0 %v3477_v26  ;;  %v1118_v26 = vld [vmem:[#allocation4 + $0x930] sm:$0xff] }
 0x151   : > { %3378 = vmatpush1.bf16.msra.mxu1 %v3377_v31  ;;  %v863_v31 = vld [vmem:[#allocation4 + $0x138] sm:$0xff] }
 0x152   : > { %3380 = vmatprep.subr.bf16.mxu1 %v3379_v32  ;;  %v3543_v32 = vpack.c.bf16 %v863_v31, %v831_v29  ;;  %v1151_v29 = vld [vmem:[#allocation4 + $0xa38] sm:$0xff]  ;;  %v3497_v31 = vpack.c.bf16 %v1116_v22, %v1084_v21  ;;  %v1436_v21 = vld [vmem:[#allocation4 + $0x1320] sm:$0xff] }
 0x154   : > { %3544 = vmatprep.subr.bf16.mxu0 %v3543_v32  ;;  %v3561_v32 = vpack.c.bf16 %v1118_v26, %v1086_v25  ;;  %v1438_v25 = vld [vmem:[#allocation4 + $0x1330] sm:$0xff]  ;;  %v1469_v26 = vld [vmem:[#allocation4 + $0x1428] sm:$0xff] }
 0x155   : > { %3382 = vmatpush1.bf16.msra.mxu1 %v3381_v37  ;;  %v862_v37 = vld [vmem:[#allocation4 + $0x130] sm:$0xff] }
 0x156   : > { %3384 = vmatprep.subr.bf16.mxu1 %v3383_v38  ;;  %v3545_v46 = vpack.c.bf16 %v862_v37, %v830_v36  ;;  %v1150_v37 = vld [vmem:[#allocation4 + $0xa30] sm:$0xff] }
 0x159   : > { %3386 = vmatpush1.bf16.msra.mxu1 %v3385_v43  ;;  %v927_v43 = vld [vmem:[#allocation4 + $0x338] sm:$0xff] }
 0x15a   : > { %3388 = vmatprep.subr.bf16.mxu1 %v3387_v44  ;;  %v3547_v54 = vpack.c.bf16 %v927_v43, %v895_v42  ;;  %v1247_v42 = vld [vmem:[#allocation4 + $0xd38] sm:$0xff] }
 0x15d   : > { %3390 = vmatpush1.bf16.msra.mxu1 %v3389_v49 }
 0x15e   : > { %3392 = vmatprep.subr.bf16.mxu1 %v3391_v50  ;;  %v894_v50 = vld [vmem:[#allocation4 + $0x230] sm:$0xff] }
 0x15f   : > { %v3549_v59 = vpack.c.bf16 %v926_v51, %v894_v50  ;;  %v3567_v50 = vpack.c.bf16 %v1247_v42, %v1215_v41  ;;  %v1214_v51 = vld [vmem:[#allocation4 + $0xc30] sm:$0xff]  ;;  %v1567_v41 = vld [vmem:[#allocation4 + $0x1738] sm:$0xff] }
 0x161   : > { %3394 = vmatpush1.bf16.msra.mxu1 %v3393_v55  ;;  %v989_v55 = vld [vmem:[#allocation4 + $0x528] sm:$0xff] }
 0x162   : > { %3396 = vmatprep.subr.bf16.mxu1 %v3395_v56  ;;  %v959_v56 = vld [vmem:[#allocation4 + $0x438] sm:$0xff] }
 0x163   : > { %v3551_v63 = vpack.c.bf16 %v991_v57, %v959_v56  ;;  %v1311_v56 = vld [vmem:[#allocation4 + $0xf38] sm:$0xff] }
 0x165   : > { %3398 = vmatpush1.bf16.msra.mxu1 %v3397_v61  ;;  %v988_v61 = vld [vmem:[#allocation4 + $0x520] sm:$0xff] }
 0x166   : > { %3400 = vmatprep.subr.bf16.mxu1 %v3399_v62  ;;  %v3487_v62 = vpack.c.bf16 %v989_v55, %v957_v52  ;;  %v3489_v7 = vpack.c.bf16 %v988_v61, %v956_v60  ;;  %v1246_v52 = vld [vmem:[#allocation4 + $0xd30] sm:$0xff]  ;;  %v1279_v55 = vld [vmem:[#allocation4 + $0xe38] sm:$0xff]  ;;  %v1308_v60 = vld [vmem:[#allocation4 + $0xf20] sm:$0xff] }
 0x169   : > { %3402 = vmatpush1.bf16.msra.mxu1 %v3401_v4  ;;  %v1053_v4 = vld [vmem:[#allocation4 + $0x728] sm:$0xff] }
 0x16a   : > { %3404 = vmatprep.subr.bf16.mxu1 %v3403_v5  ;;  %v1023_v5 = vld [vmem:[#allocation4 + $0x638] sm:$0xff] }
 0x16b   : > { %v3555_v12 = vpack.c.bf16 %v1055_v6, %v1023_v5  ;;  %v1375_v5 = vld [vmem:[#allocation4 + $0x1138] sm:$0xff] }
 0x16d   : > { %3406 = vmatpush1.bf16.msra.mxu1 %v3405_v10  ;;  %v1052_v10 = vld [vmem:[#allocation4 + $0x720] sm:$0xff] }
 0x16e   : > { %3408 = vmatprep.subr.bf16.mxu1 %v3407_v11  ;;  %v3491_v11 = vpack.c.bf16 %v1053_v4, %v1021_v3  ;;  %v3493_v19 = vpack.c.bf16 %v1052_v10, %v1020_v9  ;;  %v1373_v3 = vld [vmem:[#allocation4 + $0x1128] sm:$0xff]  ;;  %v1343_v4 = vld [vmem:[#allocation4 + $0x1038] sm:$0xff]  ;;  %v1372_v9 = vld [vmem:[#allocation4 + $0x1120] sm:$0xff] }
 0x16f   : > { %v3511_v10 = vpack.c.bf16 %v1373_v3, %v1341_v2  ;;  %v1693_v2 = vld [vmem:[#allocation4 + $0x1b28] sm:$0xff]  ;;  %v1663_v3 = vld [vmem:[#allocation4 + $0x1a38] sm:$0xff] }
 0x171   : > { %3410 = vmatpush1.bf16.msra.mxu1 %v3409_v14  ;;  %v1054_v14 = vld [vmem:[#allocation4 + $0x730] sm:$0xff] }
 0x172   : > { %3412 = vmatprep.subr.bf16.mxu1 %v3411_v18  ;;  %v1119_v18 = vld [vmem:[#allocation4 + $0x938] sm:$0xff]  ;;  %v3557_v20 = vpack.c.bf16 %v1054_v14, %v1022_v13  ;;  %v1374_v13 = vld [vmem:[#allocation4 + $0x1130] sm:$0xff]  ;;  %v1405_v14 = vld [vmem:[#allocation4 + $0x1228] sm:$0xff] }
 0x173   : > { %v3559_v24 = vpack.c.bf16 %v1119_v18, %v1087_v17  ;;  %v1439_v17 = vld [vmem:[#allocation4 + $0x1338] sm:$0xff] }
 0x175   : > { %3414 = vmatpush1.bf16.msra.mxu1 %v3413_v23  ;;  %v3495_v23 = vpack.c.bf16 %v1117_v16, %v1085_v15  ;;  %v1437_v15 = vld [vmem:[#allocation4 + $0x1328] sm:$0xff]  ;;  %v1407_v16 = vld [vmem:[#allocation4 + $0x1238] sm:$0xff] }
 0x176   : > { %3480 = vmatprep.subr.bf16.mxu1 %v3479_v30  ;;  %v1183_v30 = vld [vmem:[#allocation4 + $0xb38] sm:$0xff]  ;;  %v3515_v22 = vpack.c.bf16 %v1437_v15, %v1405_v14  ;;  %v1757_v14 = vld [vmem:[#allocation4 + $0x1d28] sm:$0xff] }
 0x177   : > { %v3563_v36 = vpack.c.bf16 %v1183_v30, %v1151_v29  ;;  %v1503_v29 = vld [vmem:[#allocation4 + $0x1538] sm:$0xff] }
 0x178   : > { %v1727_v15 = vld [vmem:[#allocation4 + $0x1c38] sm:$0xff] }
 0x20b   : > { %v819_v38 = vpop.f32.mrb[2].mxu1 }
 0x20c   : > { %v821_v40 = vpop.f32.mrb[3].mxu1  ;;  %v4680_v49 = vadd.f32 %v819_v38, %v742_v34  ;;  %v1182_v38 = vld [vmem:[#allocation4 + $0xb30] sm:$0xff] }
 0x20d   : > { %v4678_v44 = vadd.f32 %v821_v40, %v742_v34  ;;  %v1180_v34 = vld [vmem:[#allocation4 + $0xb20] sm:$0xff]  ;;  %v1245_v40 = vld [vmem:[#allocation4 + $0xd28] sm:$0xff] }
 0x20e   : > { %v3501_v43 = vpack.c.bf16 %v1180_v34, %v1148_v33  ;;  %v3503_v48 = vpack.c.bf16 %v1245_v40, %v1213_v39  ;;  %v1500_v33 = vld [vmem:[#allocation4 + $0x1520] sm:$0xff]  ;;  %v3519_v34 = vpack.c.bf16 %v1501_v27, %v1469_v26  ;;  %v1565_v39 = vld [vmem:[#allocation4 + $0x1728] sm:$0xff]  ;;  %v1535_v40 = vld [vmem:[#allocation4 + $0x1638] sm:$0xff] }
 0x20f   : > { %1912 = vmatprep.mubr.f32.mxu1 %v4678_v44  ;;  %1983 = vmatprep.mubr.f32.mxu0 %v4678_v44  ;;  %v1821_v26 = vld [vmem:[#allocation4 + $0x1f28] sm:$0xff]  ;;  %v1791_v27 = vld [vmem:[#allocation4 + $0x1e38] sm:$0xff] }
 0x210   : > { %1913 = vmatmul.mubr.f32.vlgmr.msra.gmra.mrb[4].mxu1 %v4680_v49  ;;  %1984 = vmatmul.mubr.f32.vlgmr.msra.gmra.mrb[2].mxu0 %v4680_v49 }
 0x211   : > { %3482 = vmatpush1.bf16.msra.mxu1 %v3481_v45  ;;  %3546 = vmatpush1.bf16.msra.mxu0 %v3545_v46  ;;  %v3565_v45 = vpack.c.bf16 %v1182_v38, %v1150_v37  ;;  %v1212_v46 = vld [vmem:[#allocation4 + $0xc20] sm:$0xff]  ;;  %v1502_v37 = vld [vmem:[#allocation4 + $0x1530] sm:$0xff]  ;;  %v1533_v38 = vld [vmem:[#allocation4 + $0x1628] sm:$0xff] }
 0x212   : > { %2054 = vmatprep.mubr.f32.mxu1 %v4678_v44  ;;  %2125 = vmatprep.mubr.f32.mxu0 %v4678_v44  ;;  %v3505_v57 = vpack.c.bf16 %v1244_v47, %v1212_v46  ;;  %v1564_v46 = vld [vmem:[#allocation4 + $0x1720] sm:$0xff]  ;;  %v3523_v47 = vpack.c.bf16 %v1565_v39, %v1533_v38  ;;  %v865_v38 = vld [vmem:[#allocation4 + $0x148] sm:$0xff]  ;;  %v835_v39 = vld [vmem:[#allocation4 + $0x58] sm:$0xff] }
 0x213   : > { %3484 = vmatprep.subr.bf16.mxu1 %v3483_v53  ;;  %3548 = vmatprep.subr.bf16.mxu0 %v3547_v54  ;;  %v1277_v53 = vld [vmem:[#allocation4 + $0xe28] sm:$0xff] }
 0x214   : > { %v1309_v54 = vld [vmem:[#allocation4 + $0xf28] sm:$0xff] }
 0x215   : > { %3486 = vmatpush1.bf16.msra.mxu1 %v3485_v58  ;;  %3550 = vmatpush1.bf16.msra.mxu0 %v3549_v59  ;;  %v3569_v58 = vpack.c.bf16 %v1246_v52, %v1214_v51  ;;  %v1276_v59 = vld [vmem:[#allocation4 + $0xe20] sm:$0xff]  ;;  %v3507_v61 = vpack.c.bf16 %v1309_v54, %v1277_v53  ;;  %v1566_v51 = vld [vmem:[#allocation4 + $0x1730] sm:$0xff]  ;;  %v1597_v52 = vld [vmem:[#allocation4 + $0x1828] sm:$0xff] }
 0x216   : > { %3488 = vmatprep.subr.bf16.mxu1 %v3487_v62  ;;  %3552 = vmatprep.subr.bf16.mxu0 %v3551_v63  ;;  %v3571_v62 = vpack.c.bf16 %v1311_v56, %v1279_v55  ;;  %v1278_v63 = vld [vmem:[#allocation4 + $0xe30] sm:$0xff]  ;;  %v3509_v6 = vpack.c.bf16 %v1308_v60, %v1276_v59  ;;  %v1629_v53 = vld [vmem:[#allocation4 + $0x1928] sm:$0xff]  ;;  %v1599_v54 = vld [vmem:[#allocation4 + $0x1838] sm:$0xff] }
 0x217   : > { %v1631_v55 = vld [vmem:[#allocation4 + $0x1938] sm:$0xff]  ;;  %v1628_v59 = vld [vmem:[#allocation4 + $0x1920] sm:$0xff]  ;;  %v3527_v60 = vpack.c.bf16 %v1629_v53, %v1597_v52  ;;  %v929_v52 = vld [vmem:[#allocation4 + $0x348] sm:$0xff] }
 0x218   : > { %v899_v53 = vld [vmem:[#allocation4 + $0x258] sm:$0xff] }
 0x219   : > { %3490 = vmatpush1.bf16.msra.mxu1 %v3489_v7  ;;  %3554 = vmatpush1.bf16.msra.mxu0 %v3553_v8  ;;  %v3573_v7 = vpack.c.bf16 %v1310_v1, %v1278_v63  ;;  %v1340_v8 = vld [vmem:[#allocation4 + $0x1020] sm:$0xff]  ;;  %v1630_v63 = vld [vmem:[#allocation4 + $0x1930] sm:$0xff]  ;;  %v1661_v1 = vld [vmem:[#allocation4 + $0x1a28] sm:$0xff] }
 0x21a   : > { %3492 = vmatprep.subr.bf16.mxu1 %v3491_v11  ;;  %3556 = vmatprep.subr.bf16.mxu0 %v3555_v12  ;;  %v3575_v11 = vpack.c.bf16 %v1375_v5, %v1343_v4  ;;  %v1342_v12 = vld [vmem:[#allocation4 + $0x1030] sm:$0xff]  ;;  %v3513_v18 = vpack.c.bf16 %v1372_v9, %v1340_v8  ;;  %v1695_v4 = vld [vmem:[#allocation4 + $0x1b38] sm:$0xff]  ;;  %v1692_v8 = vld [vmem:[#allocation4 + $0x1b20] sm:$0xff]  ;;  %v3531_v9 = vpack.c.bf16 %v1693_v2, %v1661_v1 }
 0x21b   : > { %v993_v1 = vld [vmem:[#allocation4 + $0x548] sm:$0xff]  ;;  %v963_v2 = vld [vmem:[#allocation4 + $0x458] sm:$0xff] }
 0x21d   : > { %3494 = vmatpush1.bf16.msra.mxu1 %v3493_v19  ;;  %3558 = vmatpush1.bf16.msra.mxu0 %v3557_v20  ;;  %v3577_v19 = vpack.c.bf16 %v1374_v13, %v1342_v12  ;;  %v1404_v20 = vld [vmem:[#allocation4 + $0x1220] sm:$0xff]  ;;  %v1694_v12 = vld [vmem:[#allocation4 + $0x1b30] sm:$0xff]  ;;  %v1725_v13 = vld [vmem:[#allocation4 + $0x1c28] sm:$0xff] }
 0x21e   : > { %3496 = vmatprep.subr.bf16.mxu1 %v3495_v23  ;;  %3560 = vmatprep.subr.bf16.mxu0 %v3559_v24  ;;  %v3579_v23 = vpack.c.bf16 %v1439_v17, %v1407_v16  ;;  %v1406_v24 = vld [vmem:[#allocation4 + $0x1230] sm:$0xff]  ;;  %v3517_v30 = vpack.c.bf16 %v1436_v21, %v1404_v20  ;;  %v1759_v16 = vld [vmem:[#allocation4 + $0x1d38] sm:$0xff]  ;;  %v1756_v20 = vld [vmem:[#allocation4 + $0x1d20] sm:$0xff]  ;;  %v3535_v21 = vpack.c.bf16 %v1757_v14, %v1725_v13 }
 0x21f   : > { %v1057_v13 = vld [vmem:[#allocation4 + $0x748] sm:$0xff]  ;;  %v1027_v14 = vld [vmem:[#allocation4 + $0x658] sm:$0xff] }
 0x221   : > { %3498 = vmatpush1.bf16.msra.mxu1 %v3497_v31  ;;  %3562 = vmatpush1.bf16.msra.mxu0 %v3561_v32  ;;  %v3581_v31 = vpack.c.bf16 %v1438_v25, %v1406_v24  ;;  %v1468_v32 = vld [vmem:[#allocation4 + $0x1420] sm:$0xff]  ;;  %v1758_v24 = vld [vmem:[#allocation4 + $0x1d30] sm:$0xff]  ;;  %v1789_v25 = vld [vmem:[#allocation4 + $0x1e28] sm:$0xff] }
 0x222   : > { %3500 = vmatprep.subr.bf16.mxu1 %v3499_v35  ;;  %3564 = vmatprep.subr.bf16.mxu0 %v3563_v36  ;;  %v3583_v35 = vpack.c.bf16 %v1503_v29, %v1471_v28  ;;  %v1470_v36 = vld [vmem:[#allocation4 + $0x1430] sm:$0xff]  ;;  %v3521_v42 = vpack.c.bf16 %v1500_v33, %v1468_v32  ;;  %v1823_v28 = vld [vmem:[#allocation4 + $0x1f38] sm:$0xff]  ;;  %v1820_v32 = vld [vmem:[#allocation4 + $0x1f20] sm:$0xff]  ;;  %v3539_v33 = vpack.c.bf16 %v1821_v26, %v1789_v25 }
 0x223   : > { %v1121_v25 = vld [vmem:[#allocation4 + $0x948] sm:$0xff]  ;;  %v1091_v26 = vld [vmem:[#allocation4 + $0x858] sm:$0xff] }
 0x225   : > { %3502 = vmatpush1.bf16.msra.mxu1 %v3501_v43  ;;  %3566 = vmatpush1.bf16.msra.mxu0 %v3565_v45  ;;  %v3585_v43 = vpack.c.bf16 %v1502_v37, %v1470_v36  ;;  %v1532_v45 = vld [vmem:[#allocation4 + $0x1620] sm:$0xff]  ;;  %v1822_v36 = vld [vmem:[#allocation4 + $0x1f30] sm:$0xff]  ;;  %v833_v37 = vld [vmem:[#allocation4 + $0x48] sm:$0xff] }
 0x226   : > { %3504 = vmatprep.subr.bf16.mxu1 %v3503_v48  ;;  %3568 = vmatprep.subr.bf16.mxu0 %v3567_v50  ;;  %v3587_v48 = vpack.c.bf16 %v1567_v41, %v1535_v40  ;;  %v1534_v50 = vld [vmem:[#allocation4 + $0x1630] sm:$0xff]  ;;  %v3525_v56 = vpack.c.bf16 %v1564_v46, %v1532_v45  ;;  %v867_v40 = vld [vmem:[#allocation4 + $0x158] sm:$0xff]  ;;  %v832_v46 = vld [vmem:[#allocation4 + $0x40] sm:$0xff] }
 0x227   : > { %v3671_v45 = vpack.c.bf16 %v867_v40, %v835_v39  ;;  %v1187_v39 = vld [vmem:[#allocation4 + $0xb58] sm:$0xff] }
 0x229   : > { %3506 = vmatpush1.bf16.msra.mxu1 %v3505_v57  ;;  %3570 = vmatpush1.bf16.msra.mxu0 %v3569_v58  ;;  %v3589_v57 = vpack.c.bf16 %v1566_v51, %v1534_v50  ;;  %v1596_v58 = vld [vmem:[#allocation4 + $0x1820] sm:$0xff]  ;;  %v866_v50 = vld [vmem:[#allocation4 + $0x150] sm:$0xff]  ;;  %v897_v51 = vld [vmem:[#allocation4 + $0x248] sm:$0xff] }
 0x22a   : > { %3508 = vmatprep.subr.bf16.mxu1 %v3507_v61  ;;  %3572 = vmatprep.subr.bf16.mxu0 %v3571_v62  ;;  %v3591_v61 = vpack.c.bf16 %v1631_v55, %v1599_v54  ;;  %v1598_v62 = vld [vmem:[#allocation4 + $0x1830] sm:$0xff]  ;;  %v3529_v5 = vpack.c.bf16 %v1628_v59, %v1596_v58  ;;  %v931_v54 = vld [vmem:[#allocation4 + $0x358] sm:$0xff]  ;;  %v928_v58 = vld [vmem:[#allocation4 + $0x340] sm:$0xff] }
 0x22b   : > { %v898_v59 = vld [vmem:[#allocation4 + $0x250] sm:$0xff] }
 0x22d   : > { %3510 = vmatpush1.bf16.msra.mxu1 %v3509_v6  ;;  %3574 = vmatpush1.bf16.msra.mxu0 %v3573_v7  ;;  %v3593_v6 = vpack.c.bf16 %v1630_v63, %v1598_v62  ;;  %v1660_v7 = vld [vmem:[#allocation4 + $0x1a20] sm:$0xff]  ;;  %v930_v62 = vld [vmem:[#allocation4 + $0x350] sm:$0xff]  ;;  %v961_v63 = vld [vmem:[#allocation4 + $0x448] sm:$0xff] }
 0x22e   : > { %3512 = vmatprep.subr.bf16.mxu1 %v3511_v10  ;;  %3576 = vmatprep.subr.bf16.mxu0 %v3575_v11  ;;  %v3595_v10 = vpack.c.bf16 %v1695_v4, %v1663_v3  ;;  %v1662_v11 = vld [vmem:[#allocation4 + $0x1a30] sm:$0xff]  ;;  %v3533_v17 = vpack.c.bf16 %v1692_v8, %v1660_v7  ;;  %v995_v3 = vld [vmem:[#allocation4 + $0x558] sm:$0xff]  ;;  %v960_v7 = vld [vmem:[#allocation4 + $0x440] sm:$0xff] }
 0x22f   : > { %v992_v8 = vld [vmem:[#allocation4 + $0x540] sm:$0xff] }
 0x231   : > { %3514 = vmatpush1.bf16.msra.mxu1 %v3513_v18  ;;  %3578 = vmatpush1.bf16.msra.mxu0 %v3577_v19  ;;  %v3597_v18 = vpack.c.bf16 %v1694_v12, %v1662_v11  ;;  %v1724_v19 = vld [vmem:[#allocation4 + $0x1c20] sm:$0xff]  ;;  %v994_v11 = vld [vmem:[#allocation4 + $0x550] sm:$0xff]  ;;  %v1025_v12 = vld [vmem:[#allocation4 + $0x648] sm:$0xff] }
 0x232   : > { %3516 = vmatprep.subr.bf16.mxu1 %v3515_v22  ;;  %3580 = vmatprep.subr.bf16.mxu0 %v3579_v23  ;;  %v3599_v22 = vpack.c.bf16 %v1759_v16, %v1727_v15  ;;  %v1726_v23 = vld [vmem:[#allocation4 + $0x1c30] sm:$0xff]  ;;  %v3537_v29 = vpack.c.bf16 %v1756_v20, %v1724_v19  ;;  %v1059_v15 = vld [vmem:[#allocation4 + $0x758] sm:$0xff]  ;;  %v3617_v16 = vpack.c.bf16 %v992_v8, %v960_v7  ;;  %v1024_v19 = vld [vmem:[#allocation4 + $0x640] sm:$0xff] }
 0x233   : > { %v1056_v20 = vld [vmem:[#allocation4 + $0x740] sm:$0xff]  ;;  %v1282_v8 = vld [vmem:[#allocation4 + $0xe50] sm:$0xff] }
 0x234   : > { %v1312_v7 = vld [vmem:[#allocation4 + $0xf40] sm:$0xff] }
 0x235   : > { %3518 = vmatpush1.bf16.msra.mxu1 %v3517_v30  ;;  %3582 = vmatpush1.bf16.msra.mxu0 %v3581_v31  ;;  %v3601_v30 = vpack.c.bf16 %v1758_v24, %v1726_v23  ;;  %v1788_v31 = vld [vmem:[#allocation4 + $0x1e20] sm:$0xff]  ;;  %v1058_v23 = vld [vmem:[#allocation4 + $0x750] sm:$0xff]  ;;  %v1089_v24 = vld [vmem:[#allocation4 + $0x848] sm:$0xff] }
 0x236   : > { %3520 = vmatprep.subr.bf16.mxu1 %v3519_v34  ;;  %3584 = vmatprep.subr.bf16.mxu0 %v3583_v35  ;;  %v3603_v34 = vpack.c.bf16 %v1823_v28, %v1791_v27  ;;  %v1790_v35 = vld [vmem:[#allocation4 + $0x1e30] sm:$0xff]  ;;  %v3541_v41 = vpack.c.bf16 %v1820_v32, %v1788_v31  ;;  %v1123_v27 = vld [vmem:[#allocation4 + $0x958] sm:$0xff]  ;;  %v3621_v28 = vpack.c.bf16 %v1056_v20, %v1024_v19  ;;  %v1088_v31 = vld [vmem:[#allocation4 + $0x840] sm:$0xff] }
 0x237   : > { %v1120_v32 = vld [vmem:[#allocation4 + $0x940] sm:$0xff]  ;;  %v1346_v20 = vld [vmem:[#allocation4 + $0x1050] sm:$0xff] }
 0x238   : > { %v3625_v40 = vpack.c.bf16 %v1120_v32, %v1088_v31  ;;  %v1376_v19 = vld [vmem:[#allocation4 + $0x1140] sm:$0xff]  ;;  %v1410_v32 = vld [vmem:[#allocation4 + $0x1250] sm:$0xff] }
 0x239   : > { %3522 = vmatpush1.bf16.msra.mxu1 %v3521_v42  ;;  %3586 = vmatpush1.bf16.msra.mxu0 %v3585_v43  ;;  %v3605_v42 = vpack.c.bf16 %v1822_v36, %v1790_v35  ;;  %v3607_v43 = vpack.c.bf16 %v865_v38, %v833_v37  ;;  %v1122_v35 = vld [vmem:[#allocation4 + $0x950] sm:$0xff]  ;;  %v1153_v36 = vld [vmem:[#allocation4 + $0xa48] sm:$0xff]  ;;  %v1155_v38 = vld [vmem:[#allocation4 + $0xa58] sm:$0xff] }
 0x23a   : > { %3524 = vmatprep.subr.bf16.mxu1 %v3523_v47  ;;  %3588 = vmatprep.subr.bf16.mxu0 %v3587_v48  ;;  %v864_v47 = vld [vmem:[#allocation4 + $0x140] sm:$0xff]  ;;  %v834_v48 = vld [vmem:[#allocation4 + $0x50] sm:$0xff]  ;;  %v1185_v37 = vld [vmem:[#allocation4 + $0xb48] sm:$0xff] }
 0x23b   : > { %v3609_v55 = vpack.c.bf16 %v864_v47, %v832_v46  ;;  %v1154_v46 = vld [vmem:[#allocation4 + $0xa50] sm:$0xff]  ;;  %v3691_v47 = vpack.c.bf16 %v1187_v39, %v1155_v38  ;;  %v1440_v31 = vld [vmem:[#allocation4 + $0x1340] sm:$0xff]  ;;  %v1507_v38 = vld [vmem:[#allocation4 + $0x1558] sm:$0xff] }
 0x23d   : > { %3526 = vmatpush1.bf16.msra.mxu1 %v3525_v56  ;;  %3590 = vmatpush1.bf16.msra.mxu0 %v3589_v57  ;;  %v3673_v56 = vpack.c.bf16 %v866_v50, %v834_v48  ;;  %v896_v57 = vld [vmem:[#allocation4 + $0x240] sm:$0xff]  ;;  %v1186_v48 = vld [vmem:[#allocation4 + $0xb50] sm:$0xff]  ;;  %v1217_v50 = vld [vmem:[#allocation4 + $0xc48] sm:$0xff] }
 0x23e   : > { %3528 = vmatprep.subr.bf16.mxu1 %v3527_v60  ;;  %3592 = vmatprep.subr.bf16.mxu0 %v3591_v61  ;;  %v3611_v60 = vpack.c.bf16 %v929_v52, %v897_v51  ;;  %v3675_v61 = vpack.c.bf16 %v931_v54, %v899_v53  ;;  %v3613_v4 = vpack.c.bf16 %v928_v58, %v896_v57  ;;  %v1249_v51 = vld [vmem:[#allocation4 + $0xd48] sm:$0xff]  ;;  %v1219_v52 = vld [vmem:[#allocation4 + $0xc58] sm:$0xff]  ;;  %v1216_v57 = vld [vmem:[#allocation4 + $0xc40] sm:$0xff] }
 0x23f   : > { %v1251_v53 = vld [vmem:[#allocation4 + $0xd58] sm:$0xff]  ;;  %v1248_v58 = vld [vmem:[#allocation4 + $0xd40] sm:$0xff] }
 0x241   : > { %3530 = vmatpush1.bf16.msra.mxu1 %v3529_v5  ;;  %3594 = vmatpush1.bf16.msra.mxu0 %v3593_v6  ;;  %v3677_v5 = vpack.c.bf16 %v930_v62, %v898_v59  ;;  %v3615_v6 = vpack.c.bf16 %v993_v1, %v961_v63  ;;  %v1218_v59 = vld [vmem:[#allocation4 + $0xc50] sm:$0xff]  ;;  %v1281_v62 = vld [vmem:[#allocation4 + $0xe48] sm:$0xff]  ;;  %v1283_v1 = vld [vmem:[#allocation4 + $0xe58] sm:$0xff] }
 0x242   : > { %3532 = vmatprep.subr.bf16.mxu1 %v3531_v9  ;;  %3596 = vmatprep.subr.bf16.mxu0 %v3595_v10  ;;  %v962_v9 = vld [vmem:[#allocation4 + $0x450] sm:$0xff]  ;;  %v3679_v10 = vpack.c.bf16 %v995_v3, %v963_v2  ;;  %v1313_v63 = vld [vmem:[#allocation4 + $0xf48] sm:$0xff]  ;;  %v1315_v2 = vld [vmem:[#allocation4 + $0xf58] sm:$0xff]  ;;  %v3633_v3 = vpack.c.bf16 %v1248_v58, %v1216_v57 }
 0x243   : > { %v1568_v57 = vld [vmem:[#allocation4 + $0x1740] sm:$0xff]  ;;  %v1538_v58 = vld [vmem:[#allocation4 + $0x1650] sm:$0xff] }
 0x245   : > { %3534 = vmatpush1.bf16.msra.mxu1 %v3533_v17  ;;  %3598 = vmatpush1.bf16.msra.mxu0 %v3597_v18  ;;  %v3681_v17 = vpack.c.bf16 %v994_v11, %v962_v9  ;;  %v3619_v18 = vpack.c.bf16 %v1057_v13, %v1025_v12  ;;  %v3699_v9 = vpack.c.bf16 %v1315_v2, %v1283_v1  ;;  %v1345_v11 = vld [vmem:[#allocation4 + $0x1048] sm:$0xff]  ;;  %v1347_v13 = vld [vmem:[#allocation4 + $0x1058] sm:$0xff] }
 0x246   : > { %3536 = vmatprep.subr.bf16.mxu1 %v3535_v21  ;;  %3600 = vmatprep.subr.bf16.mxu0 %v3599_v22  ;;  %v1026_v21 = vld [vmem:[#allocation4 + $0x650] sm:$0xff]  ;;  %v3683_v22 = vpack.c.bf16 %v1059_v15, %v1027_v14  ;;  %v1377_v12 = vld [vmem:[#allocation4 + $0x1148] sm:$0xff]  ;;  %v1379_v14 = vld [vmem:[#allocation4 + $0x1158] sm:$0xff] }
 0x247   : > { %v1635_v1 = vld [vmem:[#allocation4 + $0x1958] sm:$0xff] }
 0x249   : > { %3538 = vmatpush1.bf16.msra.mxu1 %v3537_v29  ;;  %3602 = vmatpush1.bf16.msra.mxu0 %v3601_v30  ;;  %v3685_v29 = vpack.c.bf16 %v1058_v23, %v1026_v21  ;;  %v3623_v30 = vpack.c.bf16 %v1121_v25, %v1089_v24  ;;  %v3703_v21 = vpack.c.bf16 %v1379_v14, %v1347_v13  ;;  %v1409_v23 = vld [vmem:[#allocation4 + $0x1248] sm:$0xff]  ;;  %v1411_v25 = vld [vmem:[#allocation4 + $0x1258] sm:$0xff] }
 0x24a   : > { %3540 = vmatprep.subr.bf16.mxu1 %v3539_v33  ;;  %3604 = vmatprep.subr.bf16.mxu0 %v3603_v34  ;;  %v1090_v33 = vld [vmem:[#allocation4 + $0x850] sm:$0xff]  ;;  %v3687_v34 = vpack.c.bf16 %v1123_v27, %v1091_v26  ;;  %v1441_v24 = vld [vmem:[#allocation4 + $0x1348] sm:$0xff]  ;;  %v1443_v26 = vld [vmem:[#allocation4 + $0x1358] sm:$0xff] }
 0x24b   : > { %v1699_v13 = vld [vmem:[#allocation4 + $0x1b58] sm:$0xff] }
 0x24d   : > { %3542 = vmatpush1.bf16.msra.mxu1 %v3541_v41  ;;  %3606 = vmatpush1.bf16.msra.mxu0 %v3605_v42  ;;  %v3689_v41 = vpack.c.bf16 %v1122_v35, %v1090_v33  ;;  %v3627_v42 = vpack.c.bf16 %v1185_v37, %v1153_v36  ;;  %v3707_v33 = vpack.c.bf16 %v1443_v26, %v1411_v25  ;;  %v1473_v35 = vld [vmem:[#allocation4 + $0x1448] sm:$0xff]  ;;  %v1475_v37 = vld [vmem:[#allocation4 + $0x1458] sm:$0xff] }
 0x24e   : > { %3608 = vmatprep.subr.bf16.mxu1 %v3607_v43  ;;  %3672 = vmatprep.subr.bf16.mxu0 %v3671_v45  ;;  %v1152_v43 = vld [vmem:[#allocation4 + $0xa40] sm:$0xff]  ;;  %v1505_v36 = vld [vmem:[#allocation4 + $0x1548] sm:$0xff]  ;;  %v1763_v25 = vld [vmem:[#allocation4 + $0x1d58] sm:$0xff] }
 0x24f   : > { %v1184_v45 = vld [vmem:[#allocation4 + $0xb40] sm:$0xff] }
 0x250   : > { %2055 = vmatmul.mubr.f32.vlgmr.msra.gmra.mrb[6].mxu1 %v4680_v49  ;;  %2126 = vmatmul.mubr.f32.vlgmr.msra.gmra.mrb[4].mxu0 %v4680_v49  ;;  %v3629_v54 = vpack.c.bf16 %v1184_v45, %v1152_v43  ;;  %v1504_v43 = vld [vmem:[#allocation4 + $0x1540] sm:$0xff]  ;;  %v1474_v45 = vld [vmem:[#allocation4 + $0x1450] sm:$0xff] }
 0x251   : > { %3610 = vmatpush1.bf16.msra.mxu1 %v3609_v55  ;;  %2196 = vmatprep.mubr.f32.mxu1 %v4678_v44  ;;  %v3693_v55 = vpack.c.bf16 %v1186_v48, %v1154_v46  ;;  %v3711_v46 = vpack.c.bf16 %v1507_v38, %v1475_v37  ;;  %v1537_v48 = vld [vmem:[#allocation4 + $0x1648] sm:$0xff]  ;;  %v1827_v37 = vld [vmem:[#allocation4 + $0x1f58] sm:$0xff] }
 0x252   : > { %3674 = vmatpush1.bf16.msra.mxu0 %v3673_v56  ;;  %2267 = vmatprep.mubr.f32.mxu0 %v4678_v44  ;;  %v3631_v56 = vpack.c.bf16 %v1249_v51, %v1217_v50  ;;  %v1569_v50 = vld [vmem:[#allocation4 + $0x1748] sm:$0xff]  ;;  %v1539_v51 = vld [vmem:[#allocation4 + $0x1658] sm:$0xff] }
 0x253   : > { %3612 = vmatprep.subr.bf16.mxu1 %v3611_v60  ;;  %3676 = vmatprep.subr.bf16.mxu0 %v3675_v61  ;;  %v3695_v60 = vpack.c.bf16 %v1251_v53, %v1219_v52  ;;  %v1250_v61 = vld [vmem:[#allocation4 + $0xd50] sm:$0xff]  ;;  %v1571_v52 = vld [vmem:[#allocation4 + $0x1758] sm:$0xff] }
 0x255   : > { %3614 = vmatpush1.bf16.msra.mxu1 %v3613_v4  ;;  %v3697_v4 = vpack.c.bf16 %v1250_v61, %v1218_v59  ;;  %v3715_v59 = vpack.c.bf16 %v1571_v52, %v1539_v51  ;;  %v1601_v61 = vld [vmem:[#allocation4 + $0x1848] sm:$0xff]  ;;  %v871_v51 = vld [vmem:[#allocation4 + $0x178] sm:$0xff] }
 0x256   : > { %3678 = vmatpush1.bf16.msra.mxu0 %v3677_v5  ;;  %3616 = vmatprep.subr.bf16.mxu1 %v3615_v6  ;;  %v3635_v5 = vpack.c.bf16 %v1313_v63, %v1281_v62  ;;  %v1280_v6 = vld [vmem:[#allocation4 + $0xe40] sm:$0xff]  ;;  %v1633_v62 = vld [vmem:[#allocation4 + $0x1948] sm:$0xff]  ;;  %v1603_v63 = vld [vmem:[#allocation4 + $0x1858] sm:$0xff] }
 0x257   : > { %3680 = vmatprep.subr.bf16.mxu0 %v3679_v10  ;;  %v1314_v10 = vld [vmem:[#allocation4 + $0xf50] sm:$0xff]  ;;  %v3637_v15 = vpack.c.bf16 %v1312_v7, %v1280_v6  ;;  %v1632_v6 = vld [vmem:[#allocation4 + $0x1940] sm:$0xff] }
 0x258   : > { %v1602_v7 = vld [vmem:[#allocation4 + $0x1850] sm:$0xff] }
 0x259   : > { %3618 = vmatpush1.bf16.msra.mxu1 %v3617_v16  ;;  %v3701_v16 = vpack.c.bf16 %v1314_v10, %v1282_v8  ;;  %v3719_v8 = vpack.c.bf16 %v1635_v1, %v1603_v63  ;;  %v1665_v10 = vld [vmem:[#allocation4 + $0x1a48] sm:$0xff]  ;;  %v903_v63 = vld [vmem:[#allocation4 + $0x278] sm:$0xff] }
 0x25a   : > { %3682 = vmatpush1.bf16.msra.mxu0 %v3681_v17  ;;  %3620 = vmatprep.subr.bf16.mxu1 %v3619_v18  ;;  %v3639_v17 = vpack.c.bf16 %v1377_v12, %v1345_v11  ;;  %v1344_v18 = vld [vmem:[#allocation4 + $0x1040] sm:$0xff]  ;;  %v1697_v11 = vld [vmem:[#allocation4 + $0x1b48] sm:$0xff]  ;;  %v1667_v12 = vld [vmem:[#allocation4 + $0x1a58] sm:$0xff] }
 0x25b   : > { %3684 = vmatprep.subr.bf16.mxu0 %v3683_v22  ;;  %v1378_v22 = vld [vmem:[#allocation4 + $0x1150] sm:$0xff]  ;;  %v3641_v27 = vpack.c.bf16 %v1376_v19, %v1344_v18  ;;  %v1696_v18 = vld [vmem:[#allocation4 + $0x1b40] sm:$0xff]  ;;  %v935_v1 = vld [vmem:[#allocation4 + $0x378] sm:$0xff] }
 0x25c   : > { %v1666_v19 = vld [vmem:[#allocation4 + $0x1a50] sm:$0xff] }
 0x25d   : > { %3622 = vmatpush1.bf16.msra.mxu1 %v3621_v28  ;;  %v3705_v28 = vpack.c.bf16 %v1378_v22, %v1346_v20  ;;  %v3723_v20 = vpack.c.bf16 %v1699_v13, %v1667_v12  ;;  %v1729_v22 = vld [vmem:[#allocation4 + $0x1c48] sm:$0xff]  ;;  %v999_v12 = vld [vmem:[#allocation4 + $0x578] sm:$0xff] }
 0x25e   : > { %3686 = vmatpush1.bf16.msra.mxu0 %v3685_v29  ;;  %3624 = vmatprep.subr.bf16.mxu1 %v3623_v30  ;;  %v3643_v29 = vpack.c.bf16 %v1441_v24, %v1409_v23  ;;  %v1408_v30 = vld [vmem:[#allocation4 + $0x1240] sm:$0xff]  ;;  %v1761_v23 = vld [vmem:[#allocation4 + $0x1d48] sm:$0xff]  ;;  %v1731_v24 = vld [vmem:[#allocation4 + $0x1c58] sm:$0xff] }
 0x25f   : > { %3688 = vmatprep.subr.bf16.mxu0 %v3687_v34  ;;  %v1442_v34 = vld [vmem:[#allocation4 + $0x1350] sm:$0xff]  ;;  %v3645_v39 = vpack.c.bf16 %v1440_v31, %v1408_v30  ;;  %v1760_v30 = vld [vmem:[#allocation4 + $0x1d40] sm:$0xff] }
 0x260   : > { %v1730_v31 = vld [vmem:[#allocation4 + $0x1c50] sm:$0xff] }
 0x261   : > { %3626 = vmatpush1.bf16.msra.mxu1 %v3625_v40  ;;  %v3709_v40 = vpack.c.bf16 %v1442_v34, %v1410_v32  ;;  %v3727_v32 = vpack.c.bf16 %v1763_v25, %v1731_v24  ;;  %v1793_v34 = vld [vmem:[#allocation4 + $0x1e48] sm:$0xff]  ;;  %v1063_v24 = vld [vmem:[#allocation4 + $0x778] sm:$0xff] }
 0x262   : > { %3690 = vmatpush1.bf16.msra.mxu0 %v3689_v41  ;;  %3628 = vmatprep.subr.bf16.mxu1 %v3627_v42  ;;  %v3647_v41 = vpack.c.bf16 %v1505_v36, %v1473_v35  ;;  %v1472_v42 = vld [vmem:[#allocation4 + $0x1440] sm:$0xff]  ;;  %v1825_v35 = vld [vmem:[#allocation4 + $0x1f48] sm:$0xff]  ;;  %v1795_v36 = vld [vmem:[#allocation4 + $0x1e58] sm:$0xff] }
 0x263   : > { %3692 = vmatprep.subr.bf16.mxu0 %v3691_v47  ;;  %v1506_v47 = vld [vmem:[#allocation4 + $0x1550] sm:$0xff]  ;;  %v3649_v53 = vpack.c.bf16 %v1504_v43, %v1472_v42  ;;  %v1824_v42 = vld [vmem:[#allocation4 + $0x1f40] sm:$0xff] }
 0x264   : > { %v1794_v43 = vld [vmem:[#allocation4 + $0x1e50] sm:$0xff] }
 0x265   : > { %3630 = vmatpush1.bf16.msra.mxu1 %v3629_v54  ;;  %v3713_v54 = vpack.c.bf16 %v1506_v47, %v1474_v45  ;;  %v3731_v45 = vpack.c.bf16 %v1827_v37, %v1795_v36  ;;  %v837_v47 = vld [vmem:[#allocation4 + $0x68] sm:$0xff]  ;;  %v1127_v36 = vld [vmem:[#allocation4 + $0x978] sm:$0xff] }
 0x266   : > { %3694 = vmatpush1.bf16.msra.mxu0 %v3693_v55  ;;  %3632 = vmatprep.subr.bf16.mxu1 %v3631_v56  ;;  %v3651_v55 = vpack.c.bf16 %v1569_v50, %v1537_v48  ;;  %v1536_v56 = vld [vmem:[#allocation4 + $0x1640] sm:$0xff]  ;;  %v869_v48 = vld [vmem:[#allocation4 + $0x168] sm:$0xff]  ;;  %v839_v50 = vld [vmem:[#allocation4 + $0x78] sm:$0xff] }
 0x267   : > { %3696 = vmatprep.subr.bf16.mxu0 %v3695_v60  ;;  %v1570_v60 = vld [vmem:[#allocation4 + $0x1750] sm:$0xff]  ;;  %v3653_v2 = vpack.c.bf16 %v1568_v57, %v1536_v56  ;;  %v868_v56 = vld [vmem:[#allocation4 + $0x160] sm:$0xff]  ;;  %v3799_v57 = vpack.c.bf16 %v871_v51, %v839_v50  ;;  %v1191_v50 = vld [vmem:[#allocation4 + $0xb78] sm:$0xff] }
 0x269   : > { %3634 = vmatpush1.bf16.msra.mxu1 %v3633_v3  ;;  %v3717_v3 = vpack.c.bf16 %v1570_v60, %v1538_v58  ;;  %v838_v58 = vld [vmem:[#allocation4 + $0x70] sm:$0xff]  ;;  %v901_v60 = vld [vmem:[#allocation4 + $0x268] sm:$0xff] }
 0x26a   : > { %3698 = vmatpush1.bf16.msra.mxu0 %v3697_v4  ;;  %3636 = vmatprep.subr.bf16.mxu1 %v3635_v5  ;;  %v3655_v4 = vpack.c.bf16 %v1633_v62, %v1601_v61  ;;  %v1600_v5 = vld [vmem:[#allocation4 + $0x1840] sm:$0xff]  ;;  %v933_v61 = vld [vmem:[#allocation4 + $0x368] sm:$0xff] }
 0x26b   : > { %3700 = vmatprep.subr.bf16.mxu0 %v3699_v9  ;;  %v1634_v9 = vld [vmem:[#allocation4 + $0x1950] sm:$0xff]  ;;  %v3657_v14 = vpack.c.bf16 %v1632_v6, %v1600_v5  ;;  %v3739_v6 = vpack.c.bf16 %v933_v61, %v901_v60  ;;  %v1253_v60 = vld [vmem:[#allocation4 + $0xd68] sm:$0xff]  ;;  %v1223_v61 = vld [vmem:[#allocation4 + $0xc78] sm:$0xff] }
 0x26c   : > { %v902_v5 = vld [vmem:[#allocation4 + $0x270] sm:$0xff] }
 0x26d   : > { %3638 = vmatpush1.bf16.msra.mxu1 %v3637_v15  ;;  %v3721_v15 = vpack.c.bf16 %v1634_v9, %v1602_v7  ;;  %v934_v7 = vld [vmem:[#allocation4 + $0x370] sm:$0xff]  ;;  %v997_v9 = vld [vmem:[#allocation4 + $0x568] sm:$0xff] }
 0x26e   : > { %3702 = vmatpush1.bf16.msra.mxu0 %v3701_v16  ;;  %3640 = vmatprep.subr.bf16.mxu1 %v3639_v17  ;;  %v3659_v16 = vpack.c.bf16 %v1697_v11, %v1665_v10  ;;  %v1664_v17 = vld [vmem:[#allocation4 + $0x1a40] sm:$0xff]  ;;  %v3803_v10 = vpack.c.bf16 %v935_v1, %v903_v63  ;;  %v967_v11 = vld [vmem:[#allocation4 + $0x478] sm:$0xff] }
 0x26f   : > { %3704 = vmatprep.subr.bf16.mxu0 %v3703_v21  ;;  %v1698_v21 = vld [vmem:[#allocation4 + $0x1b50] sm:$0xff]  ;;  %v3661_v26 = vpack.c.bf16 %v1696_v18, %v1664_v17  ;;  %v996_v17 = vld [vmem:[#allocation4 + $0x560] sm:$0xff] }
 0x270   : > { %v966_v18 = vld [vmem:[#allocation4 + $0x470] sm:$0xff] }
 0x271   : > { %3642 = vmatpush1.bf16.msra.mxu1 %v3641_v27  ;;  %v3725_v27 = vpack.c.bf16 %v1698_v21, %v1666_v19  ;;  %v3807_v19 = vpack.c.bf16 %v999_v12, %v967_v11  ;;  %v1029_v21 = vld [vmem:[#allocation4 + $0x668] sm:$0xff]  ;;  %v1319_v11 = vld [vmem:[#allocation4 + $0xf78] sm:$0xff] }
 0x272   : > { %3706 = vmatpush1.bf16.msra.mxu0 %v3705_v28  ;;  %3644 = vmatprep.subr.bf16.mxu1 %v3643_v29  ;;  %v3663_v28 = vpack.c.bf16 %v1761_v23, %v1729_v22  ;;  %v1728_v29 = vld [vmem:[#allocation4 + $0x1c40] sm:$0xff]  ;;  %v1061_v22 = vld [vmem:[#allocation4 + $0x768] sm:$0xff]  ;;  %v1031_v23 = vld [vmem:[#allocation4 + $0x678] sm:$0xff] }
 0x273   : > { %3708 = vmatprep.subr.bf16.mxu0 %v3707_v33  ;;  %v1762_v33 = vld [vmem:[#allocation4 + $0x1d50] sm:$0xff]  ;;  %v3665_v38 = vpack.c.bf16 %v1760_v30, %v1728_v29  ;;  %v1060_v29 = vld [vmem:[#allocation4 + $0x760] sm:$0xff] }
 0x274   : > { %v1030_v30 = vld [vmem:[#allocation4 + $0x670] sm:$0xff] }
 0x275   : > { %3646 = vmatpush1.bf16.msra.mxu1 %v3645_v39  ;;  %v3729_v39 = vpack.c.bf16 %v1762_v33, %v1730_v31  ;;  %v3811_v31 = vpack.c.bf16 %v1063_v24, %v1031_v23  ;;  %v1093_v33 = vld [vmem:[#allocation4 + $0x868] sm:$0xff]  ;;  %v1383_v23 = vld [vmem:[#allocation4 + $0x1178] sm:$0xff] }
 0x276   : > { %3710 = vmatpush1.bf16.msra.mxu0 %v3709_v40  ;;  %3648 = vmatprep.subr.bf16.mxu1 %v3647_v41  ;;  %v3667_v40 = vpack.c.bf16 %v1825_v35, %v1793_v34  ;;  %v1792_v41 = vld [vmem:[#allocation4 + $0x1e40] sm:$0xff]  ;;  %v1125_v34 = vld [vmem:[#allocation4 + $0x968] sm:$0xff]  ;;  %v1095_v35 = vld [vmem:[#allocation4 + $0x878] sm:$0xff] }
 0x277   : > { %3712 = vmatprep.subr.bf16.mxu0 %v3711_v46  ;;  %v1826_v46 = vld [vmem:[#allocation4 + $0x1f50] sm:$0xff]  ;;  %v3669_v52 = vpack.c.bf16 %v1824_v42, %v1792_v41  ;;  %v1124_v41 = vld [vmem:[#allocation4 + $0x960] sm:$0xff] }
 0x278   : > { %v1094_v42 = vld [vmem:[#allocation4 + $0x870] sm:$0xff] }
 0x279   : > { %3650 = vmatpush1.bf16.msra.mxu1 %v3649_v53  ;;  %v3733_v53 = vpack.c.bf16 %v1826_v46, %v1794_v43  ;;  %v3815_v43 = vpack.c.bf16 %v1127_v36, %v1095_v35  ;;  %v1157_v46 = vld [vmem:[#allocation4 + $0xa68] sm:$0xff]  ;;  %v1447_v35 = vld [vmem:[#allocation4 + $0x1378] sm:$0xff] }
 0x27a   : > { %3714 = vmatpush1.bf16.msra.mxu0 %v3713_v54  ;;  %3652 = vmatprep.subr.bf16.mxu1 %v3651_v55  ;;  %v3735_v54 = vpack.c.bf16 %v869_v48, %v837_v47  ;;  %v836_v55 = vld [vmem:[#allocation4 + $0x60] sm:$0xff]  ;;  %v1189_v47 = vld [vmem:[#allocation4 + $0xb68] sm:$0xff]  ;;  %v1159_v48 = vld [vmem:[#allocation4 + $0xa78] sm:$0xff] }
 0x27b   : > { %3716 = vmatprep.subr.bf16.mxu0 %v3715_v59  ;;  %v870_v59 = vld [vmem:[#allocation4 + $0x170] sm:$0xff]  ;;  %v3737_v62 = vpack.c.bf16 %v868_v56, %v836_v55  ;;  %v1188_v55 = vld [vmem:[#allocation4 + $0xb60] sm:$0xff] }
 0x27c   : > { %v1158_v56 = vld [vmem:[#allocation4 + $0xa70] sm:$0xff] }
 0x27d   : > { %3654 = vmatpush1.bf16.msra.mxu1 %v3653_v2  ;;  %v3801_v2 = vpack.c.bf16 %v870_v59, %v838_v58  ;;  %v1190_v58 = vld [vmem:[#allocation4 + $0xb70] sm:$0xff]  ;;  %v1221_v59 = vld [vmem:[#allocation4 + $0xc68] sm:$0xff] }
 0x27e   : > { %3718 = vmatpush1.bf16.msra.mxu0 %v3717_v3  ;;  %3656 = vmatprep.subr.bf16.mxu1 %v3655_v4  ;;  %v900_v3 = vld [vmem:[#allocation4 + $0x260] sm:$0xff]  ;;  %v3821_v1 = vpack.c.bf16 %v1190_v58, %v1158_v56  ;;  %v1541_v58 = vld [vmem:[#allocation4 + $0x1668] sm:$0xff] }
 0x27f   : > { %3720 = vmatprep.subr.bf16.mxu0 %v3719_v8  ;;  %v932_v4 = vld [vmem:[#allocation4 + $0x360] sm:$0xff]  ;;  %v965_v8 = vld [vmem:[#allocation4 + $0x468] sm:$0xff] }
 0x280   : > { %v3741_v13 = vpack.c.bf16 %v932_v4, %v900_v3  ;;  %v1220_v3 = vld [vmem:[#allocation4 + $0xc60] sm:$0xff] }
 0x281   : > { %3658 = vmatpush1.bf16.msra.mxu1 %v3657_v14  ;;  %v3805_v14 = vpack.c.bf16 %v934_v7, %v902_v5  ;;  %v1252_v4 = vld [vmem:[#allocation4 + $0xd60] sm:$0xff]  ;;  %v1222_v5 = vld [vmem:[#allocation4 + $0xc70] sm:$0xff] }
 0x282   : > { %3722 = vmatpush1.bf16.msra.mxu0 %v3721_v15  ;;  %3660 = vmatprep.subr.bf16.mxu1 %v3659_v16  ;;  %v3743_v15 = vpack.c.bf16 %v997_v9, %v965_v8  ;;  %v964_v16 = vld [vmem:[#allocation4 + $0x460] sm:$0xff]  ;;  %v1254_v7 = vld [vmem:[#allocation4 + $0xd70] sm:$0xff]  ;;  %v1285_v8 = vld [vmem:[#allocation4 + $0xe68] sm:$0xff]  ;;  %v3761_v12 = vpack.c.bf16 %v1252_v4, %v1220_v3 }
 0x283   : > { %3724 = vmatprep.subr.bf16.mxu0 %v3723_v20  ;;  %v998_v20 = vld [vmem:[#allocation4 + $0x570] sm:$0xff]  ;;  %v3745_v25 = vpack.c.bf16 %v996_v17, %v964_v16  ;;  %v1317_v9 = vld [vmem:[#allocation4 + $0xf68] sm:$0xff]  ;;  %v1316_v16 = vld [vmem:[#allocation4 + $0xf60] sm:$0xff] }
 0x284   : > { %v1286_v17 = vld [vmem:[#allocation4 + $0xe70] sm:$0xff]  ;;  %v1572_v3 = vld [vmem:[#allocation4 + $0x1760] sm:$0xff] }
 0x285   : > { %3662 = vmatpush1.bf16.msra.mxu1 %v3661_v26  ;;  %v3809_v26 = vpack.c.bf16 %v998_v20, %v966_v18  ;;  %v1349_v20 = vld [vmem:[#allocation4 + $0x1068] sm:$0xff]  ;;  %v1542_v4 = vld [vmem:[#allocation4 + $0x1670] sm:$0xff] }
 0x286   : > { %3726 = vmatpush1.bf16.msra.mxu0 %v3725_v27  ;;  %3664 = vmatprep.subr.bf16.mxu1 %v3663_v28  ;;  %v3747_v27 = vpack.c.bf16 %v1061_v22, %v1029_v21  ;;  %v1028_v28 = vld [vmem:[#allocation4 + $0x660] sm:$0xff]  ;;  %v1381_v21 = vld [vmem:[#allocation4 + $0x1168] sm:$0xff]  ;;  %v1351_v22 = vld [vmem:[#allocation4 + $0x1078] sm:$0xff] }
 0x287   : > { %3728 = vmatprep.subr.bf16.mxu0 %v3727_v32  ;;  %v1062_v32 = vld [vmem:[#allocation4 + $0x770] sm:$0xff]  ;;  %v3749_v37 = vpack.c.bf16 %v1060_v29, %v1028_v28  ;;  %v1380_v28 = vld [vmem:[#allocation4 + $0x1160] sm:$0xff] }
 0x288   : > { %v1350_v29 = vld [vmem:[#allocation4 + $0x1070] sm:$0xff] }
 0x289   : > { %3666 = vmatpush1.bf16.msra.mxu1 %v3665_v38  ;;  %v3813_v38 = vpack.c.bf16 %v1062_v32, %v1030_v30  ;;  %v3831_v30 = vpack.c.bf16 %v1383_v23, %v1351_v22  ;;  %v1413_v32 = vld [vmem:[#allocation4 + $0x1268] sm:$0xff]  ;;  %v1703_v22 = vld [vmem:[#allocation4 + $0x1b78] sm:$0xff] }
 0x28a   : > { %3730 = vmatpush1.bf16.msra.mxu0 %v3729_v39  ;;  %3668 = vmatprep.subr.bf16.mxu1 %v3667_v40  ;;  %v3751_v39 = vpack.c.bf16 %v1125_v34, %v1093_v33  ;;  %v1092_v40 = vld [vmem:[#allocation4 + $0x860] sm:$0xff]  ;;  %v1445_v33 = vld [vmem:[#allocation4 + $0x1368] sm:$0xff]  ;;  %v1415_v34 = vld [vmem:[#allocation4 + $0x1278] sm:$0xff] }
 0x28b   : > { %3732 = vmatprep.subr.bf16.mxu0 %v3731_v45  ;;  %v1126_v45 = vld [vmem:[#allocation4 + $0x970] sm:$0xff]  ;;  %v3753_v51 = vpack.c.bf16 %v1124_v41, %v1092_v40  ;;  %v1444_v40 = vld [vmem:[#allocation4 + $0x1360] sm:$0xff] }
 0x28c   : > { %v1414_v41 = vld [vmem:[#allocation4 + $0x1270] sm:$0xff] }
 0x28d   : > { %3670 = vmatpush1.bf16.msra.mxu1 %v3669_v52  ;;  %v3817_v52 = vpack.c.bf16 %v1126_v45, %v1094_v42  ;;  %v3835_v42 = vpack.c.bf16 %v1447_v35, %v1415_v34  ;;  %v1477_v45 = vld [vmem:[#allocation4 + $0x1468] sm:$0xff]  ;;  %v1767_v34 = vld [vmem:[#allocation4 + $0x1d78] sm:$0xff] }
 0x28e   : > { %3734 = vmatpush1.bf16.msra.mxu0 %v3733_v53  ;;  %3736 = vmatprep.subr.bf16.mxu1 %v3735_v54  ;;  %v3755_v53 = vpack.c.bf16 %v1189_v47, %v1157_v46  ;;  %v1156_v54 = vld [vmem:[#allocation4 + $0xa60] sm:$0xff]  ;;  %v1509_v46 = vld [vmem:[#allocation4 + $0x1568] sm:$0xff]  ;;  %v1479_v47 = vld [vmem:[#allocation4 + $0x1478] sm:$0xff] }
 0x28f   : > { %3800 = vmatprep.subr.bf16.mxu0 %v3799_v57  ;;  %v3819_v57 = vpack.c.bf16 %v1191_v50, %v1159_v48  ;;  %v3757_v63 = vpack.c.bf16 %v1188_v55, %v1156_v54  ;;  %v1511_v48 = vld [vmem:[#allocation4 + $0x1578] sm:$0xff]  ;;  %v1508_v54 = vld [vmem:[#allocation4 + $0x1560] sm:$0xff]  ;;  %v1478_v55 = vld [vmem:[#allocation4 + $0x1470] sm:$0xff] }
 0x290   : > { %2197 = vmatmul.mubr.f32.vlgmr.msra.gmra.mrb[8].mxu1 %v4680_v49  ;;  %v3839_v56 = vpack.c.bf16 %v1511_v48, %v1479_v47  ;;  %v1831_v47 = vld [vmem:[#allocation4 + $0x1f78] sm:$0xff] }
 0x291   : > { %2268 = vmatmul.mubr.f32.vlgmr.msra.gmra.mrb[6].mxu0 %v4680_v49  ;;  %3738 = vmatpush1.bf16.msra.mxu1 %v3737_v62  ;;  %v1255_v62 = vld [vmem:[#allocation4 + $0xd78] sm:$0xff] }
 0x292   : > { %2338 = vmatprep.mubr.f32.mxu1 %v4678_v44  ;;  %3802 = vmatpush1.bf16.msra.mxu0 %v3801_v2  ;;  %v3759_v2 = vpack.c.bf16 %v1253_v60, %v1221_v59  ;;  %v1573_v59 = vld [vmem:[#allocation4 + $0x1768] sm:$0xff]  ;;  %v1543_v60 = vld [vmem:[#allocation4 + $0x1678] sm:$0xff] }
 0x293   : > { %2409 = vmatprep.mubr.f32.mxu0 %v4678_v44  ;;  %3740 = vmatprep.subr.bf16.mxu1 %v3739_v6  ;;  %v3823_v6 = vpack.c.bf16 %v1255_v62, %v1223_v61  ;;  %v1575_v61 = vld [vmem:[#allocation4 + $0x1778] sm:$0xff] }
 0x294   : > { %3804 = vmatprep.subr.bf16.mxu0 %v3803_v10  ;;  %v1287_v10 = vld [vmem:[#allocation4 + $0xe78] sm:$0xff] }
 0x295   : > { %3742 = vmatpush1.bf16.msra.mxu1 %v3741_v13  ;;  %v3825_v13 = vpack.c.bf16 %v1254_v7, %v1222_v5  ;;  %v3827_v18 = vpack.c.bf16 %v1319_v11, %v1287_v10  ;;  %v3843_v5 = vpack.c.bf16 %v1575_v61, %v1543_v60  ;;  %v1605_v7 = vld [vmem:[#allocation4 + $0x1868] sm:$0xff]  ;;  %v1639_v10 = vld [vmem:[#allocation4 + $0x1978] sm:$0xff] }
 0x296   : > { %3806 = vmatpush1.bf16.msra.mxu0 %v3805_v14  ;;  %3744 = vmatprep.subr.bf16.mxu1 %v3743_v15  ;;  %v3763_v14 = vpack.c.bf16 %v1317_v9, %v1285_v8  ;;  %v1284_v15 = vld [vmem:[#allocation4 + $0xe60] sm:$0xff]  ;;  %v1637_v8 = vld [vmem:[#allocation4 + $0x1968] sm:$0xff]  ;;  %v1607_v9 = vld [vmem:[#allocation4 + $0x1878] sm:$0xff] }
 0x297   : > { %3808 = vmatprep.subr.bf16.mxu0 %v3807_v19  ;;  %v1318_v19 = vld [vmem:[#allocation4 + $0xf70] sm:$0xff]  ;;  %v3765_v24 = vpack.c.bf16 %v1316_v16, %v1284_v15  ;;  %v1636_v15 = vld [vmem:[#allocation4 + $0x1960] sm:$0xff]  ;;  %v875_v60 = vld [vmem:[#allocation4 + $0x198] sm:$0xff] }
 0x298   : > { %v1606_v16 = vld [vmem:[#allocation4 + $0x1870] sm:$0xff] }
 0x299   : > { %3746 = vmatpush1.bf16.msra.mxu1 %v3745_v25  ;;  %v3829_v25 = vpack.c.bf16 %v1318_v19, %v1286_v17  ;;  %v3847_v17 = vpack.c.bf16 %v1639_v10, %v1607_v9  ;;  %v1669_v19 = vld [vmem:[#allocation4 + $0x1a68] sm:$0xff]  ;;  %v907_v9 = vld [vmem:[#allocation4 + $0x298] sm:$0xff] }
 0x29a   : > { %3810 = vmatpush1.bf16.msra.mxu0 %v3809_v26  ;;  %3748 = vmatprep.subr.bf16.mxu1 %v3747_v27  ;;  %v3767_v26 = vpack.c.bf16 %v1381_v21, %v1349_v20  ;;  %v1348_v27 = vld [vmem:[#allocation4 + $0x1060] sm:$0xff]  ;;  %v1701_v20 = vld [vmem:[#allocation4 + $0x1b68] sm:$0xff]  ;;  %v1671_v21 = vld [vmem:[#allocation4 + $0x1a78] sm:$0xff] }
 0x29b   : > { %3812 = vmatprep.subr.bf16.mxu0 %v3811_v31  ;;  %v1382_v31 = vld [vmem:[#allocation4 + $0x1170] sm:$0xff]  ;;  %v3769_v36 = vpack.c.bf16 %v1380_v28, %v1348_v27  ;;  %v1700_v27 = vld [vmem:[#allocation4 + $0x1b60] sm:$0xff]  ;;  %v939_v10 = vld [vmem:[#allocation4 + $0x398] sm:$0xff] }
 0x29c   : > { %v1670_v28 = vld [vmem:[#allocation4 + $0x1a70] sm:$0xff] }
 0x29d   : > { %3750 = vmatpush1.bf16.msra.mxu1 %v3749_v37  ;;  %v3833_v37 = vpack.c.bf16 %v1382_v31, %v1350_v29  ;;  %v3851_v29 = vpack.c.bf16 %v1703_v22, %v1671_v21  ;;  %v1733_v31 = vld [vmem:[#allocation4 + $0x1c68] sm:$0xff]  ;;  %v1003_v21 = vld [vmem:[#allocation4 + $0x598] sm:$0xff] }
 0x29e   : > { %3814 = vmatpush1.bf16.msra.mxu0 %v3813_v38  ;;  %3752 = vmatprep.subr.bf16.mxu1 %v3751_v39  ;;  %v3771_v38 = vpack.c.bf16 %v1445_v33, %v1413_v32  ;;  %v1412_v39 = vld [vmem:[#allocation4 + $0x1260] sm:$0xff]  ;;  %v1765_v32 = vld [vmem:[#allocation4 + $0x1d68] sm:$0xff]  ;;  %v1735_v33 = vld [vmem:[#allocation4 + $0x1c78] sm:$0xff] }
 0x29f   : > { %3816 = vmatprep.subr.bf16.mxu0 %v3815_v43  ;;  %v1446_v43 = vld [vmem:[#allocation4 + $0x1370] sm:$0xff]  ;;  %v3773_v50 = vpack.c.bf16 %v1444_v40, %v1412_v39  ;;  %v1764_v39 = vld [vmem:[#allocation4 + $0x1d60] sm:$0xff] }
 0x2a0   : > { %v1734_v40 = vld [vmem:[#allocation4 + $0x1c70] sm:$0xff] }
 0x2a1   : > { %3754 = vmatpush1.bf16.msra.mxu1 %v3753_v51  ;;  %v3837_v51 = vpack.c.bf16 %v1446_v43, %v1414_v41  ;;  %v3855_v41 = vpack.c.bf16 %v1767_v34, %v1735_v33  ;;  %v1797_v43 = vld [vmem:[#allocation4 + $0x1e68] sm:$0xff]  ;;  %v1067_v33 = vld [vmem:[#allocation4 + $0x798] sm:$0xff] }
 0x2a2   : > { %3818 = vmatpush1.bf16.msra.mxu0 %v3817_v52  ;;  %3756 = vmatprep.subr.bf16.mxu1 %v3755_v53  ;;  %v3775_v52 = vpack.c.bf16 %v1509_v46, %v1477_v45  ;;  %v1476_v53 = vld [vmem:[#allocation4 + $0x1460] sm:$0xff]  ;;  %v1829_v45 = vld [vmem:[#allocation4 + $0x1f68] sm:$0xff]  ;;  %v1799_v46 = vld [vmem:[#allocation4 + $0x1e78] sm:$0xff] }
 0x2a3   : > { %3820 = vmatprep.subr.bf16.mxu0 %v3819_v57  ;;  %v1510_v57 = vld [vmem:[#allocation4 + $0x1570] sm:$0xff]  ;;  %v3777_v62 = vpack.c.bf16 %v1508_v54, %v1476_v53  ;;  %v1828_v53 = vld [vmem:[#allocation4 + $0x1f60] sm:$0xff] }
 0x2a4   : > { %v1798_v54 = vld [vmem:[#allocation4 + $0x1e70] sm:$0xff] }
 0x2a5   : > { %3758 = vmatpush1.bf16.msra.mxu1 %v3757_v63  ;;  %v3841_v63 = vpack.c.bf16 %v1510_v57, %v1478_v55  ;;  %v3859_v55 = vpack.c.bf16 %v1831_v47, %v1799_v46  ;;  %v841_v57 = vld [vmem:[#allocation4 + $0x88] sm:$0xff]  ;;  %v1131_v46 = vld [vmem:[#allocation4 + $0x998] sm:$0xff] }
 0x2a6   : > { %3822 = vmatpush1.bf16.msra.mxu0 %v3821_v1  ;;  %3760 = vmatprep.subr.bf16.mxu1 %v3759_v2  ;;  %v3779_v1 = vpack.c.bf16 %v1573_v59, %v1541_v58  ;;  %v1540_v2 = vld [vmem:[#allocation4 + $0x1660] sm:$0xff]  ;;  %v873_v58 = vld [vmem:[#allocation4 + $0x188] sm:$0xff]  ;;  %v843_v59 = vld [vmem:[#allocation4 + $0x98] sm:$0xff] }
 0x2a7   : > { %3824 = vmatprep.subr.bf16.mxu0 %v3823_v6  ;;  %v1574_v6 = vld [vmem:[#allocation4 + $0x1770] sm:$0xff]  ;;  %v3781_v11 = vpack.c.bf16 %v1572_v3, %v1540_v2  ;;  %v872_v2 = vld [vmem:[#allocation4 + $0x180] sm:$0xff]  ;;  %v3927_v3 = vpack.c.bf16 %v875_v60, %v843_v59  ;;  %v1195_v59 = vld [vmem:[#allocation4 + $0xb98] sm:$0xff] }
 0x2a9   : > { %3762 = vmatpush1.bf16.msra.mxu1 %v3761_v12  ;;  %v3845_v12 = vpack.c.bf16 %v1574_v6, %v1542_v4  ;;  %v842_v4 = vld [vmem:[#allocation4 + $0x90] sm:$0xff]  ;;  %v905_v6 = vld [vmem:[#allocation4 + $0x288] sm:$0xff] }
 0x2aa   : > { %3826 = vmatpush1.bf16.msra.mxu0 %v3825_v13  ;;  %3764 = vmatprep.subr.bf16.mxu1 %v3763_v14  ;;  %v3783_v13 = vpack.c.bf16 %v1637_v8, %v1605_v7  ;;  %v1604_v14 = vld [vmem:[#allocation4 + $0x1860] sm:$0xff]  ;;  %v937_v7 = vld [vmem:[#allocation4 + $0x388] sm:$0xff] }
 0x2ab   : > { %3828 = vmatprep.subr.bf16.mxu0 %v3827_v18  ;;  %v1638_v18 = vld [vmem:[#allocation4 + $0x1970] sm:$0xff]  ;;  %v3785_v23 = vpack.c.bf16 %v1636_v15, %v1604_v14  ;;  %v3867_v15 = vpack.c.bf16 %v937_v7, %v905_v6  ;;  %v1257_v6 = vld [vmem:[#allocation4 + $0xd88] sm:$0xff]  ;;  %v1227_v7 = vld [vmem:[#allocation4 + $0xc98] sm:$0xff] }
 0x2ac   : > { %v906_v14 = vld [vmem:[#allocation4 + $0x290] sm:$0xff] }
 0x2ad   : > { %3766 = vmatpush1.bf16.msra.mxu1 %v3765_v24  ;;  %v3849_v24 = vpack.c.bf16 %v1638_v18, %v1606_v16  ;;  %v938_v16 = vld [vmem:[#allocation4 + $0x390] sm:$0xff]  ;;  %v1001_v18 = vld [vmem:[#allocation4 + $0x588] sm:$0xff] }
 0x2ae   : > { %3830 = vmatpush1.bf16.msra.mxu0 %v3829_v25  ;;  %3768 = vmatprep.subr.bf16.mxu1 %v3767_v26  ;;  %v3787_v25 = vpack.c.bf16 %v1701_v20, %v1669_v19  ;;  %v1668_v26 = vld [vmem:[#allocation4 + $0x1a60] sm:$0xff]  ;;  %v3931_v19 = vpack.c.bf16 %v939_v10, %v907_v9  ;;  %v971_v20 = vld [vmem:[#allocation4 + $0x498] sm:$0xff] }
 0x2af   : > { %3832 = vmatprep.subr.bf16.mxu0 %v3831_v30  ;;  %v1702_v30 = vld [vmem:[#allocation4 + $0x1b70] sm:$0xff]  ;;  %v3789_v35 = vpack.c.bf16 %v1700_v27, %v1668_v26  ;;  %v1000_v26 = vld [vmem:[#allocation4 + $0x580] sm:$0xff] }
 0x2b0   : > { %v970_v27 = vld [vmem:[#allocation4 + $0x490] sm:$0xff]  ;;  %v1224_v10 = vld [vmem:[#allocation4 + $0xc80] sm:$0xff] }
 0x2b1   : > { %3770 = vmatpush1.bf16.msra.mxu1 %v3769_v36  ;;  %v3853_v36 = vpack.c.bf16 %v1702_v30, %v1670_v28  ;;  %v3935_v28 = vpack.c.bf16 %v1003_v21, %v971_v20  ;;  %v1033_v30 = vld [vmem:[#allocation4 + $0x688] sm:$0xff] }
 0x2b2   : > { %3834 = vmatpush1.bf16.msra.mxu0 %v3833_v37  ;;  %3772 = vmatprep.subr.bf16.mxu1 %v3771_v38  ;;  %v3791_v37 = vpack.c.bf16 %v1765_v32, %v1733_v31  ;;  %v1732_v38 = vld [vmem:[#allocation4 + $0x1c60] sm:$0xff]  ;;  %v1065_v31 = vld [vmem:[#allocation4 + $0x788] sm:$0xff]  ;;  %v1035_v32 = vld [vmem:[#allocation4 + $0x698] sm:$0xff] }
 0x2b3   : > { %3836 = vmatprep.subr.bf16.mxu0 %v3835_v42  ;;  %v1766_v42 = vld [vmem:[#allocation4 + $0x1d70] sm:$0xff]  ;;  %v3793_v48 = vpack.c.bf16 %v1764_v39, %v1732_v38  ;;  %v1064_v38 = vld [vmem:[#allocation4 + $0x780] sm:$0xff]  ;;  %v1321_v20 = vld [vmem:[#allocation4 + $0xf88] sm:$0xff] }
 0x2b4   : > { %v1034_v39 = vld [vmem:[#allocation4 + $0x690] sm:$0xff] }
 0x2b5   : > { %3774 = vmatpush1.bf16.msra.mxu1 %v3773_v50  ;;  %v3857_v50 = vpack.c.bf16 %v1766_v42, %v1734_v40  ;;  %v3939_v40 = vpack.c.bf16 %v1067_v33, %v1035_v32  ;;  %v1097_v42 = vld [vmem:[#allocation4 + $0x888] sm:$0xff]  ;;  %v1288_v32 = vld [vmem:[#allocation4 + $0xe80] sm:$0xff] }
 0x2b6   : > { %3838 = vmatpush1.bf16.msra.mxu0 %v3837_v51  ;;  %3776 = vmatprep.subr.bf16.mxu1 %v3775_v52  ;;  %v3795_v51 = vpack.c.bf16 %v1829_v45, %v1797_v43  ;;  %v1796_v52 = vld [vmem:[#allocation4 + $0x1e60] sm:$0xff]  ;;  %v1129_v43 = vld [vmem:[#allocation4 + $0x988] sm:$0xff]  ;;  %v1099_v45 = vld [vmem:[#allocation4 + $0x898] sm:$0xff] }
 0x2b7   : > { %3840 = vmatprep.subr.bf16.mxu0 %v3839_v56  ;;  %v1830_v56 = vld [vmem:[#allocation4 + $0x1f70] sm:$0xff]  ;;  %v3797_v61 = vpack.c.bf16 %v1828_v53, %v1796_v52  ;;  %v1128_v52 = vld [vmem:[#allocation4 + $0x980] sm:$0xff] }
 0x2b8   : > { %v1098_v53 = vld [vmem:[#allocation4 + $0x890] sm:$0xff]  ;;  %v1320_v33 = vld [vmem:[#allocation4 + $0xf80] sm:$0xff] }
 0x2b9   : > { %3778 = vmatpush1.bf16.msra.mxu1 %v3777_v62  ;;  %v3861_v62 = vpack.c.bf16 %v1830_v56, %v1798_v54  ;;  %v3943_v54 = vpack.c.bf16 %v1131_v46, %v1099_v45  ;;  %v1161_v56 = vld [vmem:[#allocation4 + $0xa88] sm:$0xff] }
 0x2ba   : > { %3842 = vmatpush1.bf16.msra.mxu0 %v3841_v63  ;;  %3780 = vmatprep.subr.bf16.mxu1 %v3779_v1  ;;  %v3863_v63 = vpack.c.bf16 %v873_v58, %v841_v57  ;;  %v840_v1 = vld [vmem:[#allocation4 + $0x80] sm:$0xff]  ;;  %v1193_v57 = vld [vmem:[#allocation4 + $0xb88] sm:$0xff]  ;;  %v1163_v58 = vld [vmem:[#allocation4 + $0xa98] sm:$0xff] }
 0x2bb   : > { %3844 = vmatprep.subr.bf16.mxu0 %v3843_v5  ;;  %v874_v5 = vld [vmem:[#allocation4 + $0x190] sm:$0xff]  ;;  %v3865_v8 = vpack.c.bf16 %v872_v2, %v840_v1  ;;  %v1192_v1 = vld [vmem:[#allocation4 + $0xb80] sm:$0xff] }
 0x2bc   : > { %v1162_v2 = vld [vmem:[#allocation4 + $0xa90] sm:$0xff] }
 0x2bd   : > { %3782 = vmatpush1.bf16.msra.mxu1 %v3781_v11  ;;  %v3929_v11 = vpack.c.bf16 %v874_v5, %v842_v4  ;;  %v1194_v4 = vld [vmem:[#allocation4 + $0xb90] sm:$0xff]  ;;  %v1225_v5 = vld [vmem:[#allocation4 + $0xc88] sm:$0xff] }
 0x2be   : > { %3846 = vmatpush1.bf16.msra.mxu0 %v3845_v12  ;;  %3784 = vmatprep.subr.bf16.mxu1 %v3783_v13  ;;  %v904_v12 = vld [vmem:[#allocation4 + $0x280] sm:$0xff] }
 0x2bf   : > { %3848 = vmatprep.subr.bf16.mxu0 %v3847_v17  ;;  %v936_v13 = vld [vmem:[#allocation4 + $0x380] sm:$0xff]  ;;  %v969_v17 = vld [vmem:[#allocation4 + $0x488] sm:$0xff] }
 0x2c0   : > { %v3869_v22 = vpack.c.bf16 %v936_v13, %v904_v12  ;;  %v3949_v12 = vpack.c.bf16 %v1194_v4, %v1162_v2  ;;  %v3887_v13 = vpack.c.bf16 %v1257_v6, %v1225_v5  ;;  %v1481_v2 = vld [vmem:[#allocation4 + $0x1488] sm:$0xff]  ;;  %v1483_v4 = vld [vmem:[#allocation4 + $0x1498] sm:$0xff] }
 0x2c1   : > { %3786 = vmatpush1.bf16.msra.mxu1 %v3785_v23  ;;  %v3933_v23 = vpack.c.bf16 %v938_v16, %v906_v14  ;;  %v1226_v14 = vld [vmem:[#allocation4 + $0xc90] sm:$0xff]  ;;  %v1515_v5 = vld [vmem:[#allocation4 + $0x1598] sm:$0xff] }
 0x2c2   : > { %3850 = vmatpush1.bf16.msra.mxu0 %v3849_v24  ;;  %3788 = vmatprep.subr.bf16.mxu1 %v3787_v25  ;;  %v3871_v24 = vpack.c.bf16 %v1001_v18, %v969_v17  ;;  %v968_v25 = vld [vmem:[#allocation4 + $0x480] sm:$0xff]  ;;  %v1258_v18 = vld [vmem:[#allocation4 + $0xd90] sm:$0xff] }
 0x2c3   : > { %3852 = vmatprep.subr.bf16.mxu0 %v3851_v29  ;;  %v1002_v29 = vld [vmem:[#allocation4 + $0x590] sm:$0xff]  ;;  %v3873_v34 = vpack.c.bf16 %v1000_v26, %v968_v25  ;;  %v1323_v25 = vld [vmem:[#allocation4 + $0xf98] sm:$0xff] }
 0x2c5   : > { %3790 = vmatpush1.bf16.msra.mxu1 %v3789_v35  ;;  %v3937_v35 = vpack.c.bf16 %v1002_v29, %v970_v27 }
 0x2c6   : > { %3854 = vmatpush1.bf16.msra.mxu0 %v3853_v36  ;;  %3792 = vmatprep.subr.bf16.mxu1 %v3791_v37  ;;  %v3875_v36 = vpack.c.bf16 %v1065_v31, %v1033_v30  ;;  %v1032_v37 = vld [vmem:[#allocation4 + $0x680] sm:$0xff]  ;;  %v3953_v30 = vpack.c.bf16 %v1258_v18, %v1226_v14  ;;  %v1545_v14 = vld [vmem:[#allocation4 + $0x1688] sm:$0xff] }
 0x2c7   : > { %3856 = vmatprep.subr.bf16.mxu0 %v3855_v41  ;;  %v1066_v41 = vld [vmem:[#allocation4 + $0x790] sm:$0xff]  ;;  %v3877_v47 = vpack.c.bf16 %v1064_v38, %v1032_v37 }
 0x2c8   : > { %v1322_v38 = vld [vmem:[#allocation4 + $0xf90] sm:$0xff] }
 0x2c9   : > { %3794 = vmatpush1.bf16.msra.mxu1 %v3793_v48  ;;  %v3941_v48 = vpack.c.bf16 %v1066_v41, %v1034_v39  ;;  %v1353_v39 = vld [vmem:[#allocation4 + $0x1088] sm:$0xff]  ;;  %v1355_v41 = vld [vmem:[#allocation4 + $0x1098] sm:$0xff] }
 0x2ca   : > { %3858 = vmatpush1.bf16.msra.mxu0 %v3857_v50  ;;  %3796 = vmatprep.subr.bf16.mxu1 %v3795_v51  ;;  %v3879_v50 = vpack.c.bf16 %v1129_v43, %v1097_v42  ;;  %v1096_v51 = vld [vmem:[#allocation4 + $0x880] sm:$0xff]  ;;  %v1387_v42 = vld [vmem:[#allocation4 + $0x1198] sm:$0xff]  ;;  %v3893_v43 = vpack.c.bf16 %v1320_v33, %v1288_v32 }
 0x2cb   : > { %3860 = vmatprep.subr.bf16.mxu0 %v3859_v55  ;;  %v1130_v55 = vld [vmem:[#allocation4 + $0x990] sm:$0xff]  ;;  %v3881_v60 = vpack.c.bf16 %v1128_v52, %v1096_v51  ;;  %v3959_v51 = vpack.c.bf16 %v1387_v42, %v1355_v41  ;;  %v1608_v33 = vld [vmem:[#allocation4 + $0x1880] sm:$0xff]  ;;  %v1707_v41 = vld [vmem:[#allocation4 + $0x1b98] sm:$0xff] }
 0x2cc   : > { %v1386_v52 = vld [vmem:[#allocation4 + $0x1190] sm:$0xff] }
 0x2cd   : > { %3798 = vmatpush1.bf16.msra.mxu1 %v3797_v61  ;;  %v3945_v61 = vpack.c.bf16 %v1130_v55, %v1098_v53  ;;  %v1417_v53 = vld [vmem:[#allocation4 + $0x1288] sm:$0xff]  ;;  %v1419_v55 = vld [vmem:[#allocation4 + $0x1298] sm:$0xff] }
 0x2ce   : > { %3862 = vmatpush1.bf16.msra.mxu0 %v3861_v62  ;;  %3864 = vmatprep.subr.bf16.mxu1 %v3863_v63  ;;  %v3883_v62 = vpack.c.bf16 %v1193_v57, %v1161_v56  ;;  %v1160_v63 = vld [vmem:[#allocation4 + $0xa80] sm:$0xff]  ;;  %v1451_v56 = vld [vmem:[#allocation4 + $0x1398] sm:$0xff] }
 0x2cf   : > { %3928 = vmatprep.subr.bf16.mxu0 %v3927_v3  ;;  %v3947_v3 = vpack.c.bf16 %v1195_v59, %v1163_v58  ;;  %v3885_v9 = vpack.c.bf16 %v1192_v1, %v1160_v63  ;;  %v3963_v63 = vpack.c.bf16 %v1451_v56, %v1419_v55  ;;  %v1450_v1 = vld [vmem:[#allocation4 + $0x1390] sm:$0xff]  ;;  %v1771_v55 = vld [vmem:[#allocation4 + $0x1d98] sm:$0xff] }
 0x2d0   : > { %2339 = vmatmul.mubr.f32.vlgmr.msra.gmra.mrb[10].mxu1 %v4680_v49 }
 0x2d1   : > { %2410 = vmatmul.mubr.f32.vlgmr.msra.gmra.mrb[8].mxu0 %v4680_v49  ;;  %3866 = vmatpush1.bf16.msra.mxu1 %v3865_v8  ;;  %v1259_v8 = vld [vmem:[#allocation4 + $0xd98] sm:$0xff] }
 0x2d2   : > { %2480 = vmatprep.mubr.f32.mxu1 %v4678_v44  ;;  %3930 = vmatpush1.bf16.msra.mxu0 %v3929_v11  ;;  %v1256_v11 = vld [vmem:[#allocation4 + $0xd80] sm:$0xff]  ;;  %v3951_v17 = vpack.c.bf16 %v1259_v8, %v1227_v7 }
 0x2d3   : > { %2551 = vmatprep.mubr.f32.mxu0 %v4678_v44  ;;  %3868 = vmatprep.subr.bf16.mxu1 %v3867_v15 }
 0x2d4   : > { %3932 = vmatprep.subr.bf16.mxu0 %v3931_v19  ;;  %v1289_v19 = vld [vmem:[#allocation4 + $0xe88] sm:$0xff] }
 0x2d5   : > { %3870 = vmatpush1.bf16.msra.mxu1 %v3869_v22  ;;  %v3891_v31 = vpack.c.bf16 %v1321_v20, %v1289_v19 }
 0x2d6   : > { %3934 = vmatpush1.bf16.msra.mxu0 %v3933_v23  ;;  %3872 = vmatprep.subr.bf16.mxu1 %v3871_v24  ;;  %v3889_v23 = vpack.c.bf16 %v1256_v11, %v1224_v10  ;;  %v1291_v24 = vld [vmem:[#allocation4 + $0xe98] sm:$0xff]  ;;  %v1512_v10 = vld [vmem:[#allocation4 + $0x1580] sm:$0xff]  ;;  %v1482_v11 = vld [vmem:[#allocation4 + $0x1490] sm:$0xff] }
 0x2d7   : > { %3936 = vmatprep.subr.bf16.mxu0 %v3935_v28  ;;  %v3955_v37 = vpack.c.bf16 %v1323_v25, %v1291_v24  ;;  %v1578_v25 = vld [vmem:[#allocation4 + $0x1790] sm:$0xff] }
 0x2d9   : > { %3874 = vmatpush1.bf16.msra.mxu1 %v3873_v34  ;;  %v1290_v34 = vld [vmem:[#allocation4 + $0xe90] sm:$0xff] }
 0x2da   : > { %3938 = vmatpush1.bf16.msra.mxu0 %v3937_v35  ;;  %3876 = vmatprep.subr.bf16.mxu1 %v3875_v36  ;;  %v3957_v45 = vpack.c.bf16 %v1322_v38, %v1290_v34  ;;  %v1640_v34 = vld [vmem:[#allocation4 + $0x1980] sm:$0xff]  ;;  %v1673_v38 = vld [vmem:[#allocation4 + $0x1a88] sm:$0xff] }
 0x2db   : > { %3940 = vmatprep.subr.bf16.mxu0 %v3939_v40  ;;  %v1385_v40 = vld [vmem:[#allocation4 + $0x1188] sm:$0xff]  ;;  %v3913_v42 = vpack.c.bf16 %v1640_v34, %v1608_v33  ;;  %v910_v33 = vld [vmem:[#allocation4 + $0x2b0] sm:$0xff] }
 0x2dc   : > { %v3895_v46 = vpack.c.bf16 %v1385_v40, %v1353_v39  ;;  %v1705_v39 = vld [vmem:[#allocation4 + $0x1b88] sm:$0xff]  ;;  %v1675_v40 = vld [vmem:[#allocation4 + $0x1a98] sm:$0xff] }
 0x2dd   : > { %3878 = vmatpush1.bf16.msra.mxu1 %v3877_v47  ;;  %v1352_v47 = vld [vmem:[#allocation4 + $0x1080] sm:$0xff] }
 0x2de   : > { %3942 = vmatpush1.bf16.msra.mxu0 %v3941_v48  ;;  %3880 = vmatprep.subr.bf16.mxu1 %v3879_v50  ;;  %v1384_v48 = vld [vmem:[#allocation4 + $0x1180] sm:$0xff]  ;;  %v1354_v50 = vld [vmem:[#allocation4 + $0x1090] sm:$0xff] }
 0x2df   : > { %3944 = vmatprep.subr.bf16.mxu0 %v3943_v54  ;;  %v1449_v54 = vld [vmem:[#allocation4 + $0x1388] sm:$0xff]  ;;  %v3897_v57 = vpack.c.bf16 %v1384_v48, %v1352_v47  ;;  %v3961_v58 = vpack.c.bf16 %v1386_v52, %v1354_v50  ;;  %v1704_v47 = vld [vmem:[#allocation4 + $0x1b80] sm:$0xff]  ;;  %v1674_v48 = vld [vmem:[#allocation4 + $0x1a90] sm:$0xff]  ;;  %v3979_v50 = vpack.c.bf16 %v1707_v41, %v1675_v40 }
 0x2e0   : > { %v3899_v59 = vpack.c.bf16 %v1449_v54, %v1417_v53  ;;  %v1737_v52 = vld [vmem:[#allocation4 + $0x1c88] sm:$0xff]  ;;  %v1739_v54 = vld [vmem:[#allocation4 + $0x1c98] sm:$0xff] }
 0x2e1   : > { %3882 = vmatpush1.bf16.msra.mxu1 %v3881_v60  ;;  %v1416_v60 = vld [vmem:[#allocation4 + $0x1280] sm:$0xff]  ;;  %v1769_v53 = vld [vmem:[#allocation4 + $0x1d88] sm:$0xff]  ;;  %v1007_v40 = vld [vmem:[#allocation4 + $0x5b8] sm:$0xff] }
 0x2e2   : > { %3946 = vmatpush1.bf16.msra.mxu0 %v3945_v61  ;;  %3884 = vmatprep.subr.bf16.mxu1 %v3883_v62  ;;  %v1448_v61 = vld [vmem:[#allocation4 + $0x1380] sm:$0xff]  ;;  %v1418_v62 = vld [vmem:[#allocation4 + $0x1290] sm:$0xff] }
 0x2e3   : > { %v1914_v15 = vpop.f32.mrb[4].mxu1  ;;  %v1985_v16 = vpop.f32.mrb[2].mxu0  ;;  %3948 = vmatprep.subr.bf16.mxu0 %v3947_v3  ;;  %v1513_v3 = vld [vmem:[#allocation4 + $0x1588] sm:$0xff]  ;;  %v3901_v6 = vpack.c.bf16 %v1448_v61, %v1416_v60  ;;  %v3965_v7 = vpack.c.bf16 %v1450_v1, %v1418_v62  ;;  %v1768_v60 = vld [vmem:[#allocation4 + $0x1d80] sm:$0xff]  ;;  %v1738_v61 = vld [vmem:[#allocation4 + $0x1c90] sm:$0xff]  ;;  %v3983_v62 = vpack.c.bf16 %v1771_v55, %v1739_v54 }
 0x2e4   : > { %vm2984_vm4 = vcmp.gt.f32.partialorder %v1914_v15, 1.0  ;;  %vm2986_vm5 = vcmp.gt.f32.partialorder %v1985_v16, 1.0  ;;  %v1916_v21 = vpop.f32.mrb[5].mxu1  ;;  %v1987_v22 = vpop.f32.mrb[3].mxu0  ;;  %v3903_v8 = vpack.c.bf16 %v1513_v3, %v1481_v2  ;;  %v1577_v15 = vld [vmem:[#allocation4 + $0x1788] sm:$0xff]  ;;  %v1547_v16 = vld [vmem:[#allocation4 + $0x1698] sm:$0xff] }
 0x2e5   : > { %v3312_v26 = vsel %vm2984_vm4, 1.0, %v4495_v0  ;;  %v3314_v27 = vsel %vm2986_vm5, 1.0, %v4495_v0  ;;  %vm2985_vm6 = vcmp.gt.f32.partialorder %v1916_v21, 1.0  ;;  %vm2987_vm7 = vcmp.gt.f32.partialorder %v1987_v22, 1.0  ;;  %3886 = vmatpush1.bf16.msra.mxu1 %v3885_v9  ;;  %v1480_v9 = vld [vmem:[#allocation4 + $0x1480] sm:$0xff]  ;;  %v1801_v1 = vld [vmem:[#allocation4 + $0x1e88] sm:$0xff] }
 0x2e6   : > { %v3313_v28 = vsel %vm2985_vm6, 1.0, %v4495_v0  ;;  %v3315_v29 = vsel %vm2987_vm7, 1.0, %v4495_v0  ;;  %3950 = vmatpush1.bf16.msra.mxu0 %v3949_v12  ;;  %3888 = vmatprep.subr.bf16.mxu1 %v3887_v13  ;;  %v3967_v12 = vpack.c.bf16 %v1515_v5, %v1483_v4  ;;  %v1514_v13 = vld [vmem:[#allocation4 + $0x1590] sm:$0xff]  ;;  %v3905_v18 = vpack.c.bf16 %v1512_v10, %v1480_v9  ;;  %v1544_v21 = vld [vmem:[#allocation4 + $0x1680] sm:$0xff]  ;;  %v1833_v2 = vld [vmem:[#allocation4 + $0x1f88] sm:$0xff] }
 0x2e7   : > { %v3112_v35 = vcombine.low %v3312_v26, %v3313_v28  ;;  %v3113_v36 = vcombine.low %v3314_v27, %v3315_v29  ;;  %3952 = vmatprep.subr.bf16.mxu0 %v3951_v17  ;;  %v1579_v17 = vld [vmem:[#allocation4 + $0x1798] sm:$0xff]  ;;  %v3969_v19 = vpack.c.bf16 %v1514_v13, %v1482_v11  ;;  %v3907_v20 = vpack.c.bf16 %v1577_v15, %v1545_v14  ;;  %v1576_v22 = vld [vmem:[#allocation4 + $0x1780] sm:$0xff]  ;;  %v1609_v26 = vld [vmem:[#allocation4 + $0x1888] sm:$0xff] }
 0x2e8   : > { %v3971_v24 = vpack.c.bf16 %v1579_v17, %v1547_v16  ;;  %v1641_v27 = vld [vmem:[#allocation4 + $0x1988] sm:$0xff]  ;;  %v1611_v28 = vld [vmem:[#allocation4 + $0x1898] sm:$0xff]  ;;  %v1832_v9 = vld [vmem:[#allocation4 + $0x1f80] sm:$0xff] }
 0x2e9   : > { %3144 = vst [vmem:[%s4706_s20] sm:$0x77] %v3112_v35  ;;  %3145 = vst [vmem:[%s4706_s20 + $0x8] sm:$0x77] %v3113_v36  ;;  %3890 = vmatpush1.bf16.msra.mxu1 %v3889_v23  ;;  %v1546_v23 = vld [vmem:[#allocation4 + $0x1690] sm:$0xff]  ;;  %v1643_v29 = vld [vmem:[#allocation4 + $0x1998] sm:$0xff]  ;;  %v3911_v32 = vpack.c.bf16 %v1641_v27, %v1609_v26 }
 0x2ea   : > { %3954 = vmatpush1.bf16.msra.mxu0 %v3953_v30  ;;  %3892 = vmatprep.subr.bf16.mxu1 %v3891_v31  ;;  %v3909_v30 = vpack.c.bf16 %v1576_v22, %v1544_v21  ;;  %v3973_v31 = vpack.c.bf16 %v1578_v25, %v1546_v23  ;;  %v1610_v35 = vld [vmem:[#allocation4 + $0x1890] sm:$0xff]  ;;  %v3975_v36 = vpack.c.bf16 %v1643_v29, %v1611_v28  ;;  %v1803_v3 = vld [vmem:[#allocation4 + $0x1e98] sm:$0xff]  ;;  %v845_v13 = vld [vmem:[#allocation4 + $0xa8] sm:$0xff] }
 0x2eb   : > { %3956 = vmatprep.subr.bf16.mxu0 %v3955_v37  ;;  %v1642_v37 = vld [vmem:[#allocation4 + $0x1990] sm:$0xff]  ;;  %v1835_v4 = vld [vmem:[#allocation4 + $0x1f98] sm:$0xff]  ;;  %v877_v14 = vld [vmem:[#allocation4 + $0x1a8] sm:$0xff] }
 0x2ec   : > { %v1802_v10 = vld [vmem:[#allocation4 + $0x1e90] sm:$0xff]  ;;  %v3987_v11 = vpack.c.bf16 %v1835_v4, %v1803_v3  ;;  %v847_v15 = vld [vmem:[#allocation4 + $0xb8] sm:$0xff]  ;;  %v876_v21 = vld [vmem:[#allocation4 + $0x1a0] sm:$0xff] }
 0x2ed   : > { %3894 = vmatpush1.bf16.msra.mxu1 %v3893_v43  ;;  %v3977_v43 = vpack.c.bf16 %v1642_v37, %v1610_v35  ;;  %v879_v16 = vld [vmem:[#allocation4 + $0x1b8] sm:$0xff]  ;;  %v846_v23 = vld [vmem:[#allocation4 + $0xb0] sm:$0xff]  ;;  %v909_v25 = vld [vmem:[#allocation4 + $0x2a8] sm:$0xff] }
 0x2ee   : > { %3958 = vmatpush1.bf16.msra.mxu0 %v3957_v45  ;;  %3896 = vmatprep.subr.bf16.mxu1 %v3895_v46  ;;  %v3915_v45 = vpack.c.bf16 %v1705_v39, %v1673_v38  ;;  %v1672_v46 = vld [vmem:[#allocation4 + $0x1a80] sm:$0xff]  ;;  %v4055_v22 = vpack.c.bf16 %v879_v16, %v847_v15  ;;  %v941_v26 = vld [vmem:[#allocation4 + $0x3a8] sm:$0xff]  ;;  %v911_v28 = vld [vmem:[#allocation4 + $0x2b8] sm:$0xff] }
 0x2ef   : > { %3960 = vmatprep.subr.bf16.mxu0 %v3959_v51  ;;  %v1706_v51 = vld [vmem:[#allocation4 + $0x1b90] sm:$0xff]  ;;  %v3917_v56 = vpack.c.bf16 %v1704_v47, %v1672_v46  ;;  %v943_v29 = vld [vmem:[#allocation4 + $0x3b8] sm:$0xff]  ;;  %v3995_v34 = vpack.c.bf16 %v941_v26, %v909_v25  ;;  %v1005_v37 = vld [vmem:[#allocation4 + $0x5a8] sm:$0xff] }
 0x2f0   : > { %v942_v35 = vld [vmem:[#allocation4 + $0x3b0] sm:$0xff]  ;;  %v4059_v38 = vpack.c.bf16 %v943_v29, %v911_v28  ;;  %v975_v39 = vld [vmem:[#allocation4 + $0x4b8] sm:$0xff]  ;;  %v1004_v46 = vld [vmem:[#allocation4 + $0x5a0] sm:$0xff] }
 0x2f1   : > { %3898 = vmatpush1.bf16.msra.mxu1 %v3897_v57  ;;  %v3981_v57 = vpack.c.bf16 %v1706_v51, %v1674_v48  ;;  %v974_v47 = vld [vmem:[#allocation4 + $0x4b0] sm:$0xff]  ;;  %v4063_v48 = vpack.c.bf16 %v1007_v40, %v975_v39  ;;  %v1037_v51 = vld [vmem:[#allocation4 + $0x6a8] sm:$0xff]  ;;  %v1071_v54 = vld [vmem:[#allocation4 + $0x7b8] sm:$0xff] }
 0x2f2   : > { %3962 = vmatpush1.bf16.msra.mxu0 %v3961_v58  ;;  %3900 = vmatprep.subr.bf16.mxu1 %v3899_v59  ;;  %v3919_v58 = vpack.c.bf16 %v1769_v53, %v1737_v52  ;;  %v1736_v59 = vld [vmem:[#allocation4 + $0x1c80] sm:$0xff]  ;;  %v1069_v52 = vld [vmem:[#allocation4 + $0x7a8] sm:$0xff]  ;;  %v1039_v53 = vld [vmem:[#allocation4 + $0x6b8] sm:$0xff] }
 0x2f3   : > { %3964 = vmatprep.subr.bf16.mxu0 %v3963_v63  ;;  %v1770_v63 = vld [vmem:[#allocation4 + $0x1d90] sm:$0xff]  ;;  %v3921_v5 = vpack.c.bf16 %v1768_v60, %v1736_v59  ;;  %v1068_v59 = vld [vmem:[#allocation4 + $0x7a0] sm:$0xff]  ;;  %v1135_v3 = vld [vmem:[#allocation4 + $0x9b8] sm:$0xff] }
 0x2f4   : > { %v1038_v60 = vld [vmem:[#allocation4 + $0x6b0] sm:$0xff]  ;;  %v1199_v15 = vld [vmem:[#allocation4 + $0xbb8] sm:$0xff]  ;;  %v1261_v25 = vld [vmem:[#allocation4 + $0xda8] sm:$0xff] }
 0x2f5   : > { %3902 = vmatpush1.bf16.msra.mxu1 %v3901_v6  ;;  %v3985_v6 = vpack.c.bf16 %v1770_v63, %v1738_v61  ;;  %v4067_v61 = vpack.c.bf16 %v1071_v54, %v1039_v53  ;;  %v1101_v63 = vld [vmem:[#allocation4 + $0x8a8] sm:$0xff]  ;;  %v1231_v26 = vld [vmem:[#allocation4 + $0xcb8] sm:$0xff]  ;;  %v1228_v29 = vld [vmem:[#allocation4 + $0xca0] sm:$0xff] }
 0x2f6   : > { %3966 = vmatpush1.bf16.msra.mxu0 %v3965_v7  ;;  %3904 = vmatprep.subr.bf16.mxu1 %v3903_v8  ;;  %v3923_v7 = vpack.c.bf16 %v1833_v2, %v1801_v1  ;;  %v1800_v8 = vld [vmem:[#allocation4 + $0x1e80] sm:$0xff]  ;;  %v1133_v1 = vld [vmem:[#allocation4 + $0x9a8] sm:$0xff]  ;;  %v1103_v2 = vld [vmem:[#allocation4 + $0x8b8] sm:$0xff] }
 0x2f7   : > { %3968 = vmatprep.subr.bf16.mxu0 %v3967_v12  ;;  %v1834_v12 = vld [vmem:[#allocation4 + $0x1f90] sm:$0xff]  ;;  %v3925_v17 = vpack.c.bf16 %v1832_v9, %v1800_v8  ;;  %v1132_v8 = vld [vmem:[#allocation4 + $0x9a0] sm:$0xff]  ;;  %v1325_v39 = vld [vmem:[#allocation4 + $0xfa8] sm:$0xff] }
 0x2f8   : > { %v1102_v9 = vld [vmem:[#allocation4 + $0x8b0] sm:$0xff]  ;;  %v1292_v53 = vld [vmem:[#allocation4 + $0xea0] sm:$0xff] }
 0x2f9   : > { %3906 = vmatpush1.bf16.msra.mxu1 %v3905_v18  ;;  %v3989_v18 = vpack.c.bf16 %v1834_v12, %v1802_v10  ;;  %v4071_v10 = vpack.c.bf16 %v1135_v3, %v1103_v2  ;;  %v1165_v12 = vld [vmem:[#allocation4 + $0xaa8] sm:$0xff]  ;;  %v1324_v54 = vld [vmem:[#allocation4 + $0xfa0] sm:$0xff] }
 0x2fa   : > { %3970 = vmatpush1.bf16.msra.mxu0 %v3969_v19  ;;  %3908 = vmatprep.subr.bf16.mxu1 %v3907_v20  ;;  %v3991_v19 = vpack.c.bf16 %v877_v14, %v845_v13  ;;  %v844_v20 = vld [vmem:[#allocation4 + $0xa0] sm:$0xff]  ;;  %v1197_v13 = vld [vmem:[#allocation4 + $0xba8] sm:$0xff]  ;;  %v1167_v14 = vld [vmem:[#allocation4 + $0xab8] sm:$0xff] }
 0x2fb   : > { %3972 = vmatprep.subr.bf16.mxu0 %v3971_v24  ;;  %v878_v24 = vld [vmem:[#allocation4 + $0x1b0] sm:$0xff]  ;;  %v3993_v27 = vpack.c.bf16 %v876_v21, %v844_v20  ;;  %v1196_v20 = vld [vmem:[#allocation4 + $0xba0] sm:$0xff] }
 0x2fc   : > { %v1166_v21 = vld [vmem:[#allocation4 + $0xab0] sm:$0xff] }
 0x2fd   : > { %3910 = vmatpush1.bf16.msra.mxu1 %v3909_v30  ;;  %v4057_v30 = vpack.c.bf16 %v878_v24, %v846_v23  ;;  %v1198_v23 = vld [vmem:[#allocation4 + $0xbb0] sm:$0xff]  ;;  %v1229_v24 = vld [vmem:[#allocation4 + $0xca8] sm:$0xff] }
 0x2fe   : > { %3974 = vmatpush1.bf16.msra.mxu0 %v3973_v31  ;;  %3912 = vmatprep.subr.bf16.mxu1 %v3911_v32  ;;  %v908_v31 = vld [vmem:[#allocation4 + $0x2a0] sm:$0xff] }
 0x2ff   : > { %3976 = vmatprep.subr.bf16.mxu0 %v3975_v36  ;;  %v940_v32 = vld [vmem:[#allocation4 + $0x3a0] sm:$0xff]  ;;  %v973_v36 = vld [vmem:[#allocation4 + $0x4a8] sm:$0xff] }
 0x300   : > { %v3997_v41 = vpack.c.bf16 %v940_v32, %v908_v31  ;;  %v4077_v31 = vpack.c.bf16 %v1198_v23, %v1166_v21  ;;  %v4015_v32 = vpack.c.bf16 %v1261_v25, %v1229_v24  ;;  %v1485_v21 = vld [vmem:[#allocation4 + $0x14a8] sm:$0xff]  ;;  %v1487_v23 = vld [vmem:[#allocation4 + $0x14b8] sm:$0xff] }
 0x301   : > { %3914 = vmatpush1.bf16.msra.mxu1 %v3913_v42  ;;  %v4061_v42 = vpack.c.bf16 %v942_v35, %v910_v33  ;;  %v1230_v33 = vld [vmem:[#allocation4 + $0xcb0] sm:$0xff]  ;;  %v1519_v24 = vld [vmem:[#allocation4 + $0x15b8] sm:$0xff] }
 0x302   : > { %3978 = vmatpush1.bf16.msra.mxu0 %v3977_v43  ;;  %3916 = vmatprep.subr.bf16.mxu1 %v3915_v45  ;;  %v3999_v43 = vpack.c.bf16 %v1005_v37, %v973_v36  ;;  %v972_v45 = vld [vmem:[#allocation4 + $0x4a0] sm:$0xff]  ;;  %v1262_v37 = vld [vmem:[#allocation4 + $0xdb0] sm:$0xff] }
 0x303   : > { %3980 = vmatprep.subr.bf16.mxu0 %v3979_v50  ;;  %v1006_v50 = vld [vmem:[#allocation4 + $0x5b0] sm:$0xff]  ;;  %v4001_v55 = vpack.c.bf16 %v1004_v46, %v972_v45  ;;  %v1327_v45 = vld [vmem:[#allocation4 + $0xfb8] sm:$0xff] }
 0x305   : > { %3918 = vmatpush1.bf16.msra.mxu1 %v3917_v56  ;;  %v4065_v56 = vpack.c.bf16 %v1006_v50, %v974_v47 }
 0x306   : > { %3982 = vmatpush1.bf16.msra.mxu0 %v3981_v57  ;;  %3920 = vmatprep.subr.bf16.mxu1 %v3919_v58  ;;  %v4003_v57 = vpack.c.bf16 %v1069_v52, %v1037_v51  ;;  %v1036_v58 = vld [vmem:[#allocation4 + $0x6a0] sm:$0xff]  ;;  %v4081_v51 = vpack.c.bf16 %v1262_v37, %v1230_v33  ;;  %v1549_v33 = vld [vmem:[#allocation4 + $0x16a8] sm:$0xff] }
 0x307   : > { %3984 = vmatprep.subr.bf16.mxu0 %v3983_v62  ;;  %v1070_v62 = vld [vmem:[#allocation4 + $0x7b0] sm:$0xff]  ;;  %v4005_v4 = vpack.c.bf16 %v1068_v59, %v1036_v58 }
 0x308   : > { %v1326_v59 = vld [vmem:[#allocation4 + $0xfb0] sm:$0xff] }
 0x309   : > { %3922 = vmatpush1.bf16.msra.mxu1 %v3921_v5  ;;  %v4069_v5 = vpack.c.bf16 %v1070_v62, %v1038_v60  ;;  %v1357_v60 = vld [vmem:[#allocation4 + $0x10a8] sm:$0xff]  ;;  %v1359_v62 = vld [vmem:[#allocation4 + $0x10b8] sm:$0xff] }
 0x30a   : > { %3986 = vmatpush1.bf16.msra.mxu0 %v3985_v6  ;;  %3924 = vmatprep.subr.bf16.mxu1 %v3923_v7  ;;  %v4007_v6 = vpack.c.bf16 %v1133_v1, %v1101_v63  ;;  %v1100_v7 = vld [vmem:[#allocation4 + $0x8a0] sm:$0xff]  ;;  %v1391_v63 = vld [vmem:[#allocation4 + $0x11b8] sm:$0xff]  ;;  %v4021_v1 = vpack.c.bf16 %v1324_v54, %v1292_v53 }
 0x30b   : > { %3988 = vmatprep.subr.bf16.mxu0 %v3987_v11  ;;  %v1134_v11 = vld [vmem:[#allocation4 + $0x9b0] sm:$0xff]  ;;  %v4009_v16 = vpack.c.bf16 %v1132_v8, %v1100_v7  ;;  %v4087_v7 = vpack.c.bf16 %v1391_v63, %v1359_v62  ;;  %v1612_v54 = vld [vmem:[#allocation4 + $0x18a0] sm:$0xff]  ;;  %v1711_v62 = vld [vmem:[#allocation4 + $0x1bb8] sm:$0xff] }
 0x30c   : > { %v1390_v8 = vld [vmem:[#allocation4 + $0x11b0] sm:$0xff] }
 0x30d   : > { %3926 = vmatpush1.bf16.msra.mxu1 %v3925_v17  ;;  %v4073_v17 = vpack.c.bf16 %v1134_v11, %v1102_v9  ;;  %v1421_v9 = vld [vmem:[#allocation4 + $0x12a8] sm:$0xff]  ;;  %v1423_v11 = vld [vmem:[#allocation4 + $0x12b8] sm:$0xff] }
 0x30e   : > { %3990 = vmatpush1.bf16.msra.mxu0 %v3989_v18  ;;  %3992 = vmatprep.subr.bf16.mxu1 %v3991_v19  ;;  %v4011_v18 = vpack.c.bf16 %v1197_v13, %v1165_v12  ;;  %v1164_v19 = vld [vmem:[#allocation4 + $0xaa0] sm:$0xff]  ;;  %v1455_v12 = vld [vmem:[#allocation4 + $0x13b8] sm:$0xff] }
 0x30f   : > { %4056 = vmatprep.subr.bf16.mxu0 %v4055_v22  ;;  %v4075_v22 = vpack.c.bf16 %v1199_v15, %v1167_v14  ;;  %v4013_v28 = vpack.c.bf16 %v1196_v20, %v1164_v19  ;;  %v4091_v19 = vpack.c.bf16 %v1455_v12, %v1423_v11  ;;  %v1454_v20 = vld [vmem:[#allocation4 + $0x13b0] sm:$0xff]  ;;  %v1775_v11 = vld [vmem:[#allocation4 + $0x1db8] sm:$0xff] }
 0x310   : > { %2481 = vmatmul.mubr.f32.vlgmr.msra.gmra.mrb[12].mxu1 %v4680_v49 }
 0x311   : > { %2552 = vmatmul.mubr.f32.vlgmr.msra.gmra.mrb[10].mxu0 %v4680_v49  ;;  %3994 = vmatpush1.bf16.msra.mxu1 %v3993_v27  ;;  %v1263_v27 = vld [vmem:[#allocation4 + $0xdb8] sm:$0xff] }
 0x312   : > { %2622 = vmatprep.mubr.f32.mxu1 %v4678_v44  ;;  %4058 = vmatpush1.bf16.msra.mxu0 %v4057_v30  ;;  %v1260_v30 = vld [vmem:[#allocation4 + $0xda0] sm:$0xff]  ;;  %v4079_v36 = vpack.c.bf16 %v1263_v27, %v1231_v26 }
 0x313   : > { %2693 = vmatprep.mubr.f32.mxu0 %v4678_v44  ;;  %3996 = vmatprep.subr.bf16.mxu1 %v3995_v34 }
 0x314   : > { %4060 = vmatprep.subr.bf16.mxu0 %v4059_v38  ;;  %v1293_v38 = vld [vmem:[#allocation4 + $0xea8] sm:$0xff] }
 0x315   : > { %3998 = vmatpush1.bf16.msra.mxu1 %v3997_v41  ;;  %v4019_v52 = vpack.c.bf16 %v1325_v39, %v1293_v38 }
 0x316   : > { %4062 = vmatpush1.bf16.msra.mxu0 %v4061_v42  ;;  %4000 = vmatprep.subr.bf16.mxu1 %v3999_v43  ;;  %v4017_v42 = vpack.c.bf16 %v1260_v30, %v1228_v29  ;;  %v1295_v43 = vld [vmem:[#allocation4 + $0xeb8] sm:$0xff]  ;;  %v1516_v29 = vld [vmem:[#allocation4 + $0x15a0] sm:$0xff]  ;;  %v1486_v30 = vld [vmem:[#allocation4 + $0x14b0] sm:$0xff] }
 0x317   : > { %4064 = vmatprep.subr.bf16.mxu0 %v4063_v48  ;;  %v4083_v58 = vpack.c.bf16 %v1327_v45, %v1295_v43  ;;  %v1582_v45 = vld [vmem:[#allocation4 + $0x17b0] sm:$0xff] }
 0x319   : > { %4002 = vmatpush1.bf16.msra.mxu1 %v4001_v55  ;;  %v1294_v55 = vld [vmem:[#allocation4 + $0xeb0] sm:$0xff] }
 0x31a   : > { %4066 = vmatpush1.bf16.msra.mxu0 %v4065_v56  ;;  %4004 = vmatprep.subr.bf16.mxu1 %v4003_v57  ;;  %v4085_v2 = vpack.c.bf16 %v1326_v59, %v1294_v55  ;;  %v1644_v55 = vld [vmem:[#allocation4 + $0x19a0] sm:$0xff]  ;;  %v1677_v59 = vld [vmem:[#allocation4 + $0x1aa8] sm:$0xff] }
 0x31b   : > { %4068 = vmatprep.subr.bf16.mxu0 %v4067_v61  ;;  %v1389_v61 = vld [vmem:[#allocation4 + $0x11a8] sm:$0xff]  ;;  %v4041_v63 = vpack.c.bf16 %v1644_v55, %v1612_v54  ;;  %v914_v54 = vld [vmem:[#allocation4 + $0x2d0] sm:$0xff] }
 0x31c   : > { %v4023_v3 = vpack.c.bf16 %v1389_v61, %v1357_v60  ;;  %v1709_v60 = vld [vmem:[#allocation4 + $0x1ba8] sm:$0xff]  ;;  %v1679_v61 = vld [vmem:[#allocation4 + $0x1ab8] sm:$0xff] }
 0x31d   : > { %4006 = vmatpush1.bf16.msra.mxu1 %v4005_v4  ;;  %v1356_v4 = vld [vmem:[#allocation4 + $0x10a0] sm:$0xff] }
 0x31e   : > { %4070 = vmatpush1.bf16.msra.mxu0 %v4069_v5  ;;  %4008 = vmatprep.subr.bf16.mxu1 %v4007_v6  ;;  %v1388_v5 = vld [vmem:[#allocation4 + $0x11a0] sm:$0xff]  ;;  %v1358_v6 = vld [vmem:[#allocation4 + $0x10b0] sm:$0xff] }
 0x31f   : > { %4072 = vmatprep.subr.bf16.mxu0 %v4071_v10  ;;  %v1453_v10 = vld [vmem:[#allocation4 + $0x13a8] sm:$0xff]  ;;  %v4025_v13 = vpack.c.bf16 %v1388_v5, %v1356_v4  ;;  %v4089_v14 = vpack.c.bf16 %v1390_v8, %v1358_v6  ;;  %v1708_v4 = vld [vmem:[#allocation4 + $0x1ba0] sm:$0xff]  ;;  %v1678_v5 = vld [vmem:[#allocation4 + $0x1ab0] sm:$0xff]  ;;  %v4107_v6 = vpack.c.bf16 %v1711_v62, %v1679_v61 }
 0x320   : > { %v4027_v15 = vpack.c.bf16 %v1453_v10, %v1421_v9  ;;  %v1741_v8 = vld [vmem:[#allocation4 + $0x1ca8] sm:$0xff]  ;;  %v1743_v10 = vld [vmem:[#allocation4 + $0x1cb8] sm:$0xff] }
 0x321   : > { %4010 = vmatpush1.bf16.msra.mxu1 %v4009_v16  ;;  %v1420_v16 = vld [vmem:[#allocation4 + $0x12a0] sm:$0xff]  ;;  %v1773_v9 = vld [vmem:[#allocation4 + $0x1da8] sm:$0xff]  ;;  %v1011_v61 = vld [vmem:[#allocation4 + $0x5d8] sm:$0xff] }
 0x322   : > { %4074 = vmatpush1.bf16.msra.mxu0 %v4073_v17  ;;  %4012 = vmatprep.subr.bf16.mxu1 %v4011_v18  ;;  %v1452_v17 = vld [vmem:[#allocation4 + $0x13a0] sm:$0xff]  ;;  %v1422_v18 = vld [vmem:[#allocation4 + $0x12b0] sm:$0xff] }
 0x323   : > { %v2056_v34 = vpop.f32.mrb[6].mxu1  ;;  %v2127_v35 = vpop.f32.mrb[4].mxu0  ;;  %4076 = vmatprep.subr.bf16.mxu0 %v4075_v22  ;;  %v1517_v22 = vld [vmem:[#allocation4 + $0x15a8] sm:$0xff]  ;;  %v4029_v25 = vpack.c.bf16 %v1452_v17, %v1420_v16  ;;  %v4093_v26 = vpack.c.bf16 %v1454_v20, %v1422_v18  ;;  %v1772_v16 = vld [vmem:[#allocation4 + $0x1da0] sm:$0xff]  ;;  %v1742_v17 = vld [vmem:[#allocation4 + $0x1cb0] sm:$0xff]  ;;  %v4111_v18 = vpack.c.bf16 %v1775_v11, %v1743_v10 }
 0x324   : > { %vm2988_vm8 = vcmp.gt.f32.partialorder %v2056_v34, 1.0  ;;  %vm2990_vm9 = vcmp.gt.f32.partialorder %v2127_v35, 1.0  ;;  %v2058_v40 = vpop.f32.mrb[7].mxu1  ;;  %v2129_v41 = vpop.f32.mrb[5].mxu0  ;;  %v4031_v27 = vpack.c.bf16 %v1517_v22, %v1485_v21  ;;  %v1581_v34 = vld [vmem:[#allocation4 + $0x17a8] sm:$0xff]  ;;  %v1551_v35 = vld [vmem:[#allocation4 + $0x16b8] sm:$0xff] }
 0x325   : > { %v3316_v46 = vsel %vm2988_vm8, 1.0, %v4495_v0  ;;  %v3318_v47 = vsel %vm2990_vm9, 1.0, %v4495_v0  ;;  %vm2989_vm10 = vcmp.gt.f32.partialorder %v2058_v40, 1.0  ;;  %vm2991_vm11 = vcmp.gt.f32.partialorder %v2129_v41, 1.0  ;;  %4014 = vmatpush1.bf16.msra.mxu1 %v4013_v28  ;;  %v1484_v28 = vld [vmem:[#allocation4 + $0x14a0] sm:$0xff]  ;;  %v1805_v20 = vld [vmem:[#allocation4 + $0x1ea8] sm:$0xff] }
 0x326   : > { %v3317_v48 = vsel %vm2989_vm10, 1.0, %v4495_v0  ;;  %v3319_v50 = vsel %vm2991_vm11, 1.0, %v4495_v0  ;;  %4078 = vmatpush1.bf16.msra.mxu0 %v4077_v31  ;;  %4016 = vmatprep.subr.bf16.mxu1 %v4015_v32  ;;  %v4095_v31 = vpack.c.bf16 %v1519_v24, %v1487_v23  ;;  %v1518_v32 = vld [vmem:[#allocation4 + $0x15b0] sm:$0xff]  ;;  %v4033_v37 = vpack.c.bf16 %v1516_v29, %v1484_v28  ;;  %v1548_v40 = vld [vmem:[#allocation4 + $0x16a0] sm:$0xff]  ;;  %v1837_v21 = vld [vmem:[#allocation4 + $0x1fa8] sm:$0xff] }
 0x327   : > { %v3114_v56 = vcombine.low %v3316_v46, %v3317_v48  ;;  %v3115_v57 = vcombine.low %v3318_v47, %v3319_v50  ;;  %4080 = vmatprep.subr.bf16.mxu0 %v4079_v36  ;;  %v1583_v36 = vld [vmem:[#allocation4 + $0x17b8] sm:$0xff]  ;;  %v4097_v38 = vpack.c.bf16 %v1518_v32, %v1486_v30  ;;  %v4035_v39 = vpack.c.bf16 %v1581_v34, %v1549_v33  ;;  %v1580_v41 = vld [vmem:[#allocation4 + $0x17a0] sm:$0xff]  ;;  %v1613_v46 = vld [vmem:[#allocation4 + $0x18a8] sm:$0xff] }
 0x328   : > { %v4099_v43 = vpack.c.bf16 %v1583_v36, %v1551_v35  ;;  %v1645_v47 = vld [vmem:[#allocation4 + $0x19a8] sm:$0xff]  ;;  %v1615_v48 = vld [vmem:[#allocation4 + $0x18b8] sm:$0xff]  ;;  %v1836_v28 = vld [vmem:[#allocation4 + $0x1fa0] sm:$0xff] }
 0x329   : > { %3146 = vst [vmem:[%s4706_s20 + $0x10] sm:$0x77] %v3114_v56  ;;  %3147 = vst [vmem:[%s4706_s20 + $0x18] sm:$0x77] %v3115_v57  ;;  %4018 = vmatpush1.bf16.msra.mxu1 %v4017_v42  ;;  %v1550_v42 = vld [vmem:[#allocation4 + $0x16b0] sm:$0xff]  ;;  %v1647_v50 = vld [vmem:[#allocation4 + $0x19b8] sm:$0xff]  ;;  %v4039_v53 = vpack.c.bf16 %v1645_v47, %v1613_v46 }
 0x32a   : > { %4082 = vmatpush1.bf16.msra.mxu0 %v4081_v51  ;;  %4020 = vmatprep.subr.bf16.mxu1 %v4019_v52  ;;  %v4037_v51 = vpack.c.bf16 %v1580_v41, %v1548_v40  ;;  %v4101_v52 = vpack.c.bf16 %v1582_v45, %v1550_v42  ;;  %v1614_v56 = vld [vmem:[#allocation4 + $0x18b0] sm:$0xff]  ;;  %v4103_v57 = vpack.c.bf16 %v1647_v50, %v1615_v48  ;;  %v1807_v22 = vld [vmem:[#allocation4 + $0x1eb8] sm:$0xff]  ;;  %v849_v32 = vld [vmem:[#allocation4 + $0xc8] sm:$0xff] }
 0x32b   : > { %4084 = vmatprep.subr.bf16.mxu0 %v4083_v58  ;;  %v1646_v58 = vld [vmem:[#allocation4 + $0x19b0] sm:$0xff]  ;;  %v1839_v23 = vld [vmem:[#allocation4 + $0x1fb8] sm:$0xff]  ;;  %v881_v33 = vld [vmem:[#allocation4 + $0x1c8] sm:$0xff] }
 0x32c   : > { %v1806_v29 = vld [vmem:[#allocation4 + $0x1eb0] sm:$0xff]  ;;  %v4115_v30 = vpack.c.bf16 %v1839_v23, %v1807_v22  ;;  %v851_v34 = vld [vmem:[#allocation4 + $0xd8] sm:$0xff]  ;;  %v880_v40 = vld [vmem:[#allocation4 + $0x1c0] sm:$0xff] }
 0x32d   : > { %4022 = vmatpush1.bf16.msra.mxu1 %v4021_v1  ;;  %v4105_v1 = vpack.c.bf16 %v1646_v58, %v1614_v56  ;;  %v883_v35 = vld [vmem:[#allocation4 + $0x1d8] sm:$0xff]  ;;  %v850_v42 = vld [vmem:[#allocation4 + $0xd0] sm:$0xff]  ;;  %v913_v45 = vld [vmem:[#allocation4 + $0x2c8] sm:$0xff] }
 0x32e   : > { %4086 = vmatpush1.bf16.msra.mxu0 %v4085_v2  ;;  %4024 = vmatprep.subr.bf16.mxu1 %v4023_v3  ;;  %v4043_v2 = vpack.c.bf16 %v1709_v60, %v1677_v59  ;;  %v1676_v3 = vld [vmem:[#allocation4 + $0x1aa0] sm:$0xff]  ;;  %v4183_v41 = vpack.c.bf16 %v883_v35, %v851_v34  ;;  %v945_v46 = vld [vmem:[#allocation4 + $0x3c8] sm:$0xff]  ;;  %v915_v48 = vld [vmem:[#allocation4 + $0x2d8] sm:$0xff] }
 0x32f   : > { %4088 = vmatprep.subr.bf16.mxu0 %v4087_v7  ;;  %v1710_v7 = vld [vmem:[#allocation4 + $0x1bb0] sm:$0xff]  ;;  %v4045_v12 = vpack.c.bf16 %v1708_v4, %v1676_v3  ;;  %v947_v50 = vld [vmem:[#allocation4 + $0x3d8] sm:$0xff]  ;;  %v4123_v55 = vpack.c.bf16 %v945_v46, %v913_v45  ;;  %v1009_v58 = vld [vmem:[#allocation4 + $0x5c8] sm:$0xff] }
 0x330   : > { %v946_v56 = vld [vmem:[#allocation4 + $0x3d0] sm:$0xff]  ;;  %v4187_v59 = vpack.c.bf16 %v947_v50, %v915_v48  ;;  %v979_v60 = vld [vmem:[#allocation4 + $0x4d8] sm:$0xff]  ;;  %v1008_v3 = vld [vmem:[#allocation4 + $0x5c0] sm:$0xff] }
 0x331   : > { %4026 = vmatpush1.bf16.msra.mxu1 %v4025_v13  ;;  %v4109_v13 = vpack.c.bf16 %v1710_v7, %v1678_v5  ;;  %v978_v4 = vld [vmem:[#allocation4 + $0x4d0] sm:$0xff]  ;;  %v4191_v5 = vpack.c.bf16 %v1011_v61, %v979_v60  ;;  %v1041_v7 = vld [vmem:[#allocation4 + $0x6c8] sm:$0xff]  ;;  %v1075_v10 = vld [vmem:[#allocation4 + $0x7d8] sm:$0xff] }
 0x332   : > { %4090 = vmatpush1.bf16.msra.mxu0 %v4089_v14  ;;  %4028 = vmatprep.subr.bf16.mxu1 %v4027_v15  ;;  %v4047_v14 = vpack.c.bf16 %v1773_v9, %v1741_v8  ;;  %v1740_v15 = vld [vmem:[#allocation4 + $0x1ca0] sm:$0xff]  ;;  %v1073_v8 = vld [vmem:[#allocation4 + $0x7c8] sm:$0xff]  ;;  %v1043_v9 = vld [vmem:[#allocation4 + $0x6d8] sm:$0xff] }
 0x333   : > { %4092 = vmatprep.subr.bf16.mxu0 %v4091_v19  ;;  %v1774_v19 = vld [vmem:[#allocation4 + $0x1db0] sm:$0xff]  ;;  %v4049_v24 = vpack.c.bf16 %v1772_v16, %v1740_v15  ;;  %v1072_v15 = vld [vmem:[#allocation4 + $0x7c0] sm:$0xff]  ;;  %v1139_v22 = vld [vmem:[#allocation4 + $0x9d8] sm:$0xff] }
 0x334   : > { %v1042_v16 = vld [vmem:[#allocation4 + $0x6d0] sm:$0xff]  ;;  %v1203_v34 = vld [vmem:[#allocation4 + $0xbd8] sm:$0xff]  ;;  %v1265_v45 = vld [vmem:[#allocation4 + $0xdc8] sm:$0xff] }
 0x335   : > { %4030 = vmatpush1.bf16.msra.mxu1 %v4029_v25  ;;  %v4113_v25 = vpack.c.bf16 %v1774_v19, %v1742_v17  ;;  %v4195_v17 = vpack.c.bf16 %v1075_v10, %v1043_v9  ;;  %v1105_v19 = vld [vmem:[#allocation4 + $0x8c8] sm:$0xff]  ;;  %v1235_v46 = vld [vmem:[#allocation4 + $0xcd8] sm:$0xff]  ;;  %v1232_v50 = vld [vmem:[#allocation4 + $0xcc0] sm:$0xff] }
 0x336   : > { %4094 = vmatpush1.bf16.msra.mxu0 %v4093_v26  ;;  %4032 = vmatprep.subr.bf16.mxu1 %v4031_v27  ;;  %v4051_v26 = vpack.c.bf16 %v1837_v21, %v1805_v20  ;;  %v1804_v27 = vld [vmem:[#allocation4 + $0x1ea0] sm:$0xff]  ;;  %v1137_v20 = vld [vmem:[#allocation4 + $0x9c8] sm:$0xff]  ;;  %v1107_v21 = vld [vmem:[#allocation4 + $0x8d8] sm:$0xff] }
 0x337   : > { %4096 = vmatprep.subr.bf16.mxu0 %v4095_v31  ;;  %v1838_v31 = vld [vmem:[#allocation4 + $0x1fb0] sm:$0xff]  ;;  %v4053_v36 = vpack.c.bf16 %v1836_v28, %v1804_v27  ;;  %v1136_v27 = vld [vmem:[#allocation4 + $0x9c0] sm:$0xff] }
 0x338   : > { %v1106_v28 = vld [vmem:[#allocation4 + $0x8d0] sm:$0xff]  ;;  %v1328_v9 = vld [vmem:[#allocation4 + $0xfc0] sm:$0xff] }
 0x339   : > { %4034 = vmatpush1.bf16.msra.mxu1 %v4033_v37  ;;  %v4117_v37 = vpack.c.bf16 %v1838_v31, %v1806_v29  ;;  %v4199_v29 = vpack.c.bf16 %v1139_v22, %v1107_v21  ;;  %v1169_v31 = vld [vmem:[#allocation4 + $0xac8] sm:$0xff]  ;;  %v1298_v10 = vld [vmem:[#allocation4 + $0xed0] sm:$0xff] }
 0x33a   : > { %4098 = vmatpush1.bf16.msra.mxu0 %v4097_v38  ;;  %4036 = vmatprep.subr.bf16.mxu1 %v4035_v39  ;;  %v4119_v38 = vpack.c.bf16 %v881_v33, %v849_v32  ;;  %v848_v39 = vld [vmem:[#allocation4 + $0xc0] sm:$0xff]  ;;  %v1201_v32 = vld [vmem:[#allocation4 + $0xbc8] sm:$0xff]  ;;  %v1171_v33 = vld [vmem:[#allocation4 + $0xad8] sm:$0xff] }
 0x33b   : > { %4100 = vmatprep.subr.bf16.mxu0 %v4099_v43  ;;  %v882_v43 = vld [vmem:[#allocation4 + $0x1d0] sm:$0xff]  ;;  %v4121_v47 = vpack.c.bf16 %v880_v40, %v848_v39  ;;  %v1200_v39 = vld [vmem:[#allocation4 + $0xbc0] sm:$0xff] }
 0x33c   : > { %v1170_v40 = vld [vmem:[#allocation4 + $0xad0] sm:$0xff] }
 0x33d   : > { %4038 = vmatpush1.bf16.msra.mxu1 %v4037_v51  ;;  %v4185_v51 = vpack.c.bf16 %v882_v43, %v850_v42  ;;  %v1202_v42 = vld [vmem:[#allocation4 + $0xbd0] sm:$0xff]  ;;  %v1233_v43 = vld [vmem:[#allocation4 + $0xcc8] sm:$0xff] }
 0x33e   : > { %4102 = vmatpush1.bf16.msra.mxu0 %v4101_v52  ;;  %4040 = vmatprep.subr.bf16.mxu1 %v4039_v53  ;;  %v912_v52 = vld [vmem:[#allocation4 + $0x2c0] sm:$0xff] }
 0x33f   : > { %4104 = vmatprep.subr.bf16.mxu0 %v4103_v57  ;;  %v944_v53 = vld [vmem:[#allocation4 + $0x3c0] sm:$0xff]  ;;  %v977_v57 = vld [vmem:[#allocation4 + $0x4c8] sm:$0xff] }
 0x340   : > { %v4125_v62 = vpack.c.bf16 %v944_v53, %v912_v52  ;;  %v4205_v52 = vpack.c.bf16 %v1202_v42, %v1170_v40  ;;  %v4143_v53 = vpack.c.bf16 %v1265_v45, %v1233_v43  ;;  %v1489_v40 = vld [vmem:[#allocation4 + $0x14c8] sm:$0xff]  ;;  %v1491_v42 = vld [vmem:[#allocation4 + $0x14d8] sm:$0xff] }
 0x341   : > { %4042 = vmatpush1.bf16.msra.mxu1 %v4041_v63  ;;  %v4189_v63 = vpack.c.bf16 %v946_v56, %v914_v54  ;;  %v1234_v54 = vld [vmem:[#allocation4 + $0xcd0] sm:$0xff]  ;;  %v1523_v43 = vld [vmem:[#allocation4 + $0x15d8] sm:$0xff] }
 0x342   : > { %4106 = vmatpush1.bf16.msra.mxu0 %v4105_v1  ;;  %4044 = vmatprep.subr.bf16.mxu1 %v4043_v2  ;;  %v4127_v1 = vpack.c.bf16 %v1009_v58, %v977_v57  ;;  %v976_v2 = vld [vmem:[#allocation4 + $0x4c0] sm:$0xff]  ;;  %v1297_v58 = vld [vmem:[#allocation4 + $0xec8] sm:$0xff] }
 0x343   : > { %4108 = vmatprep.subr.bf16.mxu0 %v4107_v6  ;;  %v1010_v6 = vld [vmem:[#allocation4 + $0x5d0] sm:$0xff]  ;;  %v4129_v11 = vpack.c.bf16 %v1008_v3, %v976_v2 }
 0x345   : > { %4046 = vmatpush1.bf16.msra.mxu1 %v4045_v12  ;;  %v4193_v12 = vpack.c.bf16 %v1010_v6, %v978_v4 }
 0x346   : > { %4110 = vmatpush1.bf16.msra.mxu0 %v4109_v13  ;;  %4048 = vmatprep.subr.bf16.mxu1 %v4047_v14  ;;  %v4131_v13 = vpack.c.bf16 %v1073_v8, %v1041_v7  ;;  %v1040_v14 = vld [vmem:[#allocation4 + $0x6c0] sm:$0xff] }
 0x347   : > { %4112 = vmatprep.subr.bf16.mxu0 %v4111_v18  ;;  %v1074_v18 = vld [vmem:[#allocation4 + $0x7d0] sm:$0xff]  ;;  %v4133_v23 = vpack.c.bf16 %v1072_v15, %v1040_v14  ;;  %v1296_v8 = vld [vmem:[#allocation4 + $0xec0] sm:$0xff]  ;;  %v1361_v15 = vld [vmem:[#allocation4 + $0x10c8] sm:$0xff] }
 0x348   : > { %v1330_v14 = vld [vmem:[#allocation4 + $0xfd0] sm:$0xff] }
 0x349   : > { %4050 = vmatpush1.bf16.msra.mxu1 %v4049_v24  ;;  %v4197_v24 = vpack.c.bf16 %v1074_v18, %v1042_v16  ;;  %v1393_v16 = vld [vmem:[#allocation4 + $0x11c8] sm:$0xff]  ;;  %v1363_v18 = vld [vmem:[#allocation4 + $0x10d8] sm:$0xff]  ;;  %v4213_v21 = vpack.c.bf16 %v1330_v14, %v1298_v10  ;;  %v1616_v10 = vld [vmem:[#allocation4 + $0x18c0] sm:$0xff] }
 0x34a   : > { %4114 = vmatpush1.bf16.msra.mxu0 %v4113_v25  ;;  %4052 = vmatprep.subr.bf16.mxu1 %v4051_v26  ;;  %v4135_v25 = vpack.c.bf16 %v1137_v20, %v1105_v19  ;;  %v1104_v26 = vld [vmem:[#allocation4 + $0x8c0] sm:$0xff]  ;;  %v1395_v19 = vld [vmem:[#allocation4 + $0x11d8] sm:$0xff]  ;;  %v4149_v20 = vpack.c.bf16 %v1328_v9, %v1296_v8  ;;  %v4151_v22 = vpack.c.bf16 %v1393_v16, %v1361_v15  ;;  %v1650_v14 = vld [vmem:[#allocation4 + $0x19d0] sm:$0xff] }
 0x34b   : > { %4116 = vmatprep.subr.bf16.mxu0 %v4115_v30  ;;  %v1138_v30 = vld [vmem:[#allocation4 + $0x9d0] sm:$0xff]  ;;  %v4137_v35 = vpack.c.bf16 %v1136_v27, %v1104_v26  ;;  %v4215_v26 = vpack.c.bf16 %v1395_v19, %v1363_v18  ;;  %v1681_v15 = vld [vmem:[#allocation4 + $0x1ac8] sm:$0xff]  ;;  %v1715_v18 = vld [vmem:[#allocation4 + $0x1bd8] sm:$0xff] }
 0x34c   : > { %v1394_v27 = vld [vmem:[#allocation4 + $0x11d0] sm:$0xff]  ;;  %v1713_v16 = vld [vmem:[#allocation4 + $0x1bc8] sm:$0xff] }
 0x34d   : > { %4054 = vmatpush1.bf16.msra.mxu1 %v4053_v36  ;;  %v4201_v36 = vpack.c.bf16 %v1138_v30, %v1106_v28  ;;  %v1425_v28 = vld [vmem:[#allocation4 + $0x12c8] sm:$0xff]  ;;  %v1427_v30 = vld [vmem:[#allocation4 + $0x12d8] sm:$0xff] }
 0x34e   : > { %4118 = vmatpush1.bf16.msra.mxu0 %v4117_v37  ;;  %4120 = vmatprep.subr.bf16.mxu1 %v4119_v38  ;;  %v4139_v37 = vpack.c.bf16 %v1201_v32, %v1169_v31  ;;  %v1168_v38 = vld [vmem:[#allocation4 + $0xac0] sm:$0xff]  ;;  %v1459_v31 = vld [vmem:[#allocation4 + $0x13d8] sm:$0xff] }
 0x34f   : > { %4184 = vmatprep.subr.bf16.mxu0 %v4183_v41  ;;  %v4203_v41 = vpack.c.bf16 %v1203_v34, %v1171_v33  ;;  %v4141_v48 = vpack.c.bf16 %v1200_v39, %v1168_v38  ;;  %v4219_v38 = vpack.c.bf16 %v1459_v31, %v1427_v30  ;;  %v1458_v39 = vld [vmem:[#allocation4 + $0x13d0] sm:$0xff]  ;;  %v1779_v30 = vld [vmem:[#allocation4 + $0x1dd8] sm:$0xff] }
 0x350   : > { %2623 = vmatmul.mubr.f32.vlgmr.msra.gmra.mrb[14].mxu1 %v4680_v49 }
 0x351   : > { %2694 = vmatmul.mubr.f32.vlgmr.msra.gmra.mrb[12].mxu0 %v4680_v49  ;;  %4122 = vmatpush1.bf16.msra.mxu1 %v4121_v47  ;;  %v1267_v47 = vld [vmem:[#allocation4 + $0xdd8] sm:$0xff] }
 0x352   : > { %2764 = vmatprep.mubr.f32.mxu1 %v4678_v44  ;;  %4186 = vmatpush1.bf16.msra.mxu0 %v4185_v51  ;;  %v1264_v51 = vld [vmem:[#allocation4 + $0xdc0] sm:$0xff]  ;;  %v4207_v57 = vpack.c.bf16 %v1267_v47, %v1235_v46 }
 0x353   : > { %2835 = vmatprep.mubr.f32.mxu0 %v4678_v44  ;;  %4124 = vmatprep.subr.bf16.mxu1 %v4123_v55  ;;  %v1266_v55 = vld [vmem:[#allocation4 + $0xdd0] sm:$0xff] }
 0x354   : > { %4188 = vmatprep.subr.bf16.mxu0 %v4187_v59  ;;  %v1329_v59 = vld [vmem:[#allocation4 + $0xfc8] sm:$0xff]  ;;  %v4209_v4 = vpack.c.bf16 %v1266_v55, %v1234_v54 }
 0x355   : > { %4126 = vmatpush1.bf16.msra.mxu1 %v4125_v62  ;;  %v4145_v62 = vpack.c.bf16 %v1264_v51, %v1232_v50  ;;  %v4147_v7 = vpack.c.bf16 %v1329_v59, %v1297_v58  ;;  %v1520_v50 = vld [vmem:[#allocation4 + $0x15c0] sm:$0xff]  ;;  %v1490_v51 = vld [vmem:[#allocation4 + $0x14d0] sm:$0xff]  ;;  %v1553_v54 = vld [vmem:[#allocation4 + $0x16c8] sm:$0xff] }
 0x356   : > { %4190 = vmatpush1.bf16.msra.mxu0 %v4189_v63  ;;  %4128 = vmatprep.subr.bf16.mxu1 %v4127_v1  ;;  %v1299_v63 = vld [vmem:[#allocation4 + $0xed8] sm:$0xff]  ;;  %v1585_v55 = vld [vmem:[#allocation4 + $0x17c8] sm:$0xff] }
 0x357   : > { %4192 = vmatprep.subr.bf16.mxu0 %v4191_v5  ;;  %v1331_v1 = vld [vmem:[#allocation4 + $0xfd8] sm:$0xff] }
 0x359   : > { %4130 = vmatpush1.bf16.msra.mxu1 %v4129_v11 }
 0x35a   : > { %4194 = vmatpush1.bf16.msra.mxu0 %v4193_v12  ;;  %4132 = vmatprep.subr.bf16.mxu1 %v4131_v13  ;;  %v4211_v13 = vpack.c.bf16 %v1331_v1, %v1299_v63  ;;  %v1554_v63 = vld [vmem:[#allocation4 + $0x16d0] sm:$0xff] }
 0x35b   : > { %4196 = vmatprep.subr.bf16.mxu0 %v4195_v17 }
 0x35d   : > { %4134 = vmatpush1.bf16.msra.mxu1 %v4133_v23  ;;  %v1360_v23 = vld [vmem:[#allocation4 + $0x10c0] sm:$0xff] }
 0x35e   : > { %4198 = vmatpush1.bf16.msra.mxu0 %v4197_v24  ;;  %4136 = vmatprep.subr.bf16.mxu1 %v4135_v25  ;;  %v1392_v24 = vld [vmem:[#allocation4 + $0x11c0] sm:$0xff]  ;;  %v1362_v25 = vld [vmem:[#allocation4 + $0x10d0] sm:$0xff] }
 0x35f   : > { %4200 = vmatprep.subr.bf16.mxu0 %v4199_v29  ;;  %v1457_v29 = vld [vmem:[#allocation4 + $0x13c8] sm:$0xff]  ;;  %v4153_v32 = vpack.c.bf16 %v1392_v24, %v1360_v23  ;;  %v4217_v33 = vpack.c.bf16 %v1394_v27, %v1362_v25  ;;  %v1712_v23 = vld [vmem:[#allocation4 + $0x1bc0] sm:$0xff]  ;;  %v1682_v24 = vld [vmem:[#allocation4 + $0x1ad0] sm:$0xff] }
 0x360   : > { %v4155_v34 = vpack.c.bf16 %v1457_v29, %v1425_v28  ;;  %v1745_v27 = vld [vmem:[#allocation4 + $0x1cc8] sm:$0xff]  ;;  %v1747_v29 = vld [vmem:[#allocation4 + $0x1cd8] sm:$0xff] }
 0x361   : > { %4138 = vmatpush1.bf16.msra.mxu1 %v4137_v35  ;;  %v1424_v35 = vld [vmem:[#allocation4 + $0x12c0] sm:$0xff]  ;;  %v1777_v28 = vld [vmem:[#allocation4 + $0x1dc8] sm:$0xff] }
 0x362   : > { %4202 = vmatpush1.bf16.msra.mxu0 %v4201_v36  ;;  %4140 = vmatprep.subr.bf16.mxu1 %v4139_v37  ;;  %v1456_v36 = vld [vmem:[#allocation4 + $0x13c0] sm:$0xff]  ;;  %v1426_v37 = vld [vmem:[#allocation4 + $0x12d0] sm:$0xff] }
 0x363   : > { %v2198_v56 = vpop.f32.mrb[8].mxu1  ;;  %4204 = vmatprep.subr.bf16.mxu0 %v4203_v41  ;;  %v1521_v41 = vld [vmem:[#allocation4 + $0x15c8] sm:$0xff]  ;;  %v4157_v45 = vpack.c.bf16 %v1456_v36, %v1424_v35  ;;  %v4221_v46 = vpack.c.bf16 %v1458_v39, %v1426_v37  ;;  %v1776_v35 = vld [vmem:[#allocation4 + $0x1dc0] sm:$0xff]  ;;  %v1746_v36 = vld [vmem:[#allocation4 + $0x1cd0] sm:$0xff]  ;;  %v4239_v37 = vpack.c.bf16 %v1779_v30, %v1747_v29 }
 0x364   : > { %vm2992_vm12 = vcmp.gt.f32.partialorder %v2198_v56, 1.0  ;;  %v2269_v60 = vpop.f32.mrb[6].mxu0  ;;  %v2200_v61 = vpop.f32.mrb[9].mxu1  ;;  %v4159_v47 = vpack.c.bf16 %v1521_v41, %v1489_v40  ;;  %v1555_v56 = vld [vmem:[#allocation4 + $0x16d8] sm:$0xff]  ;;  %v1809_v39 = vld [vmem:[#allocation4 + $0x1ec8] sm:$0xff] }
 0x365   : > { %v3320_v2 = vsel %vm2992_vm12, 1.0, %v4495_v0  ;;  %vm2994_vm13 = vcmp.gt.f32.partialorder %v2269_v60, 1.0  ;;  %vm2993_vm14 = vcmp.gt.f32.partialorder %v2200_v61, 1.0  ;;  %v2271_v3 = vpop.f32.mrb[7].mxu0  ;;  %4142 = vmatpush1.bf16.msra.mxu1 %v4141_v48  ;;  %v1488_v48 = vld [vmem:[#allocation4 + $0x14c0] sm:$0xff]  ;;  %v4163_v60 = vpack.c.bf16 %v1585_v55, %v1553_v54  ;;  %v1841_v40 = vld [vmem:[#allocation4 + $0x1fc8] sm:$0xff] }
 0x366   : > { %v3322_v5 = vsel %vm2994_vm13, 1.0, %v4495_v0  ;;  %v3321_v6 = vsel %vm2993_vm14, 1.0, %v4495_v0  ;;  %vm2995_vm15 = vcmp.gt.f32.partialorder %v2271_v3, 1.0  ;;  %4206 = vmatpush1.bf16.msra.mxu0 %v4205_v52  ;;  %4144 = vmatprep.subr.bf16.mxu1 %v4143_v53  ;;  %v4223_v52 = vpack.c.bf16 %v1523_v43, %v1491_v42  ;;  %v1522_v53 = vld [vmem:[#allocation4 + $0x15d0] sm:$0xff]  ;;  %v1552_v61 = vld [vmem:[#allocation4 + $0x16c0] sm:$0xff]  ;;  %v1617_v3 = vld [vmem:[#allocation4 + $0x18c8] sm:$0xff] }
 0x367   : > { %v3116_v11 = vcombine.low %v3320_v2, %v3321_v6  ;;  %v3323_v12 = vsel %vm2995_vm15, 1.0, %v4495_v0  ;;  %4208 = vmatprep.subr.bf16.mxu0 %v4207_v57  ;;  %v1587_v57 = vld [vmem:[#allocation4 + $0x17d8] sm:$0xff]  ;;  %v4161_v58 = vpack.c.bf16 %v1520_v50, %v1488_v48  ;;  %v4225_v59 = vpack.c.bf16 %v1522_v53, %v1490_v51  ;;  %v1586_v2 = vld [vmem:[#allocation4 + $0x17d0] sm:$0xff]  ;;  %v1840_v48 = vld [vmem:[#allocation4 + $0x1fc0] sm:$0xff] }
 0x368   : > { %v3117_v17 = vcombine.low %v3322_v5, %v3323_v12  ;;  %v4227_v1 = vpack.c.bf16 %v1587_v57, %v1555_v56  ;;  %v1619_v5 = vld [vmem:[#allocation4 + $0x18d8] sm:$0xff]  ;;  %v4229_v8 = vpack.c.bf16 %v1586_v2, %v1554_v63  ;;  %v1618_v12 = vld [vmem:[#allocation4 + $0x18d0] sm:$0xff]  ;;  %v853_v53 = vld [vmem:[#allocation4 + $0xe8] sm:$0xff] }
 0x369   : > { %3148 = vst [vmem:[%s4706_s20 + $0x20] sm:$0x77] %v3116_v11  ;;  %4146 = vmatpush1.bf16.msra.mxu1 %v4145_v62  ;;  %v1584_v62 = vld [vmem:[#allocation4 + $0x17c0] sm:$0xff]  ;;  %v1651_v6 = vld [vmem:[#allocation4 + $0x19d8] sm:$0xff]  ;;  %v1810_v50 = vld [vmem:[#allocation4 + $0x1ed0] sm:$0xff] }
 0x36a   : > { %3149 = vst [vmem:[%s4706_s20 + $0x28] sm:$0x77] %v3117_v17  ;;  %4210 = vmatpush1.bf16.msra.mxu0 %v4209_v4  ;;  %4148 = vmatprep.subr.bf16.mxu1 %v4147_v7  ;;  %v1649_v4 = vld [vmem:[#allocation4 + $0x19c8] sm:$0xff]  ;;  %v4165_v7 = vpack.c.bf16 %v1584_v62, %v1552_v61  ;;  %v1648_v11 = vld [vmem:[#allocation4 + $0x19c0] sm:$0xff]  ;;  %v1683_v17 = vld [vmem:[#allocation4 + $0x1ad8] sm:$0xff] }
 0x36b   : > { %4212 = vmatprep.subr.bf16.mxu0 %v4211_v13  ;;  %v4167_v9 = vpack.c.bf16 %v1649_v4, %v1617_v3  ;;  %v4231_v13 = vpack.c.bf16 %v1651_v6, %v1619_v5  ;;  %v4169_v19 = vpack.c.bf16 %v1648_v11, %v1616_v10  ;;  %v4235_v25 = vpack.c.bf16 %v1715_v18, %v1683_v17  ;;  %v1811_v41 = vld [vmem:[#allocation4 + $0x1ed8] sm:$0xff]  ;;  %v885_v54 = vld [vmem:[#allocation4 + $0x1e8] sm:$0xff]  ;;  %v884_v61 = vld [vmem:[#allocation4 + $0x1e0] sm:$0xff] }
 0x36c   : > { %v1843_v42 = vld [vmem:[#allocation4 + $0x1fd8] sm:$0xff]  ;;  %v854_v63 = vld [vmem:[#allocation4 + $0xf0] sm:$0xff]  ;;  %v917_v2 = vld [vmem:[#allocation4 + $0x2e8] sm:$0xff] }
 0x36d   : > { %4150 = vmatpush1.bf16.msra.mxu1 %v4149_v20  ;;  %v4233_v20 = vpack.c.bf16 %v1650_v14, %v1618_v12  ;;  %v4243_v51 = vpack.c.bf16 %v1843_v42, %v1811_v41  ;;  %v855_v55 = vld [vmem:[#allocation4 + $0xf8] sm:$0xff]  ;;  %v949_v3 = vld [vmem:[#allocation4 + $0x3e8] sm:$0xff]  ;;  %v918_v10 = vld [vmem:[#allocation4 + $0x2f0] sm:$0xff] }
 0x36e   : > { %4214 = vmatpush1.bf16.msra.mxu0 %v4213_v21  ;;  %4152 = vmatprep.subr.bf16.mxu1 %v4151_v22  ;;  %v4171_v21 = vpack.c.bf16 %v1713_v16, %v1681_v15  ;;  %v1680_v22 = vld [vmem:[#allocation4 + $0x1ac0] sm:$0xff]  ;;  %v887_v56 = vld [vmem:[#allocation4 + $0x1f8] sm:$0xff]  ;;  %v4251_v11 = vpack.c.bf16 %v949_v3, %v917_v2  ;;  %v950_v12 = vld [vmem:[#allocation4 + $0x3f0] sm:$0xff] }
 0x36f   : > { %4216 = vmatprep.subr.bf16.mxu0 %v4215_v26  ;;  %v1714_v26 = vld [vmem:[#allocation4 + $0x1bd0] sm:$0xff]  ;;  %v4173_v31 = vpack.c.bf16 %v1712_v23, %v1680_v22  ;;  %v4311_v62 = vpack.c.bf16 %v887_v56, %v855_v55  ;;  %v919_v5 = vld [vmem:[#allocation4 + $0x2f8] sm:$0xff]  ;;  %v1013_v14 = vld [vmem:[#allocation4 + $0x5e8] sm:$0xff] }
 0x370   : > { %v951_v6 = vld [vmem:[#allocation4 + $0x3f8] sm:$0xff]  ;;  %v1012_v22 = vld [vmem:[#allocation4 + $0x5e0] sm:$0xff]  ;;  %v982_v23 = vld [vmem:[#allocation4 + $0x4f0] sm:$0xff] }
 0x371   : > { %4154 = vmatpush1.bf16.msra.mxu1 %v4153_v32  ;;  %v4237_v32 = vpack.c.bf16 %v1714_v26, %v1682_v24  ;;  %v4315_v15 = vpack.c.bf16 %v951_v6, %v919_v5  ;;  %v983_v16 = vld [vmem:[#allocation4 + $0x4f8] sm:$0xff]  ;;  %v1045_v26 = vld [vmem:[#allocation4 + $0x6e8] sm:$0xff]  ;;  %v1236_v5 = vld [vmem:[#allocation4 + $0xce0] sm:$0xff] }
 0x372   : > { %4218 = vmatpush1.bf16.msra.mxu0 %v4217_v33  ;;  %4156 = vmatprep.subr.bf16.mxu1 %v4155_v34  ;;  %v4175_v33 = vpack.c.bf16 %v1777_v28, %v1745_v27  ;;  %v1744_v34 = vld [vmem:[#allocation4 + $0x1cc0] sm:$0xff]  ;;  %v1015_v17 = vld [vmem:[#allocation4 + $0x5f8] sm:$0xff]  ;;  %v1077_v27 = vld [vmem:[#allocation4 + $0x7e8] sm:$0xff] }
 0x373   : > { %4220 = vmatprep.subr.bf16.mxu0 %v4219_v38  ;;  %v1778_v38 = vld [vmem:[#allocation4 + $0x1dd0] sm:$0xff]  ;;  %v4177_v43 = vpack.c.bf16 %v1776_v35, %v1744_v34  ;;  %v4319_v24 = vpack.c.bf16 %v1015_v17, %v983_v16  ;;  %v1047_v28 = vld [vmem:[#allocation4 + $0x6f8] sm:$0xff]  ;;  %v1076_v34 = vld [vmem:[#allocation4 + $0x7e0] sm:$0xff] }
 0x374   : > { %v1079_v29 = vld [vmem:[#allocation4 + $0x7f8] sm:$0xff]  ;;  %v1046_v35 = vld [vmem:[#allocation4 + $0x6f0] sm:$0xff]  ;;  %v1268_v6 = vld [vmem:[#allocation4 + $0xde0] sm:$0xff] }
 0x375   : > { %4158 = vmatpush1.bf16.msra.mxu1 %v4157_v45  ;;  %v4241_v45 = vpack.c.bf16 %v1778_v38, %v1746_v36  ;;  %v4323_v36 = vpack.c.bf16 %v1079_v29, %v1047_v28  ;;  %v1141_v38 = vld [vmem:[#allocation4 + $0x9e8] sm:$0xff]  ;;  %v1239_v2 = vld [vmem:[#allocation4 + $0xcf8] sm:$0xff]  ;;  %v4273_v17 = vpack.c.bf16 %v1268_v6, %v1236_v5  ;;  %v1302_v28 = vld [vmem:[#allocation4 + $0xef0] sm:$0xff] }
 0x376   : > { %4222 = vmatpush1.bf16.msra.mxu0 %v4221_v46  ;;  %4160 = vmatprep.subr.bf16.mxu1 %v4159_v47  ;;  %v4179_v46 = vpack.c.bf16 %v1841_v40, %v1809_v39  ;;  %v1808_v47 = vld [vmem:[#allocation4 + $0x1ec0] sm:$0xff]  ;;  %v1111_v39 = vld [vmem:[#allocation4 + $0x8f8] sm:$0xff]  ;;  %v1494_v5 = vld [vmem:[#allocation4 + $0x14f0] sm:$0xff] }
 0x377   : > { %4224 = vmatprep.subr.bf16.mxu0 %v4223_v52  ;;  %v1842_v52 = vld [vmem:[#allocation4 + $0x1fd0] sm:$0xff]  ;;  %v4181_v57 = vpack.c.bf16 %v1840_v48, %v1808_v47  ;;  %v1143_v40 = vld [vmem:[#allocation4 + $0x9f8] sm:$0xff] }
 0x378   : > { %v1110_v47 = vld [vmem:[#allocation4 + $0x8f0] sm:$0xff]  ;;  %v4327_v48 = vpack.c.bf16 %v1143_v40, %v1111_v39  ;;  %v1271_v3 = vld [vmem:[#allocation4 + $0xdf8] sm:$0xff]  ;;  %v1364_v40 = vld [vmem:[#allocation4 + $0x10e0] sm:$0xff] }
 0x379   : > { %4162 = vmatpush1.bf16.msra.mxu1 %v4161_v58  ;;  %v4245_v58 = vpack.c.bf16 %v1842_v52, %v1810_v50  ;;  %v1142_v50 = vld [vmem:[#allocation4 + $0x9f0] sm:$0xff]  ;;  %v1205_v52 = vld [vmem:[#allocation4 + $0xbe8] sm:$0xff] }
 0x37a   : > { %4226 = vmatpush1.bf16.msra.mxu0 %v4225_v59  ;;  %4164 = vmatprep.subr.bf16.mxu1 %v4163_v60  ;;  %v4247_v59 = vpack.c.bf16 %v885_v54, %v853_v53  ;;  %v852_v60 = vld [vmem:[#allocation4 + $0xe0] sm:$0xff]  ;;  %v1175_v53 = vld [vmem:[#allocation4 + $0xaf8] sm:$0xff]  ;;  %v4329_v56 = vpack.c.bf16 %v1142_v50, %v1110_v47  ;;  %v1461_v47 = vld [vmem:[#allocation4 + $0x13e8] sm:$0xff] }
 0x37b   : > { %4228 = vmatprep.subr.bf16.mxu0 %v4227_v1  ;;  %v886_v1 = vld [vmem:[#allocation4 + $0x1f0] sm:$0xff]  ;;  %v4249_v4 = vpack.c.bf16 %v884_v61, %v852_v60  ;;  %v1207_v54 = vld [vmem:[#allocation4 + $0xbf8] sm:$0xff] }
 0x37c   : > { %v1174_v60 = vld [vmem:[#allocation4 + $0xaf0] sm:$0xff]  ;;  %v4331_v61 = vpack.c.bf16 %v1207_v54, %v1175_v53  ;;  %v1463_v50 = vld [vmem:[#allocation4 + $0x13f8] sm:$0xff]  ;;  %v1428_v54 = vld [vmem:[#allocation4 + $0x12e0] sm:$0xff] }
 0x37d   : > { %4166 = vmatpush1.bf16.msra.mxu1 %v4165_v7  ;;  %v4313_v7 = vpack.c.bf16 %v886_v1, %v854_v63  ;;  %v1237_v63 = vld [vmem:[#allocation4 + $0xce8] sm:$0xff] }
 0x37e   : > { %4230 = vmatpush1.bf16.msra.mxu0 %v4229_v8  ;;  %4168 = vmatprep.subr.bf16.mxu1 %v4167_v9  ;;  %v916_v8 = vld [vmem:[#allocation4 + $0x2e0] sm:$0xff]  ;;  %v1269_v1 = vld [vmem:[#allocation4 + $0xde8] sm:$0xff] }
 0x37f   : > { %4232 = vmatprep.subr.bf16.mxu0 %v4231_v13  ;;  %v948_v9 = vld [vmem:[#allocation4 + $0x3e0] sm:$0xff]  ;;  %v981_v13 = vld [vmem:[#allocation4 + $0x4e8] sm:$0xff] }
 0x380   : > { %v4253_v18 = vpack.c.bf16 %v948_v9, %v916_v8  ;;  %v4271_v8 = vpack.c.bf16 %v1269_v1, %v1237_v63  ;;  %v1238_v9 = vld [vmem:[#allocation4 + $0xcf0] sm:$0xff] }
 0x381   : > { %4170 = vmatpush1.bf16.msra.mxu1 %v4169_v19  ;;  %v4317_v19 = vpack.c.bf16 %v950_v12, %v918_v10  ;;  %v1270_v10 = vld [vmem:[#allocation4 + $0xdf0] sm:$0xff]  ;;  %v4335_v12 = vpack.c.bf16 %v1271_v3, %v1239_v2  ;;  %v1492_v3 = vld [vmem:[#allocation4 + $0x14e0] sm:$0xff] }
 0x382   : > { %4234 = vmatpush1.bf16.msra.mxu0 %v4233_v20  ;;  %4172 = vmatprep.subr.bf16.mxu1 %v4171_v21  ;;  %v4255_v20 = vpack.c.bf16 %v1013_v14, %v981_v13  ;;  %v980_v21 = vld [vmem:[#allocation4 + $0x4e0] sm:$0xff]  ;;  %v1301_v13 = vld [vmem:[#allocation4 + $0xee8] sm:$0xff] }
 0x383   : > { %4236 = vmatprep.subr.bf16.mxu0 %v4235_v25  ;;  %v1014_v25 = vld [vmem:[#allocation4 + $0x5f0] sm:$0xff]  ;;  %v4257_v30 = vpack.c.bf16 %v1012_v22, %v980_v21  ;;  %v1333_v14 = vld [vmem:[#allocation4 + $0xfe8] sm:$0xff]  ;;  %v4337_v22 = vpack.c.bf16 %v1270_v10, %v1238_v9  ;;  %v1559_v10 = vld [vmem:[#allocation4 + $0x16f8] sm:$0xff] }
 0x384   : > { %v1589_v9 = vld [vmem:[#allocation4 + $0x17e8] sm:$0xff] }
 0x385   : > { %4174 = vmatpush1.bf16.msra.mxu1 %v4173_v31  ;;  %v4321_v31 = vpack.c.bf16 %v1014_v25, %v982_v23  ;;  %v4275_v25 = vpack.c.bf16 %v1333_v14, %v1301_v13 }
 0x386   : > { %4238 = vmatpush1.bf16.msra.mxu0 %v4237_v32  ;;  %4176 = vmatprep.subr.bf16.mxu1 %v4175_v33  ;;  %v4259_v32 = vpack.c.bf16 %v1077_v27, %v1045_v26  ;;  %v1044_v33 = vld [vmem:[#allocation4 + $0x6e0] sm:$0xff] }
 0x387   : > { %4240 = vmatprep.subr.bf16.mxu0 %v4239_v37  ;;  %v1109_v37 = vld [vmem:[#allocation4 + $0x8e8] sm:$0xff]  ;;  %v4261_v41 = vpack.c.bf16 %v1076_v34, %v1044_v33  ;;  %v1300_v26 = vld [vmem:[#allocation4 + $0xee0] sm:$0xff] }
 0x388   : > { %v1332_v27 = vld [vmem:[#allocation4 + $0xfe0] sm:$0xff]  ;;  %v1365_v33 = vld [vmem:[#allocation4 + $0x10e8] sm:$0xff] }
 0x389   : > { %4178 = vmatpush1.bf16.msra.mxu1 %v4177_v43  ;;  %v4263_v43 = vpack.c.bf16 %v1141_v38, %v1109_v37  ;;  %v1397_v34 = vld [vmem:[#allocation4 + $0x11e8] sm:$0xff]  ;;  %v4277_v37 = vpack.c.bf16 %v1332_v27, %v1300_v26  ;;  %v1620_v27 = vld [vmem:[#allocation4 + $0x18e0] sm:$0xff] }
 0x38a   : > { %4242 = vmatpush1.bf16.msra.mxu0 %v4241_v45  ;;  %4180 = vmatprep.subr.bf16.mxu1 %v4179_v46  ;;  %v1108_v45 = vld [vmem:[#allocation4 + $0x8e0] sm:$0xff]  ;;  %v4279_v39 = vpack.c.bf16 %v1397_v34, %v1365_v33  ;;  %v1717_v33 = vld [vmem:[#allocation4 + $0x1be8] sm:$0xff]  ;;  %v1687_v34 = vld [vmem:[#allocation4 + $0x1af8] sm:$0xff] }
 0x38b   : > { %4244 = vmatprep.subr.bf16.mxu0 %v4243_v51  ;;  %v1140_v46 = vld [vmem:[#allocation4 + $0x9e0] sm:$0xff]  ;;  %v1173_v51 = vld [vmem:[#allocation4 + $0xae8] sm:$0xff] }
 0x38c   : > { %v4265_v55 = vpack.c.bf16 %v1140_v46, %v1108_v45  ;;  %v1398_v45 = vld [vmem:[#allocation4 + $0x11f0] sm:$0xff]  ;;  %v1429_v46 = vld [vmem:[#allocation4 + $0x12e8] sm:$0xff] }
 0x38d   : > { %4182 = vmatpush1.bf16.msra.mxu1 %v4181_v57  ;;  %v4267_v57 = vpack.c.bf16 %v1205_v52, %v1173_v51  ;;  %v4283_v53 = vpack.c.bf16 %v1461_v47, %v1429_v46  ;;  %v1751_v46 = vld [vmem:[#allocation4 + $0x1cf8] sm:$0xff] }
 0x38e   : > { %4246 = vmatpush1.bf16.msra.mxu0 %v4245_v58  ;;  %4248 = vmatprep.subr.bf16.mxu1 %v4247_v59  ;;  %v1172_v58 = vld [vmem:[#allocation4 + $0xae0] sm:$0xff]  ;;  %v1783_v47 = vld [vmem:[#allocation4 + $0x1df8] sm:$0xff] }
 0x38f   : > { %4312 = vmatprep.subr.bf16.mxu0 %v4311_v62  ;;  %v1204_v59 = vld [vmem:[#allocation4 + $0xbe0] sm:$0xff]  ;;  %v1206_v62 = vld [vmem:[#allocation4 + $0xbf0] sm:$0xff] }
 0x390   : > { %2765 = vmatmul.mubr.f32.vlgmr.msra.gmra.mrb[16].mxu1 %v4680_v49 }
 0x391   : > { %2836 = vmatmul.mubr.f32.vlgmr.msra.gmra.mrb[14].mxu0 %v4680_v49  ;;  %4250 = vmatpush1.bf16.msra.mxu1 %v4249_v4  ;;  %v4269_v4 = vpack.c.bf16 %v1204_v59, %v1172_v58  ;;  %v1462_v58 = vld [vmem:[#allocation4 + $0x13f0] sm:$0xff]  ;;  %v1493_v59 = vld [vmem:[#allocation4 + $0x14e8] sm:$0xff] }
 0x392   : > { %2906 = vmatprep.mubr.f32.mxu1 %v4678_v44  ;;  %4314 = vmatpush1.bf16.msra.mxu0 %v4313_v7  ;;  %v4333_v7 = vpack.c.bf16 %v1206_v62, %v1174_v60  ;;  %v1525_v60 = vld [vmem:[#allocation4 + $0x15e8] sm:$0xff]  ;;  %v1527_v62 = vld [vmem:[#allocation4 + $0x15f8] sm:$0xff] }
 0x393   : > { %2977 = vmatprep.mubr.f32.mxu0 %v4678_v44  ;;  %4252 = vmatprep.subr.bf16.mxu1 %v4251_v11  ;;  %v1078_v44 = vld [vmem:[#allocation4 + $0x7f0] sm:$0xff]  ;;  %v4287_v2 = vpack.c.bf16 %v1525_v60, %v1493_v59  ;;  %v1815_v59 = vld [vmem:[#allocation4 + $0x1ef8] sm:$0xff] }
 0x394   : > { %4316 = vmatprep.subr.bf16.mxu0 %v4315_v15  ;;  %v4325_v42 = vpack.c.bf16 %v1078_v44, %v1046_v35  ;;  %v1399_v44 = vld [vmem:[#allocation4 + $0x11f8] sm:$0xff] }
 0x395   : > { %4254 = vmatpush1.bf16.msra.mxu1 %v4253_v18  ;;  %v1303_v18 = vld [vmem:[#allocation4 + $0xef8] sm:$0xff] }
 0x396   : > { %4318 = vmatpush1.bf16.msra.mxu0 %v4317_v19  ;;  %4256 = vmatprep.subr.bf16.mxu1 %v4255_v20  ;;  %v1335_v19 = vld [vmem:[#allocation4 + $0xff8] sm:$0xff] }
 0x397   : > { %4320 = vmatprep.subr.bf16.mxu0 %v4319_v24  ;;  %v1847_v60 = vld [vmem:[#allocation4 + $0x1ff8] sm:$0xff] }
 0x399   : > { %4258 = vmatpush1.bf16.msra.mxu1 %v4257_v30 }
 0x39a   : > { %4322 = vmatpush1.bf16.msra.mxu0 %v4321_v31  ;;  %4260 = vmatprep.subr.bf16.mxu1 %v4259_v32  ;;  %v4339_v31 = vpack.c.bf16 %v1335_v19, %v1303_v18  ;;  %v1334_v32 = vld [vmem:[#allocation4 + $0xff0] sm:$0xff] }
 0x39b   : > { %4324 = vmatprep.subr.bf16.mxu0 %v4323_v36  ;;  %v1367_v36 = vld [vmem:[#allocation4 + $0x10f8] sm:$0xff]  ;;  %v4341_v38 = vpack.c.bf16 %v1334_v32, %v1302_v28  ;;  %v1590_v19 = vld [vmem:[#allocation4 + $0x17f0] sm:$0xff]  ;;  %v1652_v28 = vld [vmem:[#allocation4 + $0x19e0] sm:$0xff] }
 0x39c   : > { %v1685_v32 = vld [vmem:[#allocation4 + $0x1ae8] sm:$0xff] }
 0x39d   : > { %4262 = vmatpush1.bf16.msra.mxu1 %v4261_v41  ;;  %v1396_v41 = vld [vmem:[#allocation4 + $0x11e0] sm:$0xff] }
 0x39e   : > { %4326 = vmatpush1.bf16.msra.mxu0 %v4325_v42  ;;  %4264 = vmatprep.subr.bf16.mxu1 %v4263_v43  ;;  %v1366_v42 = vld [vmem:[#allocation4 + $0x10f0] sm:$0xff]  ;;  %v4343_v43 = vpack.c.bf16 %v1399_v44, %v1367_v36  ;;  %v4281_v51 = vpack.c.bf16 %v1396_v41, %v1364_v40  ;;  %v4297_v36 = vpack.c.bf16 %v1652_v28, %v1620_v27 }
 0x39f   : > { %4328 = vmatprep.subr.bf16.mxu0 %v4327_v48  ;;  %v1431_v48 = vld [vmem:[#allocation4 + $0x12f8] sm:$0xff]  ;;  %v4345_v52 = vpack.c.bf16 %v1398_v45, %v1366_v42  ;;  %v1686_v40 = vld [vmem:[#allocation4 + $0x1af0] sm:$0xff]  ;;  %v1781_v45 = vld [vmem:[#allocation4 + $0x1de8] sm:$0xff] }
 0x3a0   : > { %v1718_v42 = vld [vmem:[#allocation4 + $0x1bf0] sm:$0xff] }
 0x3a1   : > { %4266 = vmatpush1.bf16.msra.mxu1 %v4265_v55  ;;  %v1460_v55 = vld [vmem:[#allocation4 + $0x13e0] sm:$0xff] }
 0x3a2   : > { %4330 = vmatpush1.bf16.msra.mxu0 %v4329_v56  ;;  %4268 = vmatprep.subr.bf16.mxu1 %v4267_v57  ;;  %v1430_v56 = vld [vmem:[#allocation4 + $0x12f0] sm:$0xff]  ;;  %v4347_v57 = vpack.c.bf16 %v1463_v50, %v1431_v48  ;;  %v4285_v63 = vpack.c.bf16 %v1460_v55, %v1428_v54  ;;  %v4365_v50 = vpack.c.bf16 %v1718_v42, %v1686_v40 }
 0x3a3   : > { %v2340_v11 = vpop.f32.mrb[10].mxu1  ;;  %4332 = vmatprep.subr.bf16.mxu0 %v4331_v61  ;;  %v1495_v61 = vld [vmem:[#allocation4 + $0x14f8] sm:$0xff]  ;;  %v4349_v1 = vpack.c.bf16 %v1462_v58, %v1430_v56  ;;  %v1750_v54 = vld [vmem:[#allocation4 + $0x1cf0] sm:$0xff]  ;;  %v4367_v55 = vpack.c.bf16 %v1783_v47, %v1751_v46  ;;  %v1845_v58 = vld [vmem:[#allocation4 + $0x1fe8] sm:$0xff] }
 0x3a4   : > { %vm2996_vm0 = vcmp.gt.f32.partialorder %v2340_v11, 1.0  ;;  %v2411_v15 = vpop.f32.mrb[8].mxu0  ;;  %v2342_v16 = vpop.f32.mrb[11].mxu1  ;;  %v4351_v6 = vpack.c.bf16 %v1527_v62, %v1495_v61  ;;  %v1591_v11 = vld [vmem:[#allocation4 + $0x17f8] sm:$0xff]  ;;  %v1782_v56 = vld [vmem:[#allocation4 + $0x1df0] sm:$0xff] }
 0x3a5   : > { %v3324_v20 = vsel %vm2996_vm0, 1.0, %v4495_v0  ;;  %vm2998_vm1 = vcmp.gt.f32.partialorder %v2411_v15, 1.0  ;;  %vm2997_vm2 = vcmp.gt.f32.partialorder %v2342_v16, 1.0  ;;  %v2413_v21 = vpop.f32.mrb[9].mxu0  ;;  %4270 = vmatpush1.bf16.msra.mxu1 %v4269_v4  ;;  %v1524_v4 = vld [vmem:[#allocation4 + $0x15e0] sm:$0xff]  ;;  %v4355_v18 = vpack.c.bf16 %v1591_v11, %v1559_v10 }
 0x3a6   : > { %v3326_v23 = vsel %vm2998_vm1, 1.0, %v4495_v0  ;;  %v3325_v24 = vsel %vm2997_vm2, 1.0, %v4495_v0  ;;  %vm2999_vm3 = vcmp.gt.f32.partialorder %v2413_v21, 1.0  ;;  %4334 = vmatpush1.bf16.msra.mxu0 %v4333_v7  ;;  %4272 = vmatprep.subr.bf16.mxu1 %v4271_v8  ;;  %v1526_v7 = vld [vmem:[#allocation4 + $0x15f0] sm:$0xff]  ;;  %v1557_v8 = vld [vmem:[#allocation4 + $0x16e8] sm:$0xff]  ;;  %v1556_v15 = vld [vmem:[#allocation4 + $0x16e0] sm:$0xff]  ;;  %v4369_v62 = vpack.c.bf16 %v1782_v56, %v1750_v54 }
 0x3a7   : > { %v3118_v29 = vcombine.low %v3324_v20, %v3325_v24  ;;  %v3327_v30 = vsel %vm2999_vm3, 1.0, %v4495_v0  ;;  %4336 = vmatprep.subr.bf16.mxu0 %v4335_v12  ;;  %v4289_v12 = vpack.c.bf16 %v1524_v4, %v1492_v3  ;;  %v4353_v13 = vpack.c.bf16 %v1526_v7, %v1494_v5  ;;  %v1588_v16 = vld [vmem:[#allocation4 + $0x17e0] sm:$0xff]  ;;  %v1621_v20 = vld [vmem:[#allocation4 + $0x18e8] sm:$0xff]  ;;  %v1814_v4 = vld [vmem:[#allocation4 + $0x1ef0] sm:$0xff] }
 0x3a8   : > { %v3119_v35 = vcombine.low %v3326_v23, %v3327_v30  ;;  %v4291_v14 = vpack.c.bf16 %v1589_v9, %v1557_v8  ;;  %v1653_v21 = vld [vmem:[#allocation4 + $0x19e8] sm:$0xff]  ;;  %v1655_v23 = vld [vmem:[#allocation4 + $0x19f8] sm:$0xff]  ;;  %v4293_v24 = vpack.c.bf16 %v1588_v16, %v1556_v15  ;;  %v4371_v3 = vpack.c.bf16 %v1847_v60, %v1815_v59  ;;  %v1846_v5 = vld [vmem:[#allocation4 + $0x1ff0] sm:$0xff] }
 0x3a9   : > { %3150 = vst [vmem:[%s4706_s20 + $0x30] sm:$0x77] %v3118_v29  ;;  %4274 = vmatpush1.bf16.msra.mxu1 %v4273_v17  ;;  %v1558_v17 = vld [vmem:[#allocation4 + $0x16f0] sm:$0xff]  ;;  %v4295_v26 = vpack.c.bf16 %v1653_v21, %v1621_v20  ;;  %v4373_v7 = vpack.c.bf16 %v1846_v5, %v1814_v4 }
 0x3aa   : > { %3151 = vst [vmem:[%s4706_s20 + $0x38] sm:$0x77] %v3119_v35  ;;  %4338 = vmatpush1.bf16.msra.mxu0 %v4337_v22  ;;  %4276 = vmatprep.subr.bf16.mxu1 %v4275_v25  ;;  %v1623_v22 = vld [vmem:[#allocation4 + $0x18f8] sm:$0xff]  ;;  %v4357_v25 = vpack.c.bf16 %v1590_v19, %v1558_v17  ;;  %v1622_v29 = vld [vmem:[#allocation4 + $0x18f0] sm:$0xff] }
 0x3ab   : > { %4340 = vmatprep.subr.bf16.mxu0 %v4339_v31  ;;  %v4359_v30 = vpack.c.bf16 %v1655_v23, %v1623_v22  ;;  %v1654_v31 = vld [vmem:[#allocation4 + $0x19f0] sm:$0xff]  ;;  %v1719_v35 = vld [vmem:[#allocation4 + $0x1bf8] sm:$0xff] }
 0x3ac   : > { %v4361_v44 = vpack.c.bf16 %v1654_v31, %v1622_v29  ;;  %v4363_v41 = vpack.c.bf16 %v1719_v35, %v1687_v34 }
 0x3ad   : > { %4278 = vmatpush1.bf16.msra.mxu1 %v4277_v37  ;;  %v4299_v37 = vpack.c.bf16 %v1717_v33, %v1685_v32 }
 0x3ae   : > { %4342 = vmatpush1.bf16.msra.mxu0 %v4341_v38  ;;  %4280 = vmatprep.subr.bf16.mxu1 %v4279_v39  ;;  %v1684_v38 = vld [vmem:[#allocation4 + $0x1ae0] sm:$0xff] }
 0x3af   : > { %4344 = vmatprep.subr.bf16.mxu0 %v4343_v43  ;;  %v1716_v39 = vld [vmem:[#allocation4 + $0x1be0] sm:$0xff]  ;;  %v1749_v43 = vld [vmem:[#allocation4 + $0x1ce8] sm:$0xff] }
 0x3b0   : > { %v4301_v48 = vpack.c.bf16 %v1716_v39, %v1684_v38 }
 0x3b1   : > { %4282 = vmatpush1.bf16.msra.mxu1 %v4281_v51  ;;  %v4303_v51 = vpack.c.bf16 %v1781_v45, %v1749_v43 }
 0x3b2   : > { %4346 = vmatpush1.bf16.msra.mxu0 %v4345_v52  ;;  %4284 = vmatprep.subr.bf16.mxu1 %v4283_v53  ;;  %v1748_v52 = vld [vmem:[#allocation4 + $0x1ce0] sm:$0xff] }
 0x3b3   : > { %4348 = vmatprep.subr.bf16.mxu0 %v4347_v57  ;;  %v1780_v53 = vld [vmem:[#allocation4 + $0x1de0] sm:$0xff]  ;;  %v1813_v57 = vld [vmem:[#allocation4 + $0x1ee8] sm:$0xff] }
 0x3b4   : > { %v4305_v61 = vpack.c.bf16 %v1780_v53, %v1748_v52 }
 0x3b5   : > { %4286 = vmatpush1.bf16.msra.mxu1 %v4285_v63  ;;  %v4307_v63 = vpack.c.bf16 %v1845_v58, %v1813_v57 }
 0x3b6   : > { %4350 = vmatpush1.bf16.msra.mxu0 %v4349_v1  ;;  %4288 = vmatprep.subr.bf16.mxu1 %v4287_v2  ;;  %v1812_v1 = vld [vmem:[#allocation4 + $0x1ee0] sm:$0xff] }
 0x3b7   : > { %4352 = vmatprep.subr.bf16.mxu0 %v4351_v6  ;;  %v1844_v2 = vld [vmem:[#allocation4 + $0x1fe0] sm:$0xff] }
 0x3b8   : > { %v4309_v6 = vpack.c.bf16 %v1844_v2, %v1812_v1 }
 0x3b9   : > { %4290 = vmatpush1.bf16.msra.mxu1 %v4289_v12 }
 0x3ba   : > { %4354 = vmatpush1.bf16.msra.mxu0 %v4353_v13  ;;  %4292 = vmatprep.subr.bf16.mxu1 %v4291_v14 }
 0x3bb   : > { %4356 = vmatprep.subr.bf16.mxu0 %v4355_v18 }
 0x3bd   : > { %4294 = vmatpush1.bf16.msra.mxu1 %v4293_v24 }
 0x3be   : > { %4358 = vmatpush1.bf16.msra.mxu0 %v4357_v25  ;;  %4296 = vmatprep.subr.bf16.mxu1 %v4295_v26 }
 0x3bf   : > { %4360 = vmatprep.subr.bf16.mxu0 %v4359_v30 }
 0x3c1   : > { %4298 = vmatpush1.bf16.msra.mxu1 %v4297_v36 }
 0x3c2   : > { %4362 = vmatpush1.bf16.msra.mxu0 %v4361_v44  ;;  %4300 = vmatprep.subr.bf16.mxu1 %v4299_v37 }
 0x3c3   : > { %4364 = vmatprep.subr.bf16.mxu0 %v4363_v41 }
 0x3c5   : > { %4302 = vmatpush1.bf16.msra.mxu1 %v4301_v48 }
 0x3c6   : > { %4366 = vmatpush1.bf16.msra.mxu0 %v4365_v50  ;;  %4304 = vmatprep.subr.bf16.mxu1 %v4303_v51 }
 0x3c7   : > { %4368 = vmatprep.subr.bf16.mxu0 %v4367_v55 }
 0x3c9   : > { %4306 = vmatpush1.bf16.msra.mxu1 %v4305_v61 }
 0x3ca   : > { %4370 = vmatpush1.bf16.msra.mxu0 %v4369_v62  ;;  %4308 = vmatprep.subr.bf16.mxu1 %v4307_v63 }
 0x3cb   : > { %4372 = vmatprep.subr.bf16.mxu0 %v4371_v3 }
 0x3cd   : > { %4310 = vmatpush1.bf16.msra.mxu1 %v4309_v6 }
 0x3ce   : > { %4374 = vmatpush1.bf16.msra.mxu0 %v4373_v7 }
 0x3d0   : > { %2907 = vmatmul.mubr.f32.vlgmr.msra.gmra.mrb[18].mxu1 %v4680_v49 }
 0x3d1   : > { %2978 = vmatmul.mubr.f32.vlgmr.msra.gmra.mrb[16].mxu0 %v4680_v49 }
 0x3e3   : > { %v2482_v8 = vpop.f32.mrb[12].mxu1 }
 0x3e4   : > { %vm3000_vm4 = vcmp.gt.f32.partialorder %v2482_v8, 1.0  ;;  %v2553_v9 = vpop.f32.mrb[10].mxu0  ;;  %v2484_v10 = vpop.f32.mrb[13].mxu1 }
 0x3e5   : > { %v3328_v11 = vsel %vm3000_vm4, 1.0, %v4495_v0  ;;  %vm3002_vm5 = vcmp.gt.f32.partialorder %v2553_v9, 1.0  ;;  %vm3001_vm6 = vcmp.gt.f32.partialorder %v2484_v10, 1.0  ;;  %v2555_v12 = vpop.f32.mrb[11].mxu0 }
 0x3e6   : > { %v3330_v13 = vsel %vm3002_vm5, 1.0, %v4495_v0  ;;  %v3329_v14 = vsel %vm3001_vm6, 1.0, %v4495_v0  ;;  %vm3003_vm7 = vcmp.gt.f32.partialorder %v2555_v12, 1.0 }
 0x3e7   : > { %v3120_v15 = vcombine.low %v3328_v11, %v3329_v14  ;;  %v3331_v16 = vsel %vm3003_vm7, 1.0, %v4495_v0 }
 0x3e8   : > { %v3121_v17 = vcombine.low %v3330_v13, %v3331_v16 }
 0x3e9   : > { %3152 = vst [vmem:[%s4706_s20 + $0x40] sm:$0x77] %v3120_v15 }
 0x3ea   : > { %3153 = vst [vmem:[%s4706_s20 + $0x48] sm:$0x77] %v3121_v17 }
 0x423   : > { %v2624_v49 = vpop.f32.mrb[14].mxu1 }
 0x424   : > { %vm3004_vm8 = vcmp.gt.f32.partialorder %v2624_v49, 1.0  ;;  %v2695_v18 = vpop.f32.mrb[12].mxu0  ;;  %v2626_v19 = vpop.f32.mrb[15].mxu1 }
 0x425   : > { %v3332_v20 = vsel %vm3004_vm8, 1.0, %v4495_v0  ;;  %vm3006_vm9 = vcmp.gt.f32.partialorder %v2695_v18, 1.0  ;;  %vm3005_vm10 = vcmp.gt.f32.partialorder %v2626_v19, 1.0  ;;  %v2697_v21 = vpop.f32.mrb[13].mxu0 }
 0x426   : > { %v3334_v22 = vsel %vm3006_vm9, 1.0, %v4495_v0  ;;  %v3333_v23 = vsel %vm3005_vm10, 1.0, %v4495_v0  ;;  %vm3007_vm11 = vcmp.gt.f32.partialorder %v2697_v21, 1.0 }
 0x427   : > { %v3122_v24 = vcombine.low %v3332_v20, %v3333_v23  ;;  %v3335_v25 = vsel %vm3007_vm11, 1.0, %v4495_v0 }
 0x428   : > { %v3123_v26 = vcombine.low %v3334_v22, %v3335_v25 }
 0x429   : > { %3154 = vst [vmem:[%s4706_s20 + $0x50] sm:$0x77] %v3122_v24 }
 0x42a   : > { %3155 = vst [vmem:[%s4706_s20 + $0x58] sm:$0x77] %v3123_v26 }
 0x463   : > { %v2766_v27 = vpop.f32.mrb[16].mxu1 }
 0x464   : > { %vm3008_vm12 = vcmp.gt.f32.partialorder %v2766_v27, 1.0  ;;  %v2837_v28 = vpop.f32.mrb[14].mxu0  ;;  %v2768_v29 = vpop.f32.mrb[17].mxu1 }
 0x465   : > { %v3336_v30 = vsel %vm3008_vm12, 1.0, %v4495_v0  ;;  %vm3010_vm13 = vcmp.gt.f32.partialorder %v2837_v28, 1.0  ;;  %vm3009_vm14 = vcmp.gt.f32.partialorder %v2768_v29, 1.0  ;;  %v2839_v31 = vpop.f32.mrb[15].mxu0 }
 0x466   : > { %v3338_v32 = vsel %vm3010_vm13, 1.0, %v4495_v0  ;;  %v3337_v33 = vsel %vm3009_vm14, 1.0, %v4495_v0  ;;  %vm3011_vm15 = vcmp.gt.f32.partialorder %v2839_v31, 1.0 }
 0x467   : > { %v3124_v34 = vcombine.low %v3336_v30, %v3337_v33  ;;  %v3339_v35 = vsel %vm3011_vm15, 1.0, %v4495_v0 }
 0x468   : > { %v3125_v36 = vcombine.low %v3338_v32, %v3339_v35 }
 0x469   : > { %3156 = vst [vmem:[%s4706_s20 + $0x60] sm:$0x77] %v3124_v34 }
 0x46a   : > { %3157 = vst [vmem:[%s4706_s20 + $0x68] sm:$0x77] %v3125_v36 }
 0x4a3   : > { %v2908_v44 = vpop.f32.mrb[18].mxu1 }
 0x4a4   : > { %vm3012_vm0 = vcmp.gt.f32.partialorder %v2908_v44, 1.0  ;;  %v2979_v37 = vpop.f32.mrb[16].mxu0  ;;  %v2910_v38 = vpop.f32.mrb[19].mxu1 }
 0x4a5   : > { %v3340_v39 = vsel %vm3012_vm0, 1.0, %v4495_v0  ;;  %vm3014_vm1 = vcmp.gt.f32.partialorder %v2979_v37, 1.0  ;;  %vm3013_vm2 = vcmp.gt.f32.partialorder %v2910_v38, 1.0  ;;  %v2981_v40 = vpop.f32.mrb[17].mxu0 }
 0x4a6   : > { %v3342_v41 = vsel %vm3014_vm1, 1.0, %v4495_v0  ;;  %v3341_v42 = vsel %vm3013_vm2, 1.0, %v4495_v0  ;;  %vm3015_vm3 = vcmp.gt.f32.partialorder %v2981_v40, 1.0 }
 0x4a7   : > { %v3126_v43 = vcombine.low %v3340_v39, %v3341_v42  ;;  %v3343_v45 = vsel %vm3015_vm3, 1.0, %v4495_v0 }
 0x4a8   : > { %v3127_v46 = vcombine.low %v3342_v41, %v3343_v45 }
 0x4a9   : > { %3158 = vst [vmem:[%s4706_s20 + $0x70] sm:$0x77] %v3126_v43 }
 0x4aa   : > { %3159 = vst [vmem:[%s4706_s20 + $0x78] sm:$0x77] %v3127_v46 }
 0x4ab PF: > { %s20_s27 = sadd.s32 1, %s4489_s27  }
 0x4ac   : > { %p17_p5 = scmp.ge.s32.totalorder %s20_s27, 4  }
 0x4ae   :  { %19 = sbr.rel (!%p17_p5) target bundleno = 2 (0x2), region = 103 }
 0x4b5   :  { %3181 = vsyncpa [#allocation3], 1 }
 0x4b6   :  { %3183 = vsyncpa [#allocation3 + $0x1], 1 }
 0x4b7   :  { %3184 = vsyncpa [#allocation5], 1 }

</bundles_post_ra>
